<compile_context>
chip_gen: v6e
topology: v6e:2x2x1
jax: 0.10.0
libtpu: 0.0.40
codegen_flags: <defaults>
</compile_context>

<pallas_src>
import functools

import numpy as np
import jax
import jax.numpy as jnp
from jax.experimental import pallas as pl
from jax.experimental.pallas import tpu as pltpu


# ----------------------------- small helpers -----------------------------

def window_partition(x, window_size):
    B, H, W, C = x.shape
    x = x.reshape(B, H // window_size, window_size, W // window_size, window_size, C)
    return x.transpose(0, 1, 3, 2, 4, 5).reshape(-1, window_size, window_size, C)


def window_reverse(windows, window_size, H, W):
    B = windows.shape[0] // (H * W // window_size // window_size)
    x = windows.reshape(B, H // window_size, W // window_size, window_size, window_size, -1)
    return x.transpose(0, 1, 3, 2, 4, 5).reshape(B, H, W, -1)


def _gelu_exact(x):
    # PyTorch nn.GELU default (erf-based)
    return 0.5 * x * (1.0 + jax.lax.erf(x * 0.7071067811865476))


def _softmax_last(x):
    m = jnp.max(x, axis=-1, keepdims=True)
    e = jnp.exp(x - m)
    return e / jnp.sum(e, axis=-1, keepdims=True)


def make_relative_position_index(ws):
    coords_h = np.arange(ws)
    coords_w = np.arange(ws)
    coords = np.stack(np.meshgrid(coords_h, coords_w, indexing="ij"))   # (2, ws, ws)
    coords_flatten = coords.reshape(2, -1)                              # (2, N)
    rel = coords_flatten[:, :, None] - coords_flatten[:, None, :]       # (2, N, N)
    rel = rel.transpose(1, 2, 0).copy()                                 # (N, N, 2)
    rel[:, :, 0] += ws - 1
    rel[:, :, 1] += ws - 1
    rel[:, :, 0] *= 2 * ws - 1
    return rel.sum(-1)                                                  # (N, N) int


def make_shift_attn_mask(H, W, window_size, shift_size):
    img_mask = np.zeros((1, H, W, 1), np.float32)
    cnt = 0
    h_slices = (slice(0, -window_size), slice(-window_size, -shift_size), slice(-shift_size, None))
    w_slices = (slice(0, -window_size), slice(-window_size, -shift_size), slice(-shift_size, None))
    for hs in h_slices:
        for wsl in w_slices:
            img_mask[:, hs, wsl, :] = cnt
            cnt += 1
    mw = np.asarray(window_partition(jnp.asarray(img_mask), window_size))
    mw = mw.reshape(-1, window_size * window_size)                      # (nW, N)
    attn_mask = mw[:, None, :] - mw[:, :, None]                         # (nW, N, N)
    attn_mask = np.where(attn_mask != 0, -100.0, 0.0).astype(np.float32)
    return jnp.asarray(attn_mask)


def _pick_row_tile(M):
    for t in (512, 256, 128, 64, 32, 16, 8):
        if M % t == 0:
            return t
    return M


# ----------------------------- Pallas kernels -----------------------------

def _attn_block_kernel(x_ref, g_ref, b_ref, qkvw_ref, qkvb_ref, pw_ref, pb_ref,
                       bias_ref, mask_ref, o_ref,
                       *, num_heads, head_dim, n_win, n_tok, eps):
    """Fused LayerNorm1 + window MHSA for all windows of one image.

    x_ref  : (1, n_win*n_tok, C)  tokens in window_partition order
    bias   : (num_heads, N, N)    relative position bias (resident)
    mask   : (n_win, N, N)        shift mask (zeros when no shift, resident)
    """
    C = num_heads * head_dim
    M = n_win * n_tok
    scale = head_dim ** (-0.5)

    x = x_ref[0].astype(jnp.float32)                          # (M, C)

    # --- LayerNorm (norm1), fused into the matmul prologue ---
    mu = jnp.mean(x, axis=-1, keepdims=True)
    var = jnp.mean((x - mu) * (x - mu), axis=-1, keepdims=True)
    xn = (x - mu) * jax.lax.rsqrt(var + eps) * g_ref[0] + b_ref[0]

    # --- QKV projection for all windows at once (one big MXU push) ---
    qkv = jnp.dot(xn, qkvw_ref[...], preferred_element_type=jnp.float32) + qkvb_ref[0]
    qkv = qkv.reshape(n_win, n_tok, 3 * C)                    # (nW, N, 3C)

    mask = mask_ref[...]                                      # (nW, N, N)

    head_outs = []
    for h in range(num_heads):                                # static, small
        q = qkv[:, :, h * head_dim:(h + 1) * head_dim] * scale
        k = qkv[:, :, C + h * head_dim:C + (h + 1) * head_dim]
        v = qkv[:, :, 2 * C + h * head_dim:2 * C + (h + 1) * head_dim]
        # batched over windows: (nW, N, hd) x (nW, N, hd) -> (nW, N, N)
        s = jnp.einsum('wnd,wmd->wnm', q, k, preferred_element_type=jnp.float32)
        s = s + bias_ref[h][None, :, :] + mask
        # softmax; one reciprocal per row instead of N divides per row
        m = jnp.max(s, axis=-1, keepdims=True)
        e = jnp.exp(s - m)
        p = e * (1.0 / jnp.sum(e, axis=-1, keepdims=True))
        head_outs.append(jnp.einsum('wnm,wmd->wnd', p, v,
                                    preferred_element_type=jnp.float32))
    out = jnp.concatenate(head_outs, axis=-1).reshape(M, C)   # head-major channels

    # --- output projection ---
    out = jnp.dot(out, pw_ref[...], preferred_element_type=jnp.float32) + pb_ref[0]
    o_ref[0] = out.astype(o_ref.dtype)


def pallas_fused_window_attention(xw, p, *, num_heads, n_win, n_tok):
    """xw: (B, nW*N, C) tokens in window_partition order, per-image contiguous."""
    B, M, C = xw.shape
    assert M == n_win * n_tok
    hd = C // num_heads
    kern = functools.partial(_attn_block_kernel, num_heads=num_heads, head_dim=hd,
                             n_win=n_win, n_tok=n_tok, eps=1e-5)
    return pl.pallas_call(
        kern,
        out_shape=jax.ShapeDtypeStruct((B, M, C), xw.dtype),
        grid=(B,),
        in_specs=[
            pl.BlockSpec((1, M, C), lambda b: (b, 0, 0)),
            pl.BlockSpec((1, C), lambda b: (0, 0)),
            pl.BlockSpec((1, C), lambda b: (0, 0)),
            pl.BlockSpec((C, 3 * C), lambda b: (0, 0)),
            pl.BlockSpec((1, 3 * C), lambda b: (0, 0)),
            pl.BlockSpec((C, C), lambda b: (0, 0)),
            pl.BlockSpec((1, C), lambda b: (0, 0)),
            pl.BlockSpec((num_heads, n_tok, n_tok), lambda b: (0, 0, 0)),
            pl.BlockSpec((n_win, n_tok, n_tok), lambda b: (0, 0, 0)),
        ],
        out_specs=pl.BlockSpec((1, M, C), lambda b: (b, 0, 0)),
        compiler_params=pltpu.CompilerParams(dimension_semantics=("parallel",)),
    )(xw, p["norm1_g"], p["norm1_b"], p["qkv_w"], p["qkv_b"],
      p["proj_w"], p["proj_b"], p["rel_bias"], p["mask"])


def _residual_mlp_kernel(x_ref, y_ref, g_ref, b_ref, w1_ref, b1_ref, w2_ref, b2_ref,
                         o_ref, *, eps):
    """Fused: x1 = shortcut + 2*attn ; out = x1 + fc2(gelu(fc1(LN2(x1))))."""
    x1 = x_ref[...].astype(jnp.float32) + 2.0 * y_ref[...].astype(jnp.float32)
    mu = jnp.mean(x1, axis=-1, keepdims=True)
    var = jnp.mean((x1 - mu) * (x1 - mu), axis=-1, keepdims=True)
    xn = (x1 - mu) * jax.lax.rsqrt(var + eps) * g_ref[0] + b_ref[0]
    h = jnp.dot(xn, w1_ref[...], preferred_element_type=jnp.float32) + b1_ref[0]
    h = _gelu_exact(h)
    out = x1 + jnp.dot(h, w2_ref[...], preferred_element_type=jnp.float32) + b2_ref[0]
    o_ref[...] = out.astype(o_ref.dtype)


def pallas_residual_mlp(x2d, y2d, g, b, w1, b1, w2, b2):
    M, C = x2d.shape
    Hd = w1.shape[1]
    TM = _pick_row_tile(M)                     # row tiling -> scales to v7x VMEM
    kern = functools.partial(_residual_mlp_kernel, eps=1e-5)
    return pl.pallas_call(
        kern,
        out_shape=jax.ShapeDtypeStruct((M, C), x2d.dtype),
        grid=(M // TM,),
        in_specs=[
            pl.BlockSpec((TM, C), lambda i: (i, 0)),
            pl.BlockSpec((TM, C), lambda i: (i, 0)),
            pl.BlockSpec((1, C), lambda i: (0, 0)),
            pl.BlockSpec((1, C), lambda i: (0, 0)),
            pl.BlockSpec((C, Hd), lambda i: (0, 0)),
            pl.BlockSpec((1, Hd), lambda i: (0, 0)),
            pl.BlockSpec((Hd, C), lambda i: (0, 0)),
            pl.BlockSpec((1, C), lambda i: (0, 0)),
        ],
        out_specs=pl.BlockSpec((TM, C), lambda i: (i, 0)),
        compiler_params=pltpu.CompilerParams(dimension_semantics=("parallel",)),
    )(x2d, y2d, g, b, w1, b1, w2, b2)


# ----------------------------- block / layer forward -----------------------------

def swin_block_forward(x, p, *, H, W, window_size, shift_size, num_heads):
    B, L, C = x.shape
    ws = window_size
    N = ws * ws
    nW = (H // ws) * (W // ws)

    xs = x.reshape(B, H, W, C)
    if shift_size > 0:
        xs = jnp.roll(xs, shift=(-shift_size, -shift_size), axis=(1, 2))

    # window partition (XLA glue); per-image windows are contiguous -> (B, nW*N, C)
    xw = window_partition(xs, ws).reshape(B, nW * N, C)

    attn = pallas_fused_window_attention(xw, p, num_heads=num_heads, n_win=nW, n_tok=N)

    attn = attn.reshape(B * nW, ws, ws, C)
    shifted = window_reverse(attn, ws, H, W)
    if shift_size > 0:
        shifted = jnp.roll(shifted, shift=(shift_size, shift_size), axis=(1, 2))
    y = shifted.reshape(B * L, C)

    # adapter == Identity => memory_attn == perception_attn => shortcut + 2*attn,
    # fused with LN2 + MLP + residual inside one kernel.
    out = pallas_residual_mlp(x.reshape(B * L, C), y,
                              p["norm2_g"], p["norm2_b"],
                              p["fc1_w"], p["fc1_b"], p["fc2_w"], p["fc2_b"])
    return out.reshape(B, L, C)


def basic_layer_forward(x, block_params, *, H, W, window_size, num_heads):
    for i, p in enumerate(block_params):
        shift = 0 if i % 2 == 0 else window_size // 2
        x = swin_block_forward(x, p, H=H, W=W, window_size=window_size,
                               shift_size=shift, num_heads=num_heads)
    # downsample is None
    return x


# ----------------------------- pure-JAX reference -----------------------------

def _ref_ln(x, g, b, eps=1e-5):
    mu = jnp.mean(x, axis=-1, keepdims=True)
    var = jnp.mean((x - mu) ** 2, axis=-1, keepdims=True)
    return (x - mu) * jax.lax.rsqrt(var + eps) * g[0] + b[0]


def _ref_block(x, p, *, H, W, window_size, shift_size, num_heads):
    B, L, C = x.shape
    N = window_size * window_size
    hd = C // num_heads
    scale = hd ** (-0.5)
    shortcut = x
    xn = _ref_ln(x.reshape(-1, C), p["norm1_g"], p["norm1_b"]).reshape(B, H, W, C)
    if shift_size > 0:
        xn = jnp.roll(xn, shift=(-shift_size, -shift_size), axis=(1, 2))
    xw = window_partition(xn, window_size).reshape(-1, N, C)
    nWB = xw.shape[0]

    rel_bias = p["rel_table"][p["rel_index"].reshape(-1)].reshape(N, N, num_heads)
    rel_bias = jnp.transpose(rel_bias, (2, 0, 1))
    if shift_size > 0:
        bias_all = rel_bias[None] + jnp.tile(p["attn_mask"], (B, 1, 1))[:, None]
    else:
        bias_all = jnp.broadcast_to(rel_bias[None], (nWB, num_heads, N, N))

    qkv = xw @ p["qkv_w"] + p["qkv_b"][0]
    qkv = qkv.reshape(nWB, N, 3, num_heads, hd).transpose(2, 0, 3, 1, 4)
    q, k, v = qkv[0] * scale, qkv[1], qkv[2]
    attn = jnp.einsum("bhnd,bhmd->bhnm", q, k) + bias_all
    attn = _softmax_last(attn)
    out = jnp.einsum("bhnm,bhmd->bhnd", attn, v).transpose(0, 2, 1, 3).reshape(nWB, N, C)
    out = out @ p["proj_w"] + p["proj_b"][0]

    out = out.reshape(-1, window_size, window_size, C)
    shifted = window_reverse(out, window_size, H, W)
    if shift_size > 0:
        shifted = jnp.roll(shifted, shift=(shift_size, shift_size), axis=(1, 2))
    perception = shifted.reshape(B, H * W, C)
    x = shortcut + 2.0 * perception

    xn2 = _ref_ln(x.reshape(-1, C), p["norm2_g"], p["norm2_b"])
    h = _gelu_exact(xn2 @ p["fc1_w"] + p["fc1_b"][0])
    mlp_out = (h @ p["fc2_w"] + p["fc2_b"][0]).reshape(B, L, C)
    return x + mlp_out


def _ref_layer(x, block_params, *, H, W, window_size, num_heads):
    for i, p in enumerate(block_params):
        shift = 0 if i % 2 == 0 else window_size // 2
        x = _ref_block(x, p, H=H, W=W, window_size=window_size,
                       shift_size=shift, num_heads=num_heads)
    return x


# ----------------------------- params -----------------------------

def init_block_params(key, dim, num_heads, window_size, mlp_ratio, H, W, shift_size):
    ks = jax.random.split(key, 8)
    hidden = int(dim * mlp_ratio)
    N = window_size * window_size
    nW = (H // window_size) * (W // window_size)
    rel_index = jnp.asarray(make_relative_position_index(window_size), jnp.int32)
    rel_table = 0.02 * jax.random.normal(
        ks[4], ((2 * window_size - 1) ** 2, num_heads), jnp.float32)
    # (nH, N, N) relative position bias, precomputed once (parameter-derived).
    rel_bias = jnp.transpose(
        rel_table[rel_index.reshape(-1)].reshape(N, N, num_heads), (2, 0, 1))
    p = {
        "norm1_g": jnp.ones((1, dim), jnp.float32),
        "norm1_b": jnp.zeros((1, dim), jnp.float32),
        "qkv_w": 0.02 * jax.random.normal(ks[0], (dim, 3 * dim), jnp.float32),
        "qkv_b": 0.02 * jax.random.normal(ks[1], (1, 3 * dim), jnp.float32),
        "proj_w": 0.02 * jax.random.normal(ks[2], (dim, dim), jnp.float32),
        "proj_b": 0.02 * jax.random.normal(ks[3], (1, dim), jnp.float32),
        "rel_table": rel_table,
        "rel_index": rel_index,
        "rel_bias": rel_bias,
        "norm2_g": jnp.ones((1, dim), jnp.float32),
        "norm2_b": jnp.zeros((1, dim), jnp.float32),
        "fc1_w": 0.02 * jax.random.normal(ks[5], (dim, hidden), jnp.float32),
        "fc1_b": jnp.zeros((1, hidden), jnp.float32),
        "fc2_w": 0.02 * jax.random.normal(ks[6], (hidden, dim), jnp.float32),
        "fc2_b": jnp.zeros((1, dim), jnp.float32),
    }
    if shift_size > 0:
        am = make_shift_attn_mask(H, W, window_size, shift_size)
        p["attn_mask"] = am              # reference path
        p["mask"] = am                   # pallas path (nW, N, N)
    else:
        p["mask"] = jnp.zeros((nW, N, N), jnp.float32)
    return p


# ----------------------------- main -----------------------------

if __name__ == "__main__":
    # BasicLayer config (small): dim=32, input_resolution=(8,8), depth=2,
    # num_heads=4, window_size=4, mlp_ratio=4.0 -> block 0 no shift, block 1 shift=2
    B, H, W = 2, 8, 8
    dim, depth, num_heads, window_size, mlp_ratio = 32, 2, 4, 4, 4.0

    root = jax.random.PRNGKey(0)
    kx, kp = jax.random.split(root)
    x = jax.random.normal(kx, (B, H * W, dim), jnp.float32)

    pkeys = jax.random.split(kp, depth)
    block_params = []
    for i in range(depth):
        shift = 0 if i % 2 == 0 else window_size // 2
        block_params.append(
            init_block_params(pkeys[i], dim, num_heads, window_size, mlp_ratio, H, W, shift))

    fwd = jax.jit(functools.partial(basic_layer_forward, H=H, W=W,
                                    window_size=window_size, num_heads=num_heads))
    out = jax.block_until_ready(fwd(x, block_params))

    ref = jax.block_until_ready(
        _ref_layer(x, block_params, H=H, W=W, window_size=window_size,
                   num_heads=num_heads))

    max_diff = float(jnp.max(jnp.abs(out - ref)))
    assert out.shape == (B, H * W, dim), out.shape
    assert max_diff < 1e-3, f"max diff {max_diff}"
    print("KERNEL_OK")
</pallas_src>

<mosaic_0001>
module attributes {stable_mosaic.version = 11 : i64} {
  func.func @_attn_block_kernel(%arg0: i32, %arg1: memref<1x64x32xf32, #tpu.memory_space<vmem>>, %arg2: memref<1x32xf32, #tpu.memory_space<vmem>>, %arg3: memref<1x32xf32, #tpu.memory_space<vmem>>, %arg4: memref<32x96xf32, #tpu.memory_space<vmem>>, %arg5: memref<1x96xf32, #tpu.memory_space<vmem>>, %arg6: memref<32x32xf32, #tpu.memory_space<vmem>>, %arg7: memref<1x32xf32, #tpu.memory_space<vmem>>, %arg8: memref<4x16x16xf32, #tpu.memory_space<vmem>>, %arg9: memref<4x16x16xf32, #tpu.memory_space<vmem>>, %arg10: memref<1x64x32xf32, #tpu.memory_space<vmem>>) attributes {dimension_semantics = [#tpu.dimension_semantics<parallel>], iteration_bounds = array<i64: 2>, scalar_prefetch = 0 : i64, scratch_operands = 0 : i64, tpu.core_type = #tpu.core_type<tc>, window_params = [{transform_indices = @transform_0, window_bounds = array<i64: 1, 64, 32>}, {pipeline_mode = #tpu.pipeline_mode<synchronous>, transform_indices = @transform_1, window_bounds = array<i64: 1, 32>}, {pipeline_mode = #tpu.pipeline_mode<synchronous>, transform_indices = @transform_2, window_bounds = array<i64: 1, 32>}, {pipeline_mode = #tpu.pipeline_mode<synchronous>, transform_indices = @transform_3, window_bounds = array<i64: 32, 96>}, {pipeline_mode = #tpu.pipeline_mode<synchronous>, transform_indices = @transform_4, window_bounds = array<i64: 1, 96>}, {pipeline_mode = #tpu.pipeline_mode<synchronous>, transform_indices = @transform_5, window_bounds = array<i64: 32, 32>}, {pipeline_mode = #tpu.pipeline_mode<synchronous>, transform_indices = @transform_6, window_bounds = array<i64: 1, 32>}, {pipeline_mode = #tpu.pipeline_mode<synchronous>, transform_indices = @transform_7, window_bounds = array<i64: 4, 16, 16>}, {pipeline_mode = #tpu.pipeline_mode<synchronous>, transform_indices = @transform_8, window_bounds = array<i64: 4, 16, 16>}, {transform_indices = @transform_9, window_bounds = array<i64: 1, 64, 32>}]} {
    %c0 = arith.constant 0 : index
    %c0_0 = arith.constant 0 : index
    %c0_1 = arith.constant 0 : index
    %0 = vector.load %arg1[%c0, %c0_0, %c0_1] : memref<1x64x32xf32, #tpu.memory_space<vmem>>, vector<1x64x32xf32>
    %1 = vector.shape_cast %0 : vector<1x64x32xf32> to vector<64x32xf32>
    %cst = arith.constant dense<0.000000e+00> : vector<64xf32>
    %2 = vector.multi_reduction <add>, %1, %cst [1] : vector<64x32xf32> to vector<64xf32>
    %3 = vector.shape_cast %2 : vector<64xf32> to vector<64x1xf32>
    %cst_2 = arith.constant 3.200000e+01 : f32
    %4 = vector.broadcast %cst_2 : f32 to vector<64x1xf32>
    %5 = arith.divf %3, %4 : vector<64x1xf32>
    %6 = vector.broadcast %5 : vector<64x1xf32> to vector<64x32xf32>
    %7 = arith.subf %1, %6 : vector<64x32xf32>
    %8 = vector.broadcast %5 : vector<64x1xf32> to vector<64x32xf32>
    %9 = arith.subf %1, %8 : vector<64x32xf32>
    %10 = arith.mulf %7, %9 : vector<64x32xf32>
    %cst_3 = arith.constant dense<0.000000e+00> : vector<64xf32>
    %11 = vector.multi_reduction <add>, %10, %cst_3 [1] : vector<64x32xf32> to vector<64xf32>
    %12 = vector.shape_cast %11 : vector<64xf32> to vector<64x1xf32>
    %cst_4 = arith.constant 3.200000e+01 : f32
    %13 = vector.broadcast %cst_4 : f32 to vector<64x1xf32>
    %14 = arith.divf %12, %13 : vector<64x1xf32>
    %15 = vector.broadcast %5 : vector<64x1xf32> to vector<64x32xf32>
    %16 = arith.subf %1, %15 : vector<64x32xf32>
    %cst_5 = arith.constant 9.99999974E-6 : f32
    %17 = vector.broadcast %cst_5 : f32 to vector<64x1xf32>
    %18 = arith.addf %14, %17 : vector<64x1xf32>
    %19 = math.rsqrt %18 : vector<64x1xf32>
    %20 = vector.broadcast %19 : vector<64x1xf32> to vector<64x32xf32>
    %21 = arith.mulf %16, %20 : vector<64x32xf32>
    %c0_6 = arith.constant 0 : index
    %c0_7 = arith.constant 0 : index
    %22 = vector.load %arg2[%c0_6, %c0_7] : memref<1x32xf32, #tpu.memory_space<vmem>>, vector<1x32xf32>
    %23 = vector.shape_cast %22 : vector<1x32xf32> to vector<32xf32>
    %24 = vector.shape_cast %23 : vector<32xf32> to vector<1x32xf32>
    %25 = vector.broadcast %24 : vector<1x32xf32> to vector<64x32xf32>
    %26 = arith.mulf %21, %25 : vector<64x32xf32>
    %c0_8 = arith.constant 0 : index
    %c0_9 = arith.constant 0 : index
    %27 = vector.load %arg3[%c0_8, %c0_9] : memref<1x32xf32, #tpu.memory_space<vmem>>, vector<1x32xf32>
    %28 = vector.shape_cast %27 : vector<1x32xf32> to vector<32xf32>
    %29 = vector.shape_cast %28 : vector<32xf32> to vector<1x32xf32>
    %30 = vector.broadcast %29 : vector<1x32xf32> to vector<64x32xf32>
    %31 = arith.addf %26, %30 : vector<64x32xf32>
    %c0_10 = arith.constant 0 : index
    %c0_11 = arith.constant 0 : index
    %32 = vector.load %arg4[%c0_10, %c0_11] : memref<32x96xf32, #tpu.memory_space<vmem>>, vector<32x96xf32>
    %cst_12 = arith.constant dense<0.000000e+00> : vector<64x96xf32>
    %33 = tpu.matmul %31, %32, %cst_12 {dimension_numbers = #tpu.dot_dimension_numbers<[1], [0], [0], [1], [0, 0, 1, 1], [], []>} : vector<64x32xf32>, vector<32x96xf32>, vector<64x96xf32> -> vector<64x96xf32>
    %c0_13 = arith.constant 0 : index
    %c0_14 = arith.constant 0 : index
    %34 = vector.load %arg5[%c0_13, %c0_14] : memref<1x96xf32, #tpu.memory_space<vmem>>, vector<1x96xf32>
    %35 = vector.shape_cast %34 : vector<1x96xf32> to vector<96xf32>
    %36 = vector.shape_cast %35 : vector<96xf32> to vector<1x96xf32>
    %37 = vector.broadcast %36 : vector<1x96xf32> to vector<64x96xf32>
    %38 = arith.addf %33, %37 : vector<64x96xf32>
    %39 = vector.shape_cast %38 : vector<64x96xf32> to vector<4x16x96xf32>
    %c0_15 = arith.constant 0 : index
    %c0_16 = arith.constant 0 : index
    %c0_17 = arith.constant 0 : index
    %40 = vector.load %arg9[%c0_15, %c0_16, %c0_17] : memref<4x16x16xf32, #tpu.memory_space<vmem>>, vector<4x16x16xf32>
    %41 = vector.extract_strided_slice %39 {offsets = [0, 0, 0], sizes = [4, 16, 8], strides = [1, 1, 1]} : vector<4x16x96xf32> to vector<4x16x8xf32>
    %cst_18 = arith.constant 0.353553385 : f32
    %42 = vector.broadcast %cst_18 : f32 to vector<4x16x8xf32>
    %43 = arith.mulf %41, %42 : vector<4x16x8xf32>
    %44 = vector.extract_strided_slice %39 {offsets = [0, 0, 32], sizes = [4, 16, 8], strides = [1, 1, 1]} : vector<4x16x96xf32> to vector<4x16x8xf32>
    %45 = vector.extract_strided_slice %39 {offsets = [0, 0, 64], sizes = [4, 16, 8], strides = [1, 1, 1]} : vector<4x16x96xf32> to vector<4x16x8xf32>
    "tpu.trace_start"() <{level = 10 : i32, message = "wnd,wmd->wnm"}> : () -> ()
    %cst_19 = arith.constant dense<0.000000e+00> : vector<4x16x16xf32>
    %46 = tpu.matmul %43, %44, %cst_19 {dimension_numbers = #tpu.dot_dimension_numbers<[2], [2], [1], [1], [0, 0, 0, 1, 1, 1], [0], [0]>} : vector<4x16x8xf32>, vector<4x16x8xf32>, vector<4x16x16xf32> -> vector<4x16x16xf32>
    "tpu.trace_stop"() : () -> ()
    %c0_20 = arith.constant 0 : index
    %c0_21 = arith.constant 0 : index
    %c0_22 = arith.constant 0 : index
    %47 = vector.load %arg8[%c0_20, %c0_21, %c0_22] : memref<4x16x16xf32, #tpu.memory_space<vmem>>, vector<1x16x16xf32>
    %48 = vector.shape_cast %47 : vector<1x16x16xf32> to vector<16x16xf32>
    %49 = vector.shape_cast %48 : vector<16x16xf32> to vector<1x16x16xf32>
    %50 = vector.broadcast %49 : vector<1x16x16xf32> to vector<4x16x16xf32>
    %51 = arith.addf %46, %50 : vector<4x16x16xf32>
    %52 = arith.addf %51, %40 : vector<4x16x16xf32>
    %cst_23 = arith.constant dense<0xFF800000> : vector<4x16xf32>
    %53 = vector.multi_reduction <maximumf>, %52, %cst_23 [2] : vector<4x16x16xf32> to vector<4x16xf32>
    %54 = vector.shape_cast %53 : vector<4x16xf32> to vector<4x16x1xf32>
    %55 = vector.broadcast %54 : vector<4x16x1xf32> to vector<4x16x16xf32>
    %56 = arith.subf %52, %55 : vector<4x16x16xf32>
    %57 = math.exp %56 : vector<4x16x16xf32>
    %cst_24 = arith.constant dense<0.000000e+00> : vector<4x16xf32>
    %58 = vector.multi_reduction <add>, %57, %cst_24 [2] : vector<4x16x16xf32> to vector<4x16xf32>
    %59 = vector.shape_cast %58 : vector<4x16xf32> to vector<4x16x1xf32>
    %cst_25 = arith.constant 1.000000e+00 : f32
    %60 = vector.broadcast %cst_25 : f32 to vector<4x16x1xf32>
    %61 = arith.divf %60, %59 : vector<4x16x1xf32>
    %62 = vector.broadcast %61 : vector<4x16x1xf32> to vector<4x16x16xf32>
    %63 = arith.mulf %57, %62 : vector<4x16x16xf32>
    "tpu.trace_start"() <{level = 10 : i32, message = "wnm,wmd->wnd"}> : () -> ()
    %cst_26 = arith.constant dense<0.000000e+00> : vector<4x16x8xf32>
    %64 = tpu.matmul %63, %45, %cst_26 {dimension_numbers = #tpu.dot_dimension_numbers<[2], [1], [1], [2], [0, 0, 0, 1, 1, 2], [0], [0]>} : vector<4x16x16xf32>, vector<4x16x8xf32>, vector<4x16x8xf32> -> vector<4x16x8xf32>
    "tpu.trace_stop"() : () -> ()
    %65 = vector.extract_strided_slice %39 {offsets = [0, 0, 8], sizes = [4, 16, 8], strides = [1, 1, 1]} : vector<4x16x96xf32> to vector<4x16x8xf32>
    %cst_27 = arith.constant 0.353553385 : f32
    %66 = vector.broadcast %cst_27 : f32 to vector<4x16x8xf32>
    %67 = arith.mulf %65, %66 : vector<4x16x8xf32>
    %68 = vector.extract_strided_slice %39 {offsets = [0, 0, 40], sizes = [4, 16, 8], strides = [1, 1, 1]} : vector<4x16x96xf32> to vector<4x16x8xf32>
    %69 = vector.extract_strided_slice %39 {offsets = [0, 0, 72], sizes = [4, 16, 8], strides = [1, 1, 1]} : vector<4x16x96xf32> to vector<4x16x8xf32>
    "tpu.trace_start"() <{level = 10 : i32, message = "wnd,wmd->wnm"}> : () -> ()
    %cst_28 = arith.constant dense<0.000000e+00> : vector<4x16x16xf32>
    %70 = tpu.matmul %67, %68, %cst_28 {dimension_numbers = #tpu.dot_dimension_numbers<[2], [2], [1], [1], [0, 0, 0, 1, 1, 1], [0], [0]>} : vector<4x16x8xf32>, vector<4x16x8xf32>, vector<4x16x16xf32> -> vector<4x16x16xf32>
    "tpu.trace_stop"() : () -> ()
    %c1 = arith.constant 1 : index
    %c0_29 = arith.constant 0 : index
    %c0_30 = arith.constant 0 : index
    %71 = vector.load %arg8[%c1, %c0_29, %c0_30] : memref<4x16x16xf32, #tpu.memory_space<vmem>>, vector<1x16x16xf32>
    %72 = vector.shape_cast %71 : vector<1x16x16xf32> to vector<16x16xf32>
    %73 = vector.shape_cast %72 : vector<16x16xf32> to vector<1x16x16xf32>
    %74 = vector.broadcast %73 : vector<1x16x16xf32> to vector<4x16x16xf32>
    %75 = arith.addf %70, %74 : vector<4x16x16xf32>
    %76 = arith.addf %75, %40 : vector<4x16x16xf32>
    %cst_31 = arith.constant dense<0xFF800000> : vector<4x16xf32>
    %77 = vector.multi_reduction <maximumf>, %76, %cst_31 [2] : vector<4x16x16xf32> to vector<4x16xf32>
    %78 = vector.shape_cast %77 : vector<4x16xf32> to vector<4x16x1xf32>
    %79 = vector.broadcast %78 : vector<4x16x1xf32> to vector<4x16x16xf32>
    %80 = arith.subf %76, %79 : vector<4x16x16xf32>
    %81 = math.exp %80 : vector<4x16x16xf32>
    %cst_32 = arith.constant dense<0.000000e+00> : vector<4x16xf32>
    %82 = vector.multi_reduction <add>, %81, %cst_32 [2] : vector<4x16x16xf32> to vector<4x16xf32>
    %83 = vector.shape_cast %82 : vector<4x16xf32> to vector<4x16x1xf32>
    %cst_33 = arith.constant 1.000000e+00 : f32
    %84 = vector.broadcast %cst_33 : f32 to vector<4x16x1xf32>
    %85 = arith.divf %84, %83 : vector<4x16x1xf32>
    %86 = vector.broadcast %85 : vector<4x16x1xf32> to vector<4x16x16xf32>
    %87 = arith.mulf %81, %86 : vector<4x16x16xf32>
    "tpu.trace_start"() <{level = 10 : i32, message = "wnm,wmd->wnd"}> : () -> ()
    %cst_34 = arith.constant dense<0.000000e+00> : vector<4x16x8xf32>
    %88 = tpu.matmul %87, %69, %cst_34 {dimension_numbers = #tpu.dot_dimension_numbers<[2], [1], [1], [2], [0, 0, 0, 1, 1, 2], [0], [0]>} : vector<4x16x16xf32>, vector<4x16x8xf32>, vector<4x16x8xf32> -> vector<4x16x8xf32>
    "tpu.trace_stop"() : () -> ()
    %89 = vector.extract_strided_slice %39 {offsets = [0, 0, 16], sizes = [4, 16, 8], strides = [1, 1, 1]} : vector<4x16x96xf32> to vector<4x16x8xf32>
    %cst_35 = arith.constant 0.353553385 : f32
    %90 = vector.broadcast %cst_35 : f32 to vector<4x16x8xf32>
    %91 = arith.mulf %89, %90 : vector<4x16x8xf32>
    %92 = vector.extract_strided_slice %39 {offsets = [0, 0, 48], sizes = [4, 16, 8], strides = [1, 1, 1]} : vector<4x16x96xf32> to vector<4x16x8xf32>
    %93 = vector.extract_strided_slice %39 {offsets = [0, 0, 80], sizes = [4, 16, 8], strides = [1, 1, 1]} : vector<4x16x96xf32> to vector<4x16x8xf32>
    "tpu.trace_start"() <{level = 10 : i32, message = "wnd,wmd->wnm"}> : () -> ()
    %cst_36 = arith.constant dense<0.000000e+00> : vector<4x16x16xf32>
    %94 = tpu.matmul %91, %92, %cst_36 {dimension_numbers = #tpu.dot_dimension_numbers<[2], [2], [1], [1], [0, 0, 0, 1, 1, 1], [0], [0]>} : vector<4x16x8xf32>, vector<4x16x8xf32>, vector<4x16x16xf32> -> vector<4x16x16xf32>
    "tpu.trace_stop"() : () -> ()
    %c2 = arith.constant 2 : index
    %c0_37 = arith.constant 0 : index
    %c0_38 = arith.constant 0 : index
    %95 = vector.load %arg8[%c2, %c0_37, %c0_38] : memref<4x16x16xf32, #tpu.memory_space<vmem>>, vector<1x16x16xf32>
    %96 = vector.shape_cast %95 : vector<1x16x16xf32> to vector<16x16xf32>
    %97 = vector.shape_cast %96 : vector<16x16xf32> to vector<1x16x16xf32>
    %98 = vector.broadcast %97 : vector<1x16x16xf32> to vector<4x16x16xf32>
    %99 = arith.addf %94, %98 : vector<4x16x16xf32>
    %100 = arith.addf %99, %40 : vector<4x16x16xf32>
    %cst_39 = arith.constant dense<0xFF800000> : vector<4x16xf32>
    %101 = vector.multi_reduction <maximumf>, %100, %cst_39 [2] : vector<4x16x16xf32> to vector<4x16xf32>
    %102 = vector.shape_cast %101 : vector<4x16xf32> to vector<4x16x1xf32>
    %103 = vector.broadcast %102 : vector<4x16x1xf32> to vector<4x16x16xf32>
    %104 = arith.subf %100, %103 : vector<4x16x16xf32>
    %105 = math.exp %104 : vector<4x16x16xf32>
    %cst_40 = arith.constant dense<0.000000e+00> : vector<4x16xf32>
    %106 = vector.multi_reduction <add>, %105, %cst_40 [2] : vector<4x16x16xf32> to vector<4x16xf32>
    %107 = vector.shape_cast %106 : vector<4x16xf32> to vector<4x16x1xf32>
    %cst_41 = arith.constant 1.000000e+00 : f32
    %108 = vector.broadcast %cst_41 : f32 to vector<4x16x1xf32>
    %109 = arith.divf %108, %107 : vector<4x16x1xf32>
    %110 = vector.broadcast %109 : vector<4x16x1xf32> to vector<4x16x16xf32>
    %111 = arith.mulf %105, %110 : vector<4x16x16xf32>
    "tpu.trace_start"() <{level = 10 : i32, message = "wnm,wmd->wnd"}> : () -> ()
    %cst_42 = arith.constant dense<0.000000e+00> : vector<4x16x8xf32>
    %112 = tpu.matmul %111, %93, %cst_42 {dimension_numbers = #tpu.dot_dimension_numbers<[2], [1], [1], [2], [0, 0, 0, 1, 1, 2], [0], [0]>} : vector<4x16x16xf32>, vector<4x16x8xf32>, vector<4x16x8xf32> -> vector<4x16x8xf32>
    "tpu.trace_stop"() : () -> ()
    %113 = vector.extract_strided_slice %39 {offsets = [0, 0, 24], sizes = [4, 16, 8], strides = [1, 1, 1]} : vector<4x16x96xf32> to vector<4x16x8xf32>
    %cst_43 = arith.constant 0.353553385 : f32
    %114 = vector.broadcast %cst_43 : f32 to vector<4x16x8xf32>
    %115 = arith.mulf %113, %114 : vector<4x16x8xf32>
    %116 = vector.extract_strided_slice %39 {offsets = [0, 0, 56], sizes = [4, 16, 8], strides = [1, 1, 1]} : vector<4x16x96xf32> to vector<4x16x8xf32>
    %117 = vector.extract_strided_slice %39 {offsets = [0, 0, 88], sizes = [4, 16, 8], strides = [1, 1, 1]} : vector<4x16x96xf32> to vector<4x16x8xf32>
    "tpu.trace_start"() <{level = 10 : i32, message = "wnd,wmd->wnm"}> : () -> ()
    %cst_44 = arith.constant dense<0.000000e+00> : vector<4x16x16xf32>
    %118 = tpu.matmul %115, %116, %cst_44 {dimension_numbers = #tpu.dot_dimension_numbers<[2], [2], [1], [1], [0, 0, 0, 1, 1, 1], [0], [0]>} : vector<4x16x8xf32>, vector<4x16x8xf32>, vector<4x16x16xf32> -> vector<4x16x16xf32>
    "tpu.trace_stop"() : () -> ()
    %c3 = arith.constant 3 : index
    %c0_45 = arith.constant 0 : index
    %c0_46 = arith.constant 0 : index
    %119 = vector.load %arg8[%c3, %c0_45, %c0_46] : memref<4x16x16xf32, #tpu.memory_space<vmem>>, vector<1x16x16xf32>
    %120 = vector.shape_cast %119 : vector<1x16x16xf32> to vector<16x16xf32>
    %121 = vector.shape_cast %120 : vector<16x16xf32> to vector<1x16x16xf32>
    %122 = vector.broadcast %121 : vector<1x16x16xf32> to vector<4x16x16xf32>
    %123 = arith.addf %118, %122 : vector<4x16x16xf32>
    %124 = arith.addf %123, %40 : vector<4x16x16xf32>
    %cst_47 = arith.constant dense<0xFF800000> : vector<4x16xf32>
    %125 = vector.multi_reduction <maximumf>, %124, %cst_47 [2] : vector<4x16x16xf32> to vector<4x16xf32>
    %126 = vector.shape_cast %125 : vector<4x16xf32> to vector<4x16x1xf32>
    %127 = vector.broadcast %126 : vector<4x16x1xf32> to vector<4x16x16xf32>
    %128 = arith.subf %124, %127 : vector<4x16x16xf32>
    %129 = math.exp %128 : vector<4x16x16xf32>
    %cst_48 = arith.constant dense<0.000000e+00> : vector<4x16xf32>
    %130 = vector.multi_reduction <add>, %129, %cst_48 [2] : vector<4x16x16xf32> to vector<4x16xf32>
    %131 = vector.shape_cast %130 : vector<4x16xf32> to vector<4x16x1xf32>
    %cst_49 = arith.constant 1.000000e+00 : f32
    %132 = vector.broadcast %cst_49 : f32 to vector<4x16x1xf32>
    %133 = arith.divf %132, %131 : vector<4x16x1xf32>
    %134 = vector.broadcast %133 : vector<4x16x1xf32> to vector<4x16x16xf32>
    %135 = arith.mulf %129, %134 : vector<4x16x16xf32>
    "tpu.trace_start"() <{level = 10 : i32, message = "wnm,wmd->wnd"}> : () -> ()
    %cst_50 = arith.constant dense<0.000000e+00> : vector<4x16x8xf32>
    %136 = tpu.matmul %135, %117, %cst_50 {dimension_numbers = #tpu.dot_dimension_numbers<[2], [1], [1], [2], [0, 0, 0, 1, 1, 2], [0], [0]>} : vector<4x16x16xf32>, vector<4x16x8xf32>, vector<4x16x8xf32> -> vector<4x16x8xf32>
    "tpu.trace_stop"() : () -> ()
    %137 = tpu.concatenate %64, %88, %112, %136 in 2 : vector<4x16x8xf32>, vector<4x16x8xf32>, vector<4x16x8xf32>, vector<4x16x8xf32> -> vector<4x16x32xf32>
    %138 = vector.shape_cast %137 : vector<4x16x32xf32> to vector<64x32xf32>
    %c0_51 = arith.constant 0 : index
    %c0_52 = arith.constant 0 : index
    %139 = vector.load %arg6[%c0_51, %c0_52] : memref<32x32xf32, #tpu.memory_space<vmem>>, vector<32x32xf32>
    %cst_53 = arith.constant dense<0.000000e+00> : vector<64x32xf32>
    %140 = tpu.matmul %138, %139, %cst_53 {dimension_numbers = #tpu.dot_dimension_numbers<[1], [0], [0], [1], [0, 0, 1, 1], [], []>} : vector<64x32xf32>, vector<32x32xf32>, vector<64x32xf32> -> vector<64x32xf32>
    %c0_54 = arith.constant 0 : index
    %c0_55 = arith.constant 0 : index
    %141 = vector.load %arg7[%c0_54, %c0_55] : memref<1x32xf32, #tpu.memory_space<vmem>>, vector<1x32xf32>
    %142 = vector.shape_cast %141 : vector<1x32xf32> to vector<32xf32>
    %143 = vector.shape_cast %142 : vector<32xf32> to vector<1x32xf32>
    %144 = vector.broadcast %143 : vector<1x32xf32> to vector<64x32xf32>
    %145 = arith.addf %140, %144 : vector<64x32xf32>
    %c0_56 = arith.constant 0 : index
    %c0_57 = arith.constant 0 : index
    %c0_58 = arith.constant 0 : index
    %146 = vector.load %arg10[%c0_56, %c0_57, %c0_58] : memref<1x64x32xf32, #tpu.memory_space<vmem>>, vector<1x64x32xf32>
    %147 = vector.shape_cast %146 : vector<1x64x32xf32> to vector<64x32xf32>
    %148 = vector.shape_cast %145 : vector<64x32xf32> to vector<1x64x32xf32>
    tpu.vector_store %arg10[%c0_56, %c0_57, %c0_58], %148 {strides = array<i32>} : memref<1x64x32xf32, #tpu.memory_space<vmem>>, vector<1x64x32xf32>,
    return
  }
  func.func @transform_0(%arg0: i32) -> (i32, i32, i32) {
    %c0_i32 = arith.constant 0 : i32
    %c0_i32_0 = arith.constant 0 : i32
    %c0_i32_1 = arith.constant 0 : i32
    return %arg0, %c0_i32, %c0_i32_0 : i32, i32, i32
  }
  func.func @transform_1(%arg0: i32) -> (i32, i32) {
    %c0_i32 = arith.constant 0 : i32
    %c0_i32_0 = arith.constant 0 : i32
    %c0_i32_1 = arith.constant 0 : i32
    return %c0_i32, %c0_i32_0 : i32, i32
  }
  func.func @transform_2(%arg0: i32) -> (i32, i32) {
    %c0_i32 = arith.constant 0 : i32
    %c0_i32_0 = arith.constant 0 : i32
    %c0_i32_1 = arith.constant 0 : i32
    return %c0_i32, %c0_i32_0 : i32, i32
  }
  func.func @transform_3(%arg0: i32) -> (i32, i32) {
    %c0_i32 = arith.constant 0 : i32
    %c0_i32_0 = arith.constant 0 : i32
    %c0_i32_1 = arith.constant 0 : i32
    return %c0_i32, %c0_i32_0 : i32, i32
  }
  func.func @transform_4(%arg0: i32) -> (i32, i32) {
    %c0_i32 = arith.constant 0 : i32
    %c0_i32_0 = arith.constant 0 : i32
    %c0_i32_1 = arith.constant 0 : i32
    return %c0_i32, %c0_i32_0 : i32, i32
  }
  func.func @transform_5(%arg0: i32) -> (i32, i32) {
    %c0_i32 = arith.constant 0 : i32
    %c0_i32_0 = arith.constant 0 : i32
    %c0_i32_1 = arith.constant 0 : i32
    return %c0_i32, %c0_i32_0 : i32, i32
  }
  func.func @transform_6(%arg0: i32) -> (i32, i32) {
    %c0_i32 = arith.constant 0 : i32
    %c0_i32_0 = arith.constant 0 : i32
    %c0_i32_1 = arith.constant 0 : i32
    return %c0_i32, %c0_i32_0 : i32, i32
  }
  func.func @transform_7(%arg0: i32) -> (i32, i32, i32) {
    %c0_i32 = arith.constant 0 : i32
    %c0_i32_0 = arith.constant 0 : i32
    %c0_i32_1 = arith.constant 0 : i32
    %c0_i32_2 = arith.constant 0 : i32
    return %c0_i32, %c0_i32_0, %c0_i32_1 : i32, i32, i32
  }
  func.func @transform_8(%arg0: i32) -> (i32, i32, i32) {
    %c0_i32 = arith.constant 0 : i32
    %c0_i32_0 = arith.constant 0 : i32
    %c0_i32_1 = arith.constant 0 : i32
    %c0_i32_2 = arith.constant 0 : i32
    return %c0_i32, %c0_i32_0, %c0_i32_1 : i32, i32, i32
  }
  func.func @transform_9(%arg0: i32) -> (i32, i32, i32) {
    %c0_i32 = arith.constant 0 : i32
    %c0_i32_0 = arith.constant 0 : i32
    %c0_i32_1 = arith.constant 0 : i32
    return %arg0, %c0_i32, %c0_i32_0 : i32, i32, i32
  }
}

module attributes {stable_mosaic.version = 11 : i64} {
  func.func @_residual_mlp_kernel(%arg0: i32, %arg1: memref<128x32xf32, #tpu.memory_space<vmem>>, %arg2: memref<128x32xf32, #tpu.memory_space<vmem>>, %arg3: memref<1x32xf32, #tpu.memory_space<vmem>>, %arg4: memref<1x32xf32, #tpu.memory_space<vmem>>, %arg5: memref<32x128xf32, #tpu.memory_space<vmem>>, %arg6: memref<1x128xf32, #tpu.memory_space<vmem>>, %arg7: memref<128x32xf32, #tpu.memory_space<vmem>>, %arg8: memref<1x32xf32, #tpu.memory_space<vmem>>, %arg9: memref<128x32xf32, #tpu.memory_space<vmem>>) attributes {dimension_semantics = [#tpu.dimension_semantics<parallel>], iteration_bounds = array<i64: 1>, scalar_prefetch = 0 : i64, scratch_operands = 0 : i64, tpu.core_type = #tpu.core_type<tc>, window_params = [{transform_indices = @transform_0, window_bounds = array<i64: 128, 32>}, {transform_indices = @transform_1, window_bounds = array<i64: 128, 32>}, {pipeline_mode = #tpu.pipeline_mode<synchronous>, transform_indices = @transform_2, window_bounds = array<i64: 1, 32>}, {pipeline_mode = #tpu.pipeline_mode<synchronous>, transform_indices = @transform_3, window_bounds = array<i64: 1, 32>}, {pipeline_mode = #tpu.pipeline_mode<synchronous>, transform_indices = @transform_4, window_bounds = array<i64: 32, 128>}, {pipeline_mode = #tpu.pipeline_mode<synchronous>, transform_indices = @transform_5, window_bounds = array<i64: 1, 128>}, {pipeline_mode = #tpu.pipeline_mode<synchronous>, transform_indices = @transform_6, window_bounds = array<i64: 128, 32>}, {pipeline_mode = #tpu.pipeline_mode<synchronous>, transform_indices = @transform_7, window_bounds = array<i64: 1, 32>}, {transform_indices = @transform_8, window_bounds = array<i64: 128, 32>}]} {
    %c0 = arith.constant 0 : index
    %c0_0 = arith.constant 0 : index
    %0 = vector.load %arg1[%c0, %c0_0] : memref<128x32xf32, #tpu.memory_space<vmem>>, vector<128x32xf32>
    %c0_1 = arith.constant 0 : index
    %c0_2 = arith.constant 0 : index
    %1 = vector.load %arg2[%c0_1, %c0_2] : memref<128x32xf32, #tpu.memory_space<vmem>>, vector<128x32xf32>
    %cst = arith.constant 2.000000e+00 : f32
    %2 = vector.broadcast %cst : f32 to vector<128x32xf32>
    %3 = arith.mulf %2, %1 : vector<128x32xf32>
    %4 = arith.addf %0, %3 : vector<128x32xf32>
    %cst_3 = arith.constant dense<0.000000e+00> : vector<128xf32>
    %5 = vector.multi_reduction <add>, %4, %cst_3 [1] : vector<128x32xf32> to vector<128xf32>
    %6 = vector.shape_cast %5 : vector<128xf32> to vector<128x1xf32>
    %cst_4 = arith.constant 3.200000e+01 : f32
    %7 = vector.broadcast %cst_4 : f32 to vector<128x1xf32>
    %8 = arith.divf %6, %7 : vector<128x1xf32>
    %9 = vector.broadcast %8 : vector<128x1xf32> to vector<128x32xf32>
    %10 = arith.subf %4, %9 : vector<128x32xf32>
    %11 = vector.broadcast %8 : vector<128x1xf32> to vector<128x32xf32>
    %12 = arith.subf %4, %11 : vector<128x32xf32>
    %13 = arith.mulf %10, %12 : vector<128x32xf32>
    %cst_5 = arith.constant dense<0.000000e+00> : vector<128xf32>
    %14 = vector.multi_reduction <add>, %13, %cst_5 [1] : vector<128x32xf32> to vector<128xf32>
    %15 = vector.shape_cast %14 : vector<128xf32> to vector<128x1xf32>
    %cst_6 = arith.constant 3.200000e+01 : f32
    %16 = vector.broadcast %cst_6 : f32 to vector<128x1xf32>
    %17 = arith.divf %15, %16 : vector<128x1xf32>
    %18 = vector.broadcast %8 : vector<128x1xf32> to vector<128x32xf32>
    %19 = arith.subf %4, %18 : vector<128x32xf32>
    %cst_7 = arith.constant 9.99999974E-6 : f32
    %20 = vector.broadcast %cst_7 : f32 to vector<128x1xf32>
    %21 = arith.addf %17, %20 : vector<128x1xf32>
    %22 = math.rsqrt %21 : vector<128x1xf32>
    %23 = vector.broadcast %22 : vector<128x1xf32> to vector<128x32xf32>
    %24 = arith.mulf %19, %23 : vector<128x32xf32>
    %c0_8 = arith.constant 0 : index
    %c0_9 = arith.constant 0 : index
    %25 = vector.load %arg3[%c0_8, %c0_9] : memref<1x32xf32, #tpu.memory_space<vmem>>, vector<1x32xf32>
    %26 = vector.shape_cast %25 : vector<1x32xf32> to vector<32xf32>
    %27 = vector.shape_cast %26 : vector<32xf32> to vector<1x32xf32>
    %28 = vector.broadcast %27 : vector<1x32xf32> to vector<128x32xf32>
    %29 = arith.mulf %24, %28 : vector<128x32xf32>
    %c0_10 = arith.constant 0 : index
    %c0_11 = arith.constant 0 : index
    %30 = vector.load %arg4[%c0_10, %c0_11] : memref<1x32xf32, #tpu.memory_space<vmem>>, vector<1x32xf32>
    %31 = vector.shape_cast %30 : vector<1x32xf32> to vector<32xf32>
    %32 = vector.shape_cast %31 : vector<32xf32> to vector<1x32xf32>
    %33 = vector.broadcast %32 : vector<1x32xf32> to vector<128x32xf32>
    %34 = arith.addf %29, %33 : vector<128x32xf32>
    %c0_12 = arith.constant 0 : index
    %c0_13 = arith.constant 0 : index
    %35 = vector.load %arg5[%c0_12, %c0_13] : memref<32x128xf32, #tpu.memory_space<vmem>>, vector<32x128xf32>
    %cst_14 = arith.constant dense<0.000000e+00> : vector<128x128xf32>
    %36 = tpu.matmul %34, %35, %cst_14 {dimension_numbers = #tpu.dot_dimension_numbers<[1], [0], [0], [1], [0, 0, 1, 1], [], []>} : vector<128x32xf32>, vector<32x128xf32>, vector<128x128xf32> -> vector<128x128xf32>
    %c0_15 = arith.constant 0 : index
    %c0_16 = arith.constant 0 : index
    %37 = vector.load %arg6[%c0_15, %c0_16] : memref<1x128xf32, #tpu.memory_space<vmem>>, vector<1x128xf32>
    %38 = vector.shape_cast %37 : vector<1x128xf32> to vector<128xf32>
    %39 = vector.shape_cast %38 : vector<128xf32> to vector<1x128xf32>
    %40 = vector.broadcast %39 : vector<1x128xf32> to vector<128x128xf32>
    %41 = arith.addf %36, %40 : vector<128x128xf32>
    %cst_17 = arith.constant 5.000000e-01 : f32
    %42 = vector.broadcast %cst_17 : f32 to vector<128x128xf32>
    %43 = arith.mulf %42, %41 : vector<128x128xf32>
    %cst_18 = arith.constant 0.707106769 : f32
    %44 = vector.broadcast %cst_18 : f32 to vector<128x128xf32>
    %45 = arith.mulf %41, %44 : vector<128x128xf32>
    %46 = math.erf %45 : vector<128x128xf32>
    %cst_19 = arith.constant 1.000000e+00 : f32
    %47 = vector.broadcast %cst_19 : f32 to vector<128x128xf32>
    %48 = arith.addf %47, %46 : vector<128x128xf32>
    %49 = arith.mulf %43, %48 : vector<128x128xf32>
    %c0_20 = arith.constant 0 : index
    %c0_21 = arith.constant 0 : index
    %50 = vector.load %arg7[%c0_20, %c0_21] : memref<128x32xf32, #tpu.memory_space<vmem>>, vector<128x32xf32>
    %cst_22 = arith.constant dense<0.000000e+00> : vector<128x32xf32>
    %51 = tpu.matmul %49, %50, %cst_22 {dimension_numbers = #tpu.dot_dimension_numbers<[1], [0], [0], [1], [0, 0, 1, 1], [], []>} : vector<128x128xf32>, vector<128x32xf32>, vector<128x32xf32> -> vector<128x32xf32>
    %52 = arith.addf %4, %51 : vector<128x32xf32>
    %c0_23 = arith.constant 0 : index
    %c0_24 = arith.constant 0 : index
    %53 = vector.load %arg8[%c0_23, %c0_24] : memref<1x32xf32, #tpu.memory_space<vmem>>, vector<1x32xf32>
    %54 = vector.shape_cast %53 : vector<1x32xf32> to vector<32xf32>
    %55 = vector.shape_cast %54 : vector<32xf32> to vector<1x32xf32>
    %56 = vector.broadcast %55 : vector<1x32xf32> to vector<128x32xf32>
    %57 = arith.addf %52, %56 : vector<128x32xf32>
    %c0_25 = arith.constant 0 : index
    %c0_26 = arith.constant 0 : index
    %58 = vector.load %arg9[%c0_25, %c0_26] : memref<128x32xf32, #tpu.memory_space<vmem>>, vector<128x32xf32>
    tpu.vector_store %arg9[%c0_25, %c0_26], %57 {strides = array<i32>} : memref<128x32xf32, #tpu.memory_space<vmem>>, vector<128x32xf32>,
    return
  }
  func.func @transform_0(%arg0: i32) -> (i32, i32) {
    %c0_i32 = arith.constant 0 : i32
    %c0_i32_0 = arith.constant 0 : i32
    return %arg0, %c0_i32 : i32, i32
  }
  func.func @transform_1(%arg0: i32) -> (i32, i32) {
    %c0_i32 = arith.constant 0 : i32
    %c0_i32_0 = arith.constant 0 : i32
    return %arg0, %c0_i32 : i32, i32
  }
  func.func @transform_2(%arg0: i32) -> (i32, i32) {
    %c0_i32 = arith.constant 0 : i32
    %c0_i32_0 = arith.constant 0 : i32
    %c0_i32_1 = arith.constant 0 : i32
    return %c0_i32, %c0_i32_0 : i32, i32
  }
  func.func @transform_3(%arg0: i32) -> (i32, i32) {
    %c0_i32 = arith.constant 0 : i32
    %c0_i32_0 = arith.constant 0 : i32
    %c0_i32_1 = arith.constant 0 : i32
    return %c0_i32, %c0_i32_0 : i32, i32
  }
  func.func @transform_4(%arg0: i32) -> (i32, i32) {
    %c0_i32 = arith.constant 0 : i32
    %c0_i32_0 = arith.constant 0 : i32
    %c0_i32_1 = arith.constant 0 : i32
    return %c0_i32, %c0_i32_0 : i32, i32
  }
  func.func @transform_5(%arg0: i32) -> (i32, i32) {
    %c0_i32 = arith.constant 0 : i32
    %c0_i32_0 = arith.constant 0 : i32
    %c0_i32_1 = arith.constant 0 : i32
    return %c0_i32, %c0_i32_0 : i32, i32
  }
  func.func @transform_6(%arg0: i32) -> (i32, i32) {
    %c0_i32 = arith.constant 0 : i32
    %c0_i32_0 = arith.constant 0 : i32
    %c0_i32_1 = arith.constant 0 : i32
    return %c0_i32, %c0_i32_0 : i32, i32
  }
  func.func @transform_7(%arg0: i32) -> (i32, i32) {
    %c0_i32 = arith.constant 0 : i32
    %c0_i32_0 = arith.constant 0 : i32
    %c0_i32_1 = arith.constant 0 : i32
    return %c0_i32, %c0_i32_0 : i32, i32
  }
  func.func @transform_8(%arg0: i32) -> (i32, i32) {
    %c0_i32 = arith.constant 0 : i32
    %c0_i32_0 = arith.constant 0 : i32
    return %arg0, %c0_i32 : i32, i32
  }
}

</mosaic_0001>

<bundles_post_ra>
// kernel: basic_layer_forward.5
= control target key start
LH: loop header
LB: loop body
LE: loop exit
PB: predicated region body
PF: predicated region fallthrough
CT: control target
= control target key end

     0   :  { %vm93_vm0 = vcmask 261120   ;;  %s1712_s0 = inlined_call_operand.vmem [shape: f32[128,32], index: 0, kind: input, shape index: {}]   ;;  %s1713_s1 = inlined_call_operand.vmem [shape: f32[128,32], index: 1, kind: input, shape index: {}]   ;;  %s1714_s4 = inlined_call_operand.vmem [shape: f32[32,128], index: 4, kind: input, shape index: {}]   ;;  %s1715_s6 = inlined_call_operand.vmem [shape: f32[128,32], index: 6, kind: input, shape index: {}]   ;;  %s1716_s2 = inlined_call_operand.vmem [shape: f32[1,32], index: 2, kind: input, shape index: {}]   ;;  %s1717_s3 = inlined_call_operand.vmem [shape: f32[1,32], index: 3, kind: input, shape index: {}]   ;;  %s1718_s5 = inlined_call_operand.vmem [shape: f32[1,128], index: 5, kind: input, shape index: {}]   ;;  %s1719_s7 = inlined_call_operand.vmem [shape: f32[1,32], index: 7, kind: input, shape index: {}]   ;;  %s1720_s8 = inlined_call_operand.vmem [shape: f32[128,32], index: 8, kind: output, shape index: {}]  }
   0x1   :  { %v29_v0 = vld [vmem:[%s1712_s0] sm:$0xff]  ;;  %v31_v2 = vld [vmem:[%s1712_s0 + $0x10] sm:$0xff]  ;;  %v30_v5 = vld [vmem:[%s1712_s0 + $0x8] sm:$0xff] }
   0x2   :  { %v45_v1 = vld [vmem:[%s1713_s1] sm:$0xff]  ;;  %v47_v4 = vld [vmem:[%s1713_s1 + $0x10] sm:$0xff]  ;;  %v46_v6 = vld [vmem:[%s1713_s1 + $0x8] sm:$0xff] }
   0x3   :  { %v61_v3 = vmul.f32 2.0, %v45_v1  ;;  %v63_v7 = vmul.f32 2.0, %v47_v4  ;;  %v62_v8 = vmul.f32 2.0, %v46_v6  ;;  %v32_v9 = vld [vmem:[%s1712_s0 + $0x18] sm:$0xff]  ;;  %v49_v13 = vld [vmem:[%s1713_s1 + $0x20] sm:$0xff]  ;;  %v50_v14 = vld [vmem:[%s1713_s1 + $0x28] sm:$0xff] }
   0x4   :  { %v48_v10 = vld [vmem:[%s1713_s1 + $0x18] sm:$0xff]  ;;  %v33_v17 = vld [vmem:[%s1712_s0 + $0x20] sm:$0xff]  ;;  %v65_v18 = vmul.f32 2.0, %v49_v13  ;;  %v66_v19 = vmul.f32 2.0, %v50_v14  ;;  %v51_v20 = vld [vmem:[%s1713_s1 + $0x30] sm:$0xff] }
   0x5   :  { %v1178_v11 = vadd.f32 %v61_v3, %v29_v0  ;;  %v64_v12 = vmul.f32 2.0, %v48_v10  ;;  %v1186_v15 = vadd.f32 %v63_v7, %v31_v2  ;;  %v1188_v16 = vadd.f32 %v62_v8, %v30_v5  ;;  %v34_v23 = vld [vmem:[%s1712_s0 + $0x28] sm:$0xff]  ;;  %v52_v24 = vld [vmem:[%s1713_s1 + $0x38] sm:$0xff]  ;;  %v35_v31 = vld [vmem:[%s1712_s0 + $0x30] sm:$0xff] }
   0x6   :  { %v1210_v27 = vadd.f32 %v65_v18, %v33_v17  ;;  %v67_v28 = vmul.f32 2.0, %v51_v20  ;;  %v1214_v30 = vadd.f32 %v66_v19, %v34_v23  ;;  %v68_v32 = vmul.f32 2.0, %v52_v24  ;;  %v53_v33 = vld [vmem:[%s1713_s1 + $0x40] sm:$0xff]  ;;  %v36_v34 = vld [vmem:[%s1712_s0 + $0x38] sm:$0xff]  ;;  %v54_v35 = vld [vmem:[%s1713_s1 + $0x48] sm:$0xff] }
   0x7   :  { %v94_v21 = vsel %vm93_vm0, %v1178_v11, 0.0  ;;  %v1198_v22 = vadd.f32 %v64_v12, %v32_v9  ;;  %v100_v25 = vsel %vm93_vm0, %v1186_v15, 0.0  ;;  %v97_v26 = vsel %vm93_vm0, %v1188_v16, 0.0  ;;  %v37_v41 = vld [vmem:[%s1712_s0 + $0x40] sm:$0xff]  ;;  %v55_v43 = vld [vmem:[%s1713_s1 + $0x50] sm:$0xff]  ;;  %v38_v44 = vld [vmem:[%s1712_s0 + $0x48] sm:$0xff] }
   0x8   :  { %95 = vadd.xlane.f32.xlu0 %v94_v21  ;;  %101 = vadd.xlane.f32.xlu1 %v100_v25  ;;  %v106_v36 = vsel %vm93_vm0, %v1210_v27, 0.0  ;;  %v1230_v37 = vadd.f32 %v67_v28, %v35_v31  ;;  %v69_v38 = vmul.f32 2.0, %v53_v33  ;;  %v109_v39 = vsel %vm93_vm0, %v1214_v30, 0.0  ;;  %v56_v45 = vld [vmem:[%s1713_s1 + $0x58] sm:$0xff]  ;;  %v39_v51 = vld [vmem:[%s1712_s0 + $0x50] sm:$0xff]  ;;  %v57_v53 = vld [vmem:[%s1713_s1 + $0x60] sm:$0xff] }
   0x9   :  { %v103_v29 = vsel %vm93_vm0, %v1198_v22, 0.0  ;;  %v1234_v40 = vadd.f32 %v68_v32, %v36_v34  ;;  %v70_v42 = vmul.f32 2.0, %v54_v35  ;;  %v71_v48 = vmul.f32 2.0, %v55_v43  ;;  %v40_v54 = vld [vmem:[%s1712_s0 + $0x58] sm:$0xff]  ;;  %v58_v55 = vld [vmem:[%s1713_s1 + $0x68] sm:$0xff]  ;;  %v41_v61 = vld [vmem:[%s1712_s0 + $0x60] sm:$0xff] }
   0xa   :  { %v112_v46 = vsel %vm93_vm0, %v1230_v37, 0.0  ;;  %v1250_v47 = vadd.f32 %v69_v38, %v37_v41  ;;  %v72_v52 = vmul.f32 2.0, %v56_v45  ;;  %v73_v58 = vmul.f32 2.0, %v57_v53  ;;  %v59_v63 = vld [vmem:[%s1713_s1 + $0x70] sm:$0xff]  ;;  %v42_v0 = vld [vmem:[%s1712_s0 + $0x68] sm:$0xff]  ;;  %v60_v1 = vld [vmem:[%s1713_s1 + $0x78] sm:$0xff] }
   0xb   :  { %v115_v49 = vsel %vm93_vm0, %v1234_v40, 0.0  ;;  %v1254_v50 = vadd.f32 %v70_v42, %v38_v44  ;;  %v1270_v57 = vadd.f32 %v71_v48, %v39_v51  ;;  %v74_v62 = vmul.f32 2.0, %v58_v55  ;;  %v43_v7 = vld [vmem:[%s1712_s0 + $0x70] sm:$0xff]  ;;  %v44_v9 = vld [vmem:[%s1712_s0 + $0x78] sm:$0xff] }
   0xc   :  { %98 = vadd.xlane.f32.xlu0 %v97_v26  ;;  %104 = vadd.xlane.f32.xlu1 %v103_v29  ;;  %v118_v56 = vsel %vm93_vm0, %v1250_v47, 0.0  ;;  %v1274_v60 = vadd.f32 %v72_v52, %v40_v54  ;;  %v1290_v3 = vadd.f32 %v73_v58, %v41_v61  ;;  %v75_v4 = vmul.f32 2.0, %v59_v63 }
   0xd   :  { %v121_v59 = vsel %vm93_vm0, %v1254_v50, 0.0  ;;  %v124_v2 = vsel %vm93_vm0, %v1270_v57, 0.0  ;;  %v1294_v6 = vadd.f32 %v74_v62, %v42_v0  ;;  %v76_v8 = vmul.f32 2.0, %v60_v1 }
   0xe   :  { %v127_v5 = vsel %vm93_vm0, %v1274_v60, 0.0  ;;  %v130_v10 = vsel %vm93_vm0, %v1290_v3, 0.0  ;;  %v1304_v12 = vadd.f32 %v75_v4, %v43_v7 }
   0xf   :  { %v133_v13 = vsel %vm93_vm0, %v1294_v6, 0.0  ;;  %v1308_v14 = vadd.f32 %v76_v8, %v44_v9 }
  0x10   :  { %107 = vadd.xlane.f32.xlu0 %v106_v36  ;;  %110 = vadd.xlane.f32.xlu1 %v109_v39  ;;  %v136_v17 = vsel %vm93_vm0, %v1304_v12, 0.0 }
  0x11   :  { %v139_v18 = vsel %vm93_vm0, %v1308_v14, 0.0 }
  0x14   :  { %113 = vadd.xlane.f32.xlu0 %v112_v46  ;;  %116 = vadd.xlane.f32.xlu1 %v115_v49 }
  0x18   :  { %119 = vadd.xlane.f32.xlu0 %v118_v56  ;;  %122 = vadd.xlane.f32.xlu1 %v121_v59 }
  0x1c   :  { %125 = vadd.xlane.f32.xlu0 %v124_v2  ;;  %128 = vadd.xlane.f32.xlu1 %v127_v5 }
  0x20   :  { %131 = vadd.xlane.f32.xlu0 %v130_v10  ;;  %134 = vadd.xlane.f32.xlu1 %v133_v13 }
  0x24   :  { %137 = vadd.xlane.f32.xlu0 %v136_v17  ;;  %140 = vadd.xlane.f32.xlu1 %v139_v18 }
  0x91   :  { %v96_v19 = vpop.xlane.xlu0 %95  ;;  %v102_v21 = vpop.xlane.xlu1 %101 }
  0x92   :  { %v143_v20 = vmul.f32 0.03125, %v96_v19  ;;  %v145_v23 = vmul.f32 0.03125, %v102_v21 }
  0x94   :  { %v1315_v24 = vsub.f32 %v1178_v11, %v143_v20  ;;  %v1318_v25 = vsub.f32 %v1186_v15, %v145_v23 }
  0x95   :  { %v99_v26 = vpop.xlane.xlu0 %98  ;;  %v105_v29 = vpop.xlane.xlu1 %104 }
  0x96   :  { %v144_v28 = vmul.f32 0.03125, %v99_v26  ;;  %v175_v31 = vmul.f32 %v1315_v24, %v1315_v24  ;;  %v146_v32 = vmul.f32 0.03125, %v105_v29  ;;  %v177_v33 = vmul.f32 %v1318_v25, %v1318_v25 }
  0x98   :  { %v1325_v34 = vsub.f32 %v1188_v16, %v144_v28  ;;  %v191_v35 = vsel %vm93_vm0, %v175_v31, 0.0  ;;  %v1329_v36 = vsub.f32 %v1198_v22, %v146_v32  ;;  %v197_v42 = vsel %vm93_vm0, %v177_v33, 0.0 }
  0x99   :  { %192 = vadd.xlane.f32.xlu0 %v191_v35  ;;  %v108_v38 = vpop.xlane.xlu0 %107  ;;  %v111_v41 = vpop.xlane.xlu1 %110 }
  0x9a   :  { %v147_v39 = vmul.f32 0.03125, %v108_v38  ;;  %v176_v43 = vmul.f32 %v1325_v34, %v1325_v34  ;;  %v148_v44 = vmul.f32 0.03125, %v111_v41  ;;  %v178_v45 = vmul.f32 %v1329_v36, %v1329_v36 }
  0x9c   :  { %v1337_v46 = vsub.f32 %v1210_v27, %v147_v39  ;;  %v194_v48 = vsel %vm93_vm0, %v176_v43, 0.0  ;;  %v1341_v49 = vsub.f32 %v1214_v30, %v148_v44  ;;  %v200_v54 = vsel %vm93_vm0, %v178_v45, 0.0 }
  0x9d   :  { %198 = vadd.xlane.f32.xlu0 %v197_v42  ;;  %195 = vadd.xlane.f32.xlu1 %v194_v48  ;;  %v114_v51 = vpop.xlane.xlu0 %113  ;;  %v117_v53 = vpop.xlane.xlu1 %116 }
  0x9e   :  { %v149_v52 = vmul.f32 0.03125, %v114_v51  ;;  %v179_v55 = vmul.f32 %v1337_v46, %v1337_v46  ;;  %v150_v56 = vmul.f32 0.03125, %v117_v53  ;;  %v180_v58 = vmul.f32 %v1341_v49, %v1341_v49 }
  0xa0   :  { %v1349_v59 = vsub.f32 %v1230_v37, %v149_v52  ;;  %v203_v61 = vsel %vm93_vm0, %v179_v55, 0.0  ;;  %v1353_v62 = vsub.f32 %v1234_v40, %v150_v56  ;;  %v206_v2 = vsel %vm93_vm0, %v180_v58, 0.0 }
  0xa1   :  { %201 = vadd.xlane.f32.xlu1 %v200_v54  ;;  %204 = vadd.xlane.f32.xlu0 %v203_v61  ;;  %v120_v63 = vpop.xlane.xlu0 %119  ;;  %v123_v1 = vpop.xlane.xlu1 %122 }
  0xa2   :  { %v151_v0 = vmul.f32 0.03125, %v120_v63  ;;  %v181_v4 = vmul.f32 %v1349_v59, %v1349_v59  ;;  %v152_v5 = vmul.f32 0.03125, %v123_v1  ;;  %v182_v7 = vmul.f32 %v1353_v62, %v1353_v62 }
  0xa4   :  { %v1361_v8 = vsub.f32 %v1250_v47, %v151_v0  ;;  %v209_v9 = vsel %vm93_vm0, %v181_v4, 0.0  ;;  %v1365_v10 = vsub.f32 %v1254_v50, %v152_v5  ;;  %v212_v19 = vsel %vm93_vm0, %v182_v7, 0.0  ;;  %v352_v5 = vld [vmem:[%s1714_s4 + $0x18] sm:$0xff]  ;;  %v351_v7 = vld [vmem:[%s1714_s4 + $0x10] sm:$0xff] }
  0xa5   :  { %207 = vadd.xlane.f32.xlu1 %v206_v2  ;;  %210 = vadd.xlane.f32.xlu0 %v209_v9  ;;  %v126_v13 = vpop.xlane.xlu0 %125  ;;  %v129_v18 = vpop.xlane.xlu1 %128  ;;  %v350_v9 = vld [vmem:[%s1714_s4 + $0x8] sm:$0xff] }
  0xa6   :  { %v153_v17 = vmul.f32 0.03125, %v126_v13  ;;  %v183_v20 = vmul.f32 %v1361_v8, %v1361_v8  ;;  %v154_v21 = vmul.f32 0.03125, %v129_v18  ;;  %v184_v23 = vmul.f32 %v1365_v10, %v1365_v10  ;;  %925 = vmatprep.subr.mxu0 %v352_v5  ;;  %v349_v13 = vld [vmem:[%s1714_s4] sm:$0xff]  ;;  %v1432_v18 = vld [vmem:[%s1715_s6 + $0x70] sm:$0xff] }
  0xa7   :  { %926 = vmatpush3.msra.mxu0 %v352_v5 }
  0xa8   :  { %v1373_v26 = vsub.f32 %v1270_v57, %v153_v17  ;;  %v215_v28 = vsel %vm93_vm0, %v183_v20, 0.0  ;;  %v1377_v29 = vsub.f32 %v1274_v60, %v154_v21  ;;  %v218_v35 = vsel %vm93_vm0, %v184_v23, 0.0  ;;  %927 = vmatprep.subr.mxu0 %v351_v7  ;;  %v1425_v17 = vld [vmem:[%s1715_s6 + $0x78] sm:$0xff] }
  0xa9   :  { %213 = vadd.xlane.f32.xlu1 %v212_v19  ;;  %216 = vadd.xlane.f32.xlu0 %v215_v28  ;;  %v132_v31 = vpop.xlane.xlu0 %131  ;;  %v135_v33 = vpop.xlane.xlu1 %134  ;;  %v1439_v19 = vld [vmem:[%s1715_s6 + $0x68] sm:$0xff] }
  0xaa   :  { %v155_v32 = vmul.f32 0.03125, %v132_v31  ;;  %v185_v38 = vmul.f32 %v1373_v26, %v1373_v26  ;;  %v156_v39 = vmul.f32 0.03125, %v135_v33  ;;  %v186_v41 = vmul.f32 %v1377_v29, %v1377_v29  ;;  %928 = vmatpush3.msra.mxu0 %v351_v7  ;;  %1013 = vmatprep.subr.mxu1 %v1425_v17  ;;  %v1447_v7 = vld [vmem:[%s1716_s2] ss:$0 sm:$0xff] }
  0xab   :  { %929 = vmatprep.subr.mxu0 %v350_v9  ;;  %1029 = vmatpush3.msra.mxu1 %v1425_v17 }
  0xac   :  { %v1385_v42 = vsub.f32 %v1290_v3, %v155_v32  ;;  %v221_v43 = vsel %vm93_vm0, %v185_v38, 0.0  ;;  %v1389_v44 = vsub.f32 %v1294_v6, %v156_v39  ;;  %v224_v52 = vsel %vm93_vm0, %v186_v41, 0.0  ;;  %930 = vmatpush3.msra.mxu0 %v350_v9  ;;  %1014 = vmatprep.subr.mxu1 %v1432_v18 }
  0xad   :  { %219 = vadd.xlane.f32.xlu1 %v218_v35  ;;  %222 = vadd.xlane.f32.xlu0 %v221_v43  ;;  %v138_v45 = vpop.xlane.xlu0 %137  ;;  %v141_v51 = vpop.xlane.xlu1 %140 }
  0xae   :  { %v157_v48 = vmul.f32 0.03125, %v138_v45  ;;  %v187_v53 = vmul.f32 %v1385_v42, %v1385_v42  ;;  %v158_v54 = vmul.f32 0.03125, %v141_v51  ;;  %v188_v55 = vmul.f32 %v1389_v44, %v1389_v44  ;;  %931 = vmatprep.subr.mxu0 %v349_v13  ;;  %1030 = vmatpush3.msra.mxu1 %v1432_v18 }
  0xaf   :  { %932 = vmatpush3.msra.mxu0 %v349_v13  ;;  %1015 = vmatprep.subr.mxu1 %v1439_v19 }
  0xb0   :  { %v1397_v56 = vsub.f32 %v1304_v12, %v157_v48  ;;  %v227_v58 = vsel %vm93_vm0, %v187_v53, 0.0  ;;  %v1401_v61 = vsub.f32 %v1308_v14, %v158_v54  ;;  %v230_v63 = vsel %vm93_vm0, %v188_v55, 0.0  ;;  %957 = vmatprep.subr.mxu0 %v1425_v17  ;;  %1031 = vmatpush3.msra.mxu1 %v1439_v19 }
  0xb1   :  { %225 = vadd.xlane.f32.xlu1 %v224_v52  ;;  %228 = vadd.xlane.f32.xlu0 %v227_v58 }
  0xb2   :  { %v189_v0 = vmul.f32 %v1397_v56, %v1397_v56  ;;  %v190_v1 = vmul.f32 %v1401_v61, %v1401_v61 }
  0xb4   :  { %v233_v2 = vsel %vm93_vm0, %v189_v0, 0.0  ;;  %v236_v4 = vsel %vm93_vm0, %v190_v1, 0.0 }
  0xb5   :  { %231 = vadd.xlane.f32.xlu1 %v230_v63  ;;  %234 = vadd.xlane.f32.xlu0 %v233_v2 }
  0xb9   :  { %237 = vadd.xlane.f32.xlu1 %v236_v4 }
 0x122   :  { %v193_v20 = vpop.xlane.xlu0 %192 }
 0x123   :  { %v239_v21 = vmul.f32 0.03125, %v193_v20 }
 0x125   :  { %v255_v23 = vadd.f32 1e-05, %v239_v21 }
 0x126   :  { %v196_v28 = vpop.xlane.xlu1 %195  ;;  %v199_v31 = vpop.xlane.xlu0 %198 }
 0x127   :  { %1045 = vrsqrt.f32 %v255_v23  ;;  %v240_v32 = vmul.f32 0.03125, %v196_v28  ;;  %v241_v33 = vmul.f32 0.03125, %v199_v31  ;;  %v1453_v28 = vld [vmem:[%s1717_s3] ss:$0 sm:$0xff] }
 0x129   :  { %v256_v35 = vadd.f32 1e-05, %v240_v32  ;;  %v257_v38 = vadd.f32 1e-05, %v241_v33 }
 0x12a   :  { %v202_v39 = vpop.xlane.xlu1 %201  ;;  %v205_v41 = vpop.xlane.xlu0 %204 }
 0x12b   :  { %1047 = vrsqrt.f32 %v256_v35  ;;  %v242_v43 = vmul.f32 0.03125, %v202_v39  ;;  %v243_v45 = vmul.f32 0.03125, %v205_v41 }
 0x12c   :  { %1049 = vrsqrt.f32 %v257_v38 }
 0x12d   :  { %v258_v48 = vadd.f32 1e-05, %v242_v43  ;;  %v259_v51 = vadd.f32 1e-05, %v243_v45 }
 0x12e   :  { %v208_v52 = vpop.xlane.xlu1 %207  ;;  %v211_v53 = vpop.xlane.xlu0 %210 }
 0x12f   :  { %1051 = vrsqrt.f32 %v258_v48  ;;  %v244_v54 = vmul.f32 0.03125, %v208_v52  ;;  %v245_v55 = vmul.f32 0.03125, %v211_v53 }
 0x130   :  { %1053 = vrsqrt.f32 %v259_v51 }
 0x131   :  { %v260_v58 = vadd.f32 1e-05, %v244_v54  ;;  %v261_v63 = vadd.f32 1e-05, %v245_v55 }
 0x132   :  { %v214_v0 = vpop.xlane.xlu1 %213  ;;  %v217_v1 = vpop.xlane.xlu0 %216 }
 0x133   :  { %1055 = vrsqrt.f32 %v260_v58  ;;  %v246_v2 = vmul.f32 0.03125, %v214_v0  ;;  %v247_v4 = vmul.f32 0.03125, %v217_v1 }
 0x134   :  { %v1046_v5 = vpop.eup %1045  ;;  %1057 = vrsqrt.f32 %v261_v63 }
 0x135   :  { %v262_v9 = vadd.f32 1e-05, %v246_v2  ;;  %v263_v13 = vadd.f32 1e-05, %v247_v4  ;;  %v287_v20 = vmul.f32 %v1046_v5, %v1315_v24 }
 0x136   :  { %v220_v21 = vpop.xlane.xlu1 %219  ;;  %v223_v23 = vpop.xlane.xlu0 %222 }
 0x137   :  { %1059 = vrsqrt.f32 %v262_v9  ;;  %v248_v31 = vmul.f32 0.03125, %v220_v21  ;;  %v249_v32 = vmul.f32 0.03125, %v223_v23  ;;  %v310_v33 = vmul.f32 %v1447_v7, %v287_v20 }
 0x138   :  { %v1048_v35 = vpop.eup %1047  ;;  %1061 = vrsqrt.f32 %v263_v13 }
 0x139   :  { %v1050_v38 = vpop.eup %1049  ;;  %v264_v39 = vadd.f32 1e-05, %v248_v31  ;;  %v265_v41 = vadd.f32 1e-05, %v249_v32  ;;  %v333_v43 = vadd.f32 %v1453_v28, %v310_v33  ;;  %v288_v24 = vmul.f32 %v1048_v35, %v1325_v34 }
 0x13a   :  { %v226_v45 = vpop.xlane.xlu1 %225  ;;  %v229_v48 = vpop.xlane.xlu0 %228  ;;  %v289_v51 = vmul.f32 %v1050_v38, %v1318_v25 }
 0x13b   :  { %1063 = vrsqrt.f32 %v264_v39  ;;  %v250_v52 = vmul.f32 0.03125, %v226_v45  ;;  %v251_v53 = vmul.f32 0.03125, %v229_v48  ;;  %933 = vmatprep.mubr.msk.f32.mxu0 %vm93_vm0, %v333_v43  ;;  %v311_v54 = vmul.f32 %v1447_v7, %v288_v24 }
 0x13c   :  { %v1052_v55 = vpop.eup %1051  ;;  %1065 = vrsqrt.f32 %v265_v41  ;;  %v312_v58 = vmul.f32 %v1447_v7, %v289_v51 }
 0x13d   :  { %v1054_v63 = vpop.eup %1053  ;;  %v266_v0 = vadd.f32 1e-05, %v250_v52  ;;  %v267_v1 = vadd.f32 1e-05, %v251_v53  ;;  %v334_v34 = vadd.f32 %v1453_v28, %v311_v54  ;;  %v290_v2 = vmul.f32 %v1052_v55, %v1329_v36 }
 0x13e   :  { %v232_v4 = vpop.xlane.xlu1 %231  ;;  %v235_v25 = vpop.xlane.xlu0 %234  ;;  %v335_v5 = vadd.f32 %v1453_v28, %v312_v58  ;;  %v291_v9 = vmul.f32 %v1054_v63, %v1337_v46 }
 0x13f   :  { %1067 = vrsqrt.f32 %v266_v0  ;;  %v252_v13 = vmul.f32 0.03125, %v232_v4  ;;  %v253_v20 = vmul.f32 0.03125, %v235_v25  ;;  %934 = vmatmul.mubr.msk.f32.vlgmr.msra.gmra.mxu0 %vm93_vm0, %v334_v34  ;;  %v313_v21 = vmul.f32 %v1447_v7, %v290_v2 }
 0x140   :  { %v1056_v23 = vpop.eup %1055  ;;  %1069 = vrsqrt.f32 %v267_v1  ;;  %936 = vmatprep.mubr.msk.f32.mxu0 %vm93_vm0, %v335_v5  ;;  %v314_v31 = vmul.f32 %v1447_v7, %v291_v9  ;;  %958 = vmatpush3.msra.mxu0 %v1425_v17 }
 0x141   :  { %v1058_v36 = vpop.eup %1057  ;;  %v268_v32 = vadd.f32 1e-05, %v252_v13  ;;  %v269_v33 = vadd.f32 1e-05, %v253_v20  ;;  %v336_v46 = vadd.f32 %v1453_v28, %v313_v21  ;;  %v292_v35 = vmul.f32 %v1056_v23, %v1341_v49  ;;  %959 = vmatprep.subr.mxu0 %v1432_v18 }
 0x142   :  { %v238_v38 = vpop.xlane.xlu1 %237  ;;  %v337_v39 = vadd.f32 %v1453_v28, %v314_v31  ;;  %v293_v41 = vmul.f32 %v1058_v36, %v1349_v59  ;;  %960 = vmatpush3.msra.mxu0 %v1432_v18 }
 0x143   :  { %1071 = vrsqrt.f32 %v268_v32  ;;  %v254_v43 = vmul.f32 0.03125, %v238_v38  ;;  %937 = vmatmul.mubr.msk.f32.gmra.mxu0 %vm93_vm0, %v336_v46  ;;  %v315_v17 = vmul.f32 %v1447_v7, %v292_v35  ;;  %961 = vmatprep.subr.mxu0 %v1439_v19  ;;  %v645_v38 = vld [vmem:[%s1715_s6 + $0x60] sm:$0xff] }
 0x144   :  { %v1060_v24 = vpop.eup %1059  ;;  %1073 = vrsqrt.f32 %v269_v33  ;;  %939 = vmatprep.mubr.msk.f32.mxu0 %vm93_vm0, %v337_v39  ;;  %v316_v49 = vmul.f32 %v1447_v7, %v293_v41  ;;  %962 = vmatpush3.msra.mxu0 %v1439_v19  ;;  %v641_v39 = vld [vmem:[%s1715_s6 + $0x40] sm:$0xff]  ;;  %v640_v41 = vld [vmem:[%s1715_s6 + $0x38] sm:$0xff] }
 0x145   :  { %v1062_v45 = vpop.eup %1061  ;;  %v270_v59 = vadd.f32 1e-05, %v254_v43  ;;  %v338_v18 = vadd.f32 %v1453_v28, %v315_v17  ;;  %v294_v48 = vmul.f32 %v1060_v24, %v1353_v62  ;;  %963 = vmatprep.subr.mxu0 %v645_v38  ;;  %1016 = vmatprep.subr.mxu1 %v645_v38  ;;  %v639_v43 = vld [vmem:[%s1715_s6 + $0x30] sm:$0xff]  ;;  %v638_v17 = vld [vmem:[%s1715_s6 + $0x28] sm:$0xff]  ;;  %v637_v24 = vld [vmem:[%s1715_s6 + $0x20] sm:$0xff] }
 0x146   :  { %v339_v51 = vadd.f32 %v1453_v28, %v316_v49  ;;  %v295_v52 = vmul.f32 %v1062_v45, %v1361_v8  ;;  %964 = vmatpush3.msra.mxu0 %v645_v38  ;;  %1032 = vmatpush3.msra.mxu1 %v645_v38  ;;  %v636_v49 = vld [vmem:[%s1715_s6 + $0x18] sm:$0xff]  ;;  %v635_v45 = vld [vmem:[%s1715_s6 + $0x10] sm:$0xff] }
 0x147   :  { %1075 = vrsqrt.f32 %v270_v59  ;;  %940 = vmatmul.mubr.msk.f32.gmra.mxu0 %vm93_vm0, %v338_v18  ;;  %v317_v53 = vmul.f32 %v1447_v7, %v294_v48  ;;  %v634_v59 = vld [vmem:[%s1715_s6 + $0x8] sm:$0xff]  ;;  %v633_v18 = vld [vmem:[%s1715_s6] sm:$0xff] }
 0x148   :  { %v1064_v54 = vpop.eup %1063  ;;  %942 = vmatprep.mubr.msk.f32.mxu0 %vm93_vm0, %v339_v51  ;;  %v318_v19 = vmul.f32 %v1447_v7, %v295_v52  ;;  %v1565_v48 = vld [vmem:[%s1718_s5] ss:$0 sm:$0xff] }
 0x149   :  { %v1066_v55 = vpop.eup %1065  ;;  %v340_v58 = vadd.f32 %v1453_v28, %v317_v53  ;;  %v296_v63 = vmul.f32 %v1064_v54, %v1365_v10 }
 0x14a   :  { %v341_v62 = vadd.f32 %v1453_v28, %v318_v19  ;;  %v297_v0 = vmul.f32 %v1066_v55, %v1373_v26 }
 0x14b   :  { %943 = vmatmul.mubr.msk.f32.gmra.mxu0 %vm93_vm0, %v340_v58  ;;  %v319_v8 = vmul.f32 %v1447_v7, %v296_v63 }
 0x14c   :  { %v1068_v1 = vpop.eup %1067  ;;  %945 = vmatprep.mubr.msk.f32.mxu0 %vm93_vm0, %v341_v62  ;;  %v320_v34 = vmul.f32 %v1447_v7, %v297_v0 }
 0x14d   :  { %v1070_v2 = vpop.eup %1069  ;;  %v342_v4 = vadd.f32 %v1453_v28, %v319_v8  ;;  %v298_v25 = vmul.f32 %v1068_v1, %v1377_v29 }
 0x14e   :  { %v343_v10 = vadd.f32 %v1453_v28, %v320_v34  ;;  %v299_v5 = vmul.f32 %v1070_v2, %v1385_v42 }
 0x14f   :  { %946 = vmatmul.mubr.msk.f32.gmra.mxu0 %vm93_vm0, %v342_v4  ;;  %v321_v26 = vmul.f32 %v1447_v7, %v298_v25 }
 0x150   :  { %v1072_v9 = vpop.eup %1071  ;;  %948 = vmatprep.mubr.msk.f32.mxu0 %vm93_vm0, %v343_v10  ;;  %v322_v13 = vmul.f32 %v1447_v7, %v299_v5 }
 0x151   :  { %v1074_v20 = vpop.eup %1073  ;;  %v344_v21 = vadd.f32 %v1453_v28, %v321_v26  ;;  %v300_v23 = vmul.f32 %v1072_v9, %v1389_v44 }
 0x152   :  { %v345_v29 = vadd.f32 %v1453_v28, %v322_v13  ;;  %v301_v31 = vmul.f32 %v1074_v20, %v1397_v56 }
 0x153   :  { %949 = vmatmul.mubr.msk.f32.gmra.mxu0 %vm93_vm0, %v344_v21  ;;  %v323_v42 = vmul.f32 %v1447_v7, %v300_v23 }
 0x154   :  { %v1076_v36 = vpop.eup %1075  ;;  %951 = vmatprep.mubr.msk.f32.mxu0 %vm93_vm0, %v345_v29  ;;  %v324_v32 = vmul.f32 %v1447_v7, %v301_v31 }
 0x155   :  { %v346_v33 = vadd.f32 %v1453_v28, %v323_v42  ;;  %v302_v46 = vmul.f32 %v1076_v36, %v1401_v61  ;;  %v644_v61 = vld [vmem:[%s1715_s6 + $0x58] sm:$0xff] }
 0x156   :  { %v347_v35 = vadd.f32 %v1453_v28, %v324_v32  ;;  %965 = vmatprep.subr.mxu0 %v644_v61  ;;  %1017 = vmatprep.subr.mxu1 %v644_v61 }
 0x157   :  { %952 = vmatmul.mubr.msk.f32.gmra.mxu0 %vm93_vm0, %v346_v33  ;;  %v325_v44 = vmul.f32 %v1447_v7, %v302_v46  ;;  %v643_v7 = vld [vmem:[%s1715_s6 + $0x50] sm:$0xff]  ;;  %1033 = vmatpush3.msra.mxu1 %v644_v61 }
 0x158   :  { %954 = vmatprep.mubr.msk.f32.mxu0 %vm93_vm0, %v347_v35  ;;  %966 = vmatpush3.msra.mxu0 %v644_v61 }
 0x159   :  { %v348_v56 = vadd.f32 %v1453_v28, %v325_v44  ;;  %967 = vmatprep.subr.mxu0 %v643_v7  ;;  %1018 = vmatprep.subr.mxu1 %v643_v7  ;;  %v642_v28 = vld [vmem:[%s1715_s6 + $0x48] sm:$0xff] }
 0x15a   :  { %968 = vmatpush3.msra.mxu0 %v643_v7  ;;  %1034 = vmatpush3.msra.mxu1 %v643_v7 }
 0x15b   :  { %955 = vmatmul.mubr.msk.f32.gmra.mxu0 %vm93_vm0, %v348_v56  ;;  %969 = vmatprep.subr.mxu0 %v642_v28 }
 0x15c   :  { %1019 = vmatprep.subr.mxu1 %v642_v28  ;;  %970 = vmatpush3.msra.mxu0 %v642_v28 }
 0x15d   :  { %1035 = vmatpush3.msra.mxu1 %v642_v28  ;;  %971 = vmatprep.subr.mxu0 %v641_v39 }
 0x15e   :  { %1020 = vmatprep.subr.mxu1 %v641_v39  ;;  %972 = vmatpush3.msra.mxu0 %v641_v39 }
 0x15f   :  { %1036 = vmatpush3.msra.mxu1 %v641_v39  ;;  %973 = vmatprep.subr.mxu0 %v640_v41 }
 0x160   :  { %1021 = vmatprep.subr.mxu1 %v640_v41  ;;  %974 = vmatpush3.msra.mxu0 %v640_v41 }
 0x161   :  { %1037 = vmatpush3.msra.mxu1 %v640_v41  ;;  %975 = vmatprep.subr.mxu0 %v639_v43 }
 0x162   :  { %1022 = vmatprep.subr.mxu1 %v639_v43  ;;  %976 = vmatpush3.msra.mxu0 %v639_v43 }
 0x163   :  { %1038 = vmatpush3.msra.mxu1 %v639_v43  ;;  %977 = vmatprep.subr.mxu0 %v638_v17 }
 0x164   :  { %1023 = vmatprep.subr.mxu1 %v638_v17  ;;  %978 = vmatpush3.msra.mxu0 %v638_v17 }
 0x165   :  { %1039 = vmatpush3.msra.mxu1 %v638_v17  ;;  %979 = vmatprep.subr.mxu0 %v637_v24 }
 0x166   :  { %1024 = vmatprep.subr.mxu1 %v637_v24  ;;  %980 = vmatpush3.msra.mxu0 %v637_v24 }
 0x167   :  { %1040 = vmatpush3.msra.mxu1 %v637_v24  ;;  %981 = vmatprep.subr.mxu0 %v636_v49 }
 0x168   :  { %1025 = vmatprep.subr.mxu1 %v636_v49  ;;  %982 = vmatpush3.msra.mxu0 %v636_v49 }
 0x169   :  { %1041 = vmatpush3.msra.mxu1 %v636_v49  ;;  %983 = vmatprep.subr.mxu0 %v635_v45 }
 0x16a   :  { %1026 = vmatprep.subr.mxu1 %v635_v45  ;;  %984 = vmatpush3.msra.mxu0 %v635_v45 }
 0x16b   :  { %1042 = vmatpush3.msra.mxu1 %v635_v45  ;;  %985 = vmatprep.subr.mxu0 %v634_v59 }
 0x16c   :  { %1027 = vmatprep.subr.mxu1 %v634_v59  ;;  %986 = vmatpush3.msra.mxu0 %v634_v59 }
 0x16d   :  { %1043 = vmatpush3.msra.mxu1 %v634_v59  ;;  %987 = vmatprep.subr.mxu0 %v633_v18 }
 0x16e   :  { %1028 = vmatprep.subr.mxu1 %v633_v18  ;;  %988 = vmatpush3.msra.mxu0 %v633_v18 }
 0x16f   :  { %1044 = vmatpush3.msra.mxu1 %v633_v18 }
 0x1ff   :  { %v935_v51 = vpop.f32.mrf.mxu0 }
 0x200   :  { %v480_v52 = vadd.f32 %v935_v51, %v1565_v48 }
 0x201   :  { %v474_v53 = vpop.f32.mrf.mxu0 }
 0x202   :  { %v570_v54 = vmul.f32 0.70710677, %v480_v52  ;;  %v475_v19 = vadd.f32 %v1565_v48, %v474_v53  ;;  %v554_v28 = vmul.f32 0.5, %v480_v52 }
 0x203   :  { %v938_v55 = vpop.f32.mrf.mxu0 }
 0x204   :  { %1077 = verf.f32 %v570_v54  ;;  %v569_v58 = vmul.f32 0.70710677, %v475_v19  ;;  %v490_v63 = vadd.f32 %v938_v55, %v1565_v48  ;;  %v553_v56 = vmul.f32 0.5, %v475_v19 }
 0x205   :  { %v484_v62 = vpop.f32.mrf.mxu0 }
 0x206   :  { %1079 = verf.f32 %v569_v58  ;;  %v572_v0 = vmul.f32 0.70710677, %v490_v63  ;;  %v485_v8 = vadd.f32 %v1565_v48, %v484_v62  ;;  %v556_v54 = vmul.f32 0.5, %v490_v63 }
 0x207   :  { %v941_v1 = vpop.f32.mrf.mxu0 }
 0x208   :  { %1081 = verf.f32 %v572_v0  ;;  %v571_v34 = vmul.f32 0.70710677, %v485_v8  ;;  %v1572_v2 = vadd.f32 %v941_v1, %v1565_v48  ;;  %v555_v19 = vmul.f32 0.5, %v485_v8 }
 0x209   :  { %v494_v4 = vpop.f32.mrf.mxu0 }
 0x20a   :  { %1083 = verf.f32 %v571_v34  ;;  %v574_v25 = vmul.f32 0.70710677, %v1572_v2  ;;  %v495_v10 = vadd.f32 %v1565_v48, %v494_v4 }
 0x20b   :  { %v944_v5 = vpop.f32.mrf.mxu0 }
 0x20c   :  { %1085 = verf.f32 %v574_v25  ;;  %v573_v26 = vmul.f32 0.70710677, %v495_v10  ;;  %v1577_v9 = vadd.f32 %v944_v5, %v1565_v48  ;;  %v557_v63 = vmul.f32 0.5, %v495_v10 }
 0x20d   :  { %v504_v13 = vpop.f32.mrf.mxu0 }
 0x20e   :  { %1087 = verf.f32 %v573_v26  ;;  %v576_v20 = vmul.f32 0.70710677, %v1577_v9  ;;  %v505_v21 = vadd.f32 %v1565_v48, %v504_v13  ;;  %v560_v10 = vmul.f32 0.5, %v1577_v9 }
 0x20f   :  { %v947_v23 = vpop.f32.mrf.mxu0 }
 0x210   :  { %1089 = verf.f32 %v576_v20  ;;  %v575_v29 = vmul.f32 0.70710677, %v505_v21  ;;  %v1582_v31 = vadd.f32 %v947_v23, %v1565_v48 }
 0x211   :  { %v1078_v42 = vpop.eup %1077  ;;  %v514_v36 = vpop.f32.mrf.mxu0 }
 0x212   :  { %1091 = verf.f32 %v575_v29  ;;  %v578_v32 = vmul.f32 0.70710677, %v1582_v31  ;;  %v602_v46 = vadd.f32 1.0, %v1078_v42  ;;  %v1586_v35 = vadd.f32 %v1565_v48, %v514_v36 }
 0x213   :  { %v1080_v33 = vpop.eup %1079  ;;  %v950_v44 = vpop.f32.mrf.mxu0  ;;  %v558_v29 = vmul.f32 0.5, %v1572_v2 }
 0x214   :  { %1093 = verf.f32 %v578_v32  ;;  %v1589_v38 = vadd.f32 %v950_v44, %v1565_v48  ;;  %v601_v61 = vadd.f32 1.0, %v1080_v33  ;;  %v577_v39 = vmul.f32 0.70710677, %v1586_v35 }
 0x215   :  { %v1082_v7 = vpop.eup %1081  ;;  %v524_v41 = vpop.f32.mrf.mxu0  ;;  %v618_v45 = vmul.f32 %v602_v46, %v554_v28  ;;  %v559_v46 = vmul.f32 0.5, %v505_v21 }
 0x216   :  { %v580_v43 = vmul.f32 0.70710677, %v1589_v38  ;;  %v1594_v17 = vadd.f32 %v1565_v48, %v524_v41  ;;  %v617_v24 = vmul.f32 %v601_v61, %v553_v56  ;;  %1095 = verf.f32 %v577_v39 }
 0x217   :  { %v1084_v49 = vpop.eup %1083  ;;  %v953_v59 = vpop.f32.mrf.mxu0  ;;  %v604_v18 = vadd.f32 1.0, %v1082_v7 }
 0x218   :  { %1097 = verf.f32 %v580_v43  ;;  %v579_v51 = vmul.f32 0.70710677, %v1594_v17  ;;  %v1598_v53 = vadd.f32 %v953_v59, %v1565_v48  ;;  %989 = vmatprep.mubr.f32.mxu0 %v617_v24  ;;  %v603_v58 = vadd.f32 1.0, %v1084_v49 }
 0x219   :  { %v1086_v52 = vpop.eup %1085  ;;  %v534_v55 = vpop.f32.mrf.mxu0  ;;  %990 = vmatmul.mubr.f32.vlgmr.msra.gmra.mxu0 %v618_v45  ;;  %v620_v25 = vmul.f32 %v604_v18, %v556_v54  ;;  %v561_v24 = vmul.f32 0.5, %v1586_v35  ;;  %v562_v49 = vmul.f32 0.5, %v1582_v31  ;;  %v563_v18 = vmul.f32 0.5, %v1594_v17 }
 0x21a   :  { %1099 = verf.f32 %v579_v51  ;;  %v582_v62 = vmul.f32 0.70710677, %v1598_v53  ;;  %v535_v0 = vadd.f32 %v1565_v48, %v534_v55  ;;  %v619_v4 = vmul.f32 %v603_v58, %v555_v19 }
 0x21b   :  { %v1088_v1 = vpop.eup %1087  ;;  %v956_v34 = vpop.f32.mrf.mxu0  ;;  %v606_v13 = vadd.f32 1.0, %v1086_v52  ;;  %v564_v19 = vmul.f32 0.5, %v1589_v38 }
 0x21c   :  { %1101 = verf.f32 %v582_v62  ;;  %v581_v5 = vmul.f32 0.70710677, %v535_v0  ;;  %v550_v26 = vadd.f32 %v956_v34, %v1565_v48  ;;  %992 = vmatprep.mubr.f32.mxu0 %v619_v4  ;;  %v605_v23 = vadd.f32 1.0, %v1088_v1 }
 0x21d   :  { %v1090_v20 = vpop.eup %1089  ;;  %v544_v8 = vpop.f32.mrf.mxu0  ;;  %993 = vmatmul.mubr.f32.gmra.mxu0 %v620_v25  ;;  %v622_v61 = vmul.f32 %v606_v13, %v558_v29  ;;  %v565_v62 = vmul.f32 0.5, %v535_v0  ;;  %v566_v4 = vmul.f32 0.5, %v1598_v53  ;;  %v1614_v29 = vld [vmem:[%s1719_s7] ss:$0 sm:$0xff] }
 0x21e   :  { %1103 = verf.f32 %v581_v5  ;;  %v584_v42 = vmul.f32 0.70710677, %v550_v26  ;;  %v545_v36 = vadd.f32 %v1565_v48, %v544_v8  ;;  %v621_v33 = vmul.f32 %v605_v23, %v557_v63 }
 0x21f   :  { %v1092_v32 = vpop.eup %1091  ;;  %v608_v44 = vadd.f32 1.0, %v1090_v20  ;;  %v568_v38 = vmul.f32 0.5, %v550_v26 }
 0x220   :  { %1105 = verf.f32 %v584_v42  ;;  %v583_v56 = vmul.f32 0.70710677, %v545_v36  ;;  %v607_v7 = vadd.f32 1.0, %v1092_v32  ;;  %995 = vmatprep.mubr.f32.mxu0 %v621_v33  ;;  %v567_v5 = vmul.f32 0.5, %v545_v36 }
 0x221   :  { %v1094_v28 = vpop.eup %1093  ;;  %996 = vmatmul.mubr.f32.gmra.mxu0 %v622_v61  ;;  %v624_v39 = vmul.f32 %v608_v44, %v560_v10 }
 0x222   :  { %1107 = verf.f32 %v583_v56  ;;  %v623_v2 = vmul.f32 %v607_v7, %v559_v46  ;;  %v610_v48 = vadd.f32 1.0, %v1094_v28 }
 0x223   :  { %v1096_v41 = vpop.eup %1095 }
 0x224   :  { %998 = vmatprep.mubr.f32.mxu1 %v623_v2  ;;  %v609_v21 = vadd.f32 1.0, %v1096_v41  ;;  %v626_v9 = vmul.f32 %v610_v48, %v562_v49 }
 0x225   :  { %v1098_v43 = vpop.eup %1097  ;;  %999 = vmatmul.mubr.f32.vlgmr.msra.gmra.mxu1 %v624_v39 }
 0x226   :  { %v625_v59 = vmul.f32 %v609_v21, %v561_v24  ;;  %v612_v52 = vadd.f32 1.0, %v1098_v43 }
 0x227   :  { %v1100_v45 = vpop.eup %1099 }
 0x228   :  { %v611_v51 = vadd.f32 1.0, %v1100_v45  ;;  %1001 = vmatprep.mubr.f32.mxu1 %v625_v59  ;;  %v628_v35 = vmul.f32 %v612_v52, %v564_v19 }
 0x229   :  { %v1102_v54 = vpop.eup %1101  ;;  %1002 = vmatmul.mubr.f32.gmra.mxu1 %v626_v9 }
 0x22a   :  { %v627_v55 = vmul.f32 %v611_v51, %v563_v18  ;;  %v614_v34 = vadd.f32 1.0, %v1102_v54 }
 0x22b   :  { %v1104_v58 = vpop.eup %1103 }
 0x22c   :  { %1004 = vmatprep.mubr.f32.mxu1 %v627_v55  ;;  %v613_v1 = vadd.f32 1.0, %v1104_v58  ;;  %v630_v13 = vmul.f32 %v614_v34, %v566_v4 }
 0x22d   :  { %v1106_v31 = vpop.eup %1105  ;;  %1005 = vmatmul.mubr.f32.gmra.mxu1 %v628_v35 }
 0x22e   :  { %v629_v17 = vmul.f32 %v613_v1, %v565_v62  ;;  %v616_v63 = vadd.f32 1.0, %v1106_v31 }
 0x22f   :  { %v1108_v25 = vpop.eup %1107 }
 0x230   :  { %1007 = vmatprep.mubr.f32.mxu1 %v629_v17  ;;  %v615_v20 = vadd.f32 1.0, %v1108_v25  ;;  %v632_v0 = vmul.f32 %v616_v63, %v568_v38 }
 0x231   :  { %1008 = vmatmul.mubr.f32.gmra.mxu1 %v630_v13 }
 0x232   :  { %v631_v8 = vmul.f32 %v615_v20, %v567_v5 }
 0x234   :  { %1010 = vmatprep.mubr.f32.mxu1 %v631_v8 }
 0x235   :  { %1011 = vmatmul.mubr.f32.gmra.mxu1 %v632_v0 }
 0x2d9   :  { %v991_v23 = vpop.f32.mrf.mxu0 }
 0x2da   :  { %v795_v53 = vadd.f32 %v991_v23, %v1188_v16 }
 0x2db   :  { %v715_v42 = vpop.f32.mrf.mxu0 }
 0x2dc   :  { %v818_v36 = vadd.f32 %v1614_v29, %v795_v53  ;;  %v794_v32 = vadd.f32 %v715_v42, %v1178_v11 }
 0x2dd   :  { %v994_v33 = vpop.f32.mrf.mxu0 }
 0x2de   :  { %834 = vst.msk [vmem:[%s1720_s8 + $0x8] sm:$0xff] %vm93_vm0, %v818_v36  ;;  %v817_v26 = vadd.f32 %v1614_v29, %v794_v32  ;;  %v797_v46 = vadd.f32 %v994_v33, %v1198_v22 }
 0x2df   :  { %v725_v16 = vpop.f32.mrf.mxu0 }
 0x2e0   :  { %833 = vst.msk [vmem:[%s1720_s8] sm:$0xff] %vm93_vm0, %v817_v26  ;;  %v820_v44 = vadd.f32 %v1614_v29, %v797_v46  ;;  %v796_v11 = vadd.f32 %v725_v16, %v1186_v15 }
 0x2e1   :  { %v997_v56 = vpop.f32.mrf.mxu0 }
 0x2e2   :  { %836 = vst.msk [vmem:[%s1720_s8 + $0x18] sm:$0xff] %vm93_vm0, %v820_v44  ;;  %v819_v61 = vadd.f32 %v1614_v29, %v796_v11  ;;  %v799_v22 = vadd.f32 %v997_v56, %v1214_v30 }
 0x2e3   :  { %v735_v7 = vpop.f32.mrf.mxu0 }
 0x2e4   :  { %835 = vst.msk [vmem:[%s1720_s8 + $0x10] sm:$0xff] %vm93_vm0, %v819_v61  ;;  %v822_v28 = vadd.f32 %v1614_v29, %v799_v22  ;;  %v798_v15 = vadd.f32 %v735_v7, %v1210_v27 }
 0x2e5   :  { %v1000_v10 = vpop.f32.mrf.mxu1 }
 0x2e6   :  { %v801_v2 = vadd.f32 %v1000_v10, %v1234_v40  ;;  %838 = vst.msk [vmem:[%s1720_s8 + $0x28] sm:$0xff] %vm93_vm0, %v822_v28  ;;  %v821_v30 = vadd.f32 %v1614_v29, %v798_v15 }
 0x2e7   :  { %v745_v39 = vpop.f32.mrf.mxu1 }
 0x2e8   :  { %v824_v41 = vadd.f32 %v1614_v29, %v801_v2  ;;  %v800_v48 = vadd.f32 %v745_v39, %v1230_v37  ;;  %837 = vst.msk [vmem:[%s1720_s8 + $0x20] sm:$0xff] %vm93_vm0, %v821_v30 }
 0x2e9   :  { %v1003_v40 = vpop.f32.mrf.mxu1 }
 0x2ea   :  { %840 = vst.msk [vmem:[%s1720_s8 + $0x38] sm:$0xff] %vm93_vm0, %v824_v41  ;;  %v823_v27 = vadd.f32 %v1614_v29, %v800_v48  ;;  %v803_v43 = vadd.f32 %v1003_v40, %v1254_v50 }
 0x2eb   :  { %v755_v37 = vpop.f32.mrf.mxu1 }
 0x2ec   :  { %839 = vst.msk [vmem:[%s1720_s8 + $0x30] sm:$0xff] %vm93_vm0, %v823_v27  ;;  %v826_v24 = vadd.f32 %v1614_v29, %v803_v43  ;;  %v802_v21 = vadd.f32 %v755_v37, %v1250_v47 }
 0x2ed   :  { %v1006_v49 = vpop.f32.mrf.mxu1 }
 0x2ee   :  { %842 = vst.msk [vmem:[%s1720_s8 + $0x48] sm:$0xff] %vm93_vm0, %v826_v24  ;;  %v825_v45 = vadd.f32 %v1614_v29, %v802_v21  ;;  %v805_v50 = vadd.f32 %v1006_v49, %v1274_v60 }
 0x2ef   :  { %v765_v59 = vpop.f32.mrf.mxu1 }
 0x2f0   :  { %841 = vst.msk [vmem:[%s1720_s8 + $0x40] sm:$0xff] %vm93_vm0, %v825_v45  ;;  %v828_v18 = vadd.f32 %v1614_v29, %v805_v50  ;;  %v804_v47 = vadd.f32 %v765_v59, %v1270_v57 }
 0x2f1   :  { %v1009_v9 = vpop.f32.mrf.mxu1 }
 0x2f2   :  { %844 = vst.msk [vmem:[%s1720_s8 + $0x58] sm:$0xff] %vm93_vm0, %v828_v18  ;;  %v827_v51 = vadd.f32 %v1614_v29, %v804_v47  ;;  %v807_v60 = vadd.f32 %v1009_v9, %v1294_v6 }
 0x2f3   :  { %v775_v52 = vpop.f32.mrf.mxu1 }
 0x2f4   :  { %843 = vst.msk [vmem:[%s1720_s8 + $0x50] sm:$0xff] %vm93_vm0, %v827_v51  ;;  %v830_v54 = vadd.f32 %v1614_v29, %v807_v60  ;;  %v806_v57 = vadd.f32 %v775_v52, %v1290_v3 }
 0x2f5   :  { %v1012_v19 = vpop.f32.mrf.mxu1 }
 0x2f6   :  { %846 = vst.msk [vmem:[%s1720_s8 + $0x68] sm:$0xff] %vm93_vm0, %v830_v54  ;;  %v829_v55 = vadd.f32 %v1614_v29, %v806_v57  ;;  %v809_v6 = vadd.f32 %v1012_v19, %v1308_v14 }
 0x2f7   :  { %v785_v58 = vpop.f32.mrf.mxu1 }
 0x2f8   :  { %845 = vst.msk [vmem:[%s1720_s8 + $0x60] sm:$0xff] %vm93_vm0, %v829_v55  ;;  %v832_v62 = vadd.f32 %v1614_v29, %v809_v6  ;;  %v808_v3 = vadd.f32 %v785_v58, %v1304_v12 }
 0x2fa   :  { %848 = vst.msk [vmem:[%s1720_s8 + $0x78] sm:$0xff] %vm93_vm0, %v832_v62  ;;  %v831_v35 = vadd.f32 %v1614_v29, %v808_v3 }
 0x2fc   :  { %847 = vst.msk [vmem:[%s1720_s8 + $0x70] sm:$0xff] %vm93_vm0, %v831_v35 }

// kernel: basic_layer_forward.4
= control target key start
LH: loop header
LB: loop body
LE: loop exit
PB: predicated region body
PF: predicated region fallthrough
CT: control target
= control target key end

     0   :  { %s5039_s30 = smov 0   ;;  %s5960_s0 = inlined_call_operand.vmem [shape: f32[2,64,32], index: 0, kind: input, shape index: {}]   ;;  %s5961_s1 = inlined_call_operand.vmem [shape: f32[1,32], index: 1, kind: input, shape index: {}]   ;;  %s5962_s2 = inlined_call_operand.vmem [shape: f32[1,32], index: 2, kind: input, shape index: {}]   ;;  %s5963_s3 = inlined_call_operand.vmem [shape: f32[32,96], index: 3, kind: input, shape index: {}]   ;;  %s5964_s4 = inlined_call_operand.vmem [shape: f32[1,96], index: 4, kind: input, shape index: {}]   ;;  %s5965_s5 = inlined_call_operand.vmem [shape: f32[32,32], index: 5, kind: input, shape index: {}]   ;;  %s5966_s6 = inlined_call_operand.vmem [shape: f32[1,32], index: 6, kind: input, shape index: {}]   ;;  %s5967_s7 = inlined_call_operand.vmem [shape: f32[4,16,16], index: 7, kind: input, shape index: {}]   ;;  %s5968_s8 = inlined_call_operand.vmem [shape: f32[4,16,16], index: 8, kind: input, shape index: {}]   ;;  %s5969_s9 = inlined_call_operand.vmem [shape: f32[2,64,32], index: 9, kind: output, shape index: {}]  }
   0x1 LB: > { %s4234_s10 = sadd.s32 4294967295, %s4973_s30   ;;  %p4238_p0 = scmp.ge.s32.totalorder %s4973_s30, 1  ;;  %s4973_s30 = sphi %s5039_s30, %s19_s30  }
   0x2   : > { %p287_p1 = scmp.lt.s32.totalorder %s4973_s30, 3 }
   0x4   : > { %p288_p2 = pnand %p4238_p0, %p287_p1 }
   0x5   : > { %p323_p3 = scmp.lt.s32.totalorder (!%p288_p2), %s4234_s10, 1  ;;  %s4975_s29 = smov (!%p288_p2), 96  }
   0x6   : > { %291 = sbr.rel (%p288_p2) target bundleno = 3293 (0xcdd), region = 56  ;;  %s4977_s15 = smov (!%p288_p2), 88  }
   0x7   : > { %s4978_s16 = smov (!%p288_p2), 120   ;;  %s4979_s21 = smov (!%p288_p2), 56  }
   0x8   : > { %s4980_s22 = smov (!%p288_p2), 80   ;;  %s4981_s23 = smov (!%p288_p2), 112  }
   0x9   : > { %s4982_s28 = smov (!%p288_p2), 48   ;;  %s4984_s12 = smov (!%p288_p2), 104  }
   0xa   : > { %s4987_s17 = smov (!%p288_p2), 16   ;;  %s4988_s26 = smov (!%p288_p2), 24  }
   0xb   : > { %s5971_s10 = smov (!%p323_p3, %s4234_s10), 1  ;;  %vm341_vm0 = vcmask 261120   ;;  %v480_v56 = vld [vmem:[%s5963_s3 + $0x18] sm:$0xff]  ;;  %v479_v57 = vld [vmem:[%s5963_s3 + $0x10] sm:$0xff]  ;;  %v478_v58 = vld [vmem:[%s5963_s3 + $0x8] sm:$0xff]  ;;  %vm641_vm1 = vcmask 64512  }
   0xc   : > { %s4367_s11 = sshll.u32 %s5971_s10, 6  ;;  %4521 = vmatprep.subr.mxu0 %v480_v56  ;;  %4785 = vmatprep.subr.mxu1 %v480_v56  ;;  %v477_v59 = vld [vmem:[%s5963_s3] sm:$0xff]  ;;  %vm1008_vm2 = vcmask 130048   ;;  %vm4022_vm3 = vcmask 195584  }
   0xd   : > { %s327_s14 = scalar_lea.vmem %s5960_s0, %s4367_s11  ;;  %4522 = vmatpush3.msra.mxu0 %v480_v56  ;;  %4789 = vmatpush3.msra.mxu1 %v480_v56  ;;  %s332_s13 = scalar_lea.vmem %s5969_s9, %s4367_s11 }
   0xe   : > { %v333_v0 = vld [vmem:[%s327_s14] sm:$0xff]  ;;  %v335_v1 = vld [vmem:[%s327_s14 + $0x10] sm:$0xff]  ;;  %v334_v2 = vld [vmem:[%s327_s14 + $0x8] sm:$0xff]  ;;  %4523 = vmatprep.subr.mxu0 %v479_v57  ;;  %4786 = vmatprep.subr.mxu1 %v479_v57 }
   0xf   : > { %v342_v3 = vsel %vm341_vm0, %v333_v0, 0.0  ;;  %v348_v4 = vsel %vm341_vm0, %v335_v1, 0.0  ;;  %v336_v5 = vld [vmem:[%s327_s14 + $0x18] sm:$0xff]  ;;  %v345_v6 = vsel %vm341_vm0, %v334_v2, 0.0  ;;  %v337_v8 = vld [vmem:[%s327_s14 + $0x20] sm:$0xff]  ;;  %v338_v9 = vld [vmem:[%s327_s14 + $0x28] sm:$0xff]  ;;  %4524 = vmatpush3.msra.mxu0 %v479_v57  ;;  %4790 = vmatpush3.msra.mxu1 %v479_v57 }
  0x10   : > { %343 = vadd.xlane.f32.xlu0 %v342_v3  ;;  %349 = vadd.xlane.f32.xlu1 %v348_v4  ;;  %v351_v7 = vsel %vm341_vm0, %v336_v5, 0.0  ;;  %v354_v10 = vsel %vm341_vm0, %v337_v8, 0.0  ;;  %v357_v11 = vsel %vm341_vm0, %v338_v9, 0.0  ;;  %v339_v12 = vld [vmem:[%s327_s14 + $0x30] sm:$0xff]  ;;  %v340_v13 = vld [vmem:[%s327_s14 + $0x38] sm:$0xff]  ;;  %s4976_s14 = smov 64  }
  0x11   : > { %v360_v14 = vsel %vm341_vm0, %v339_v12, 0.0  ;;  %v363_v15 = vsel %vm341_vm0, %v340_v13, 0.0  ;;  %4525 = vmatprep.subr.mxu0 %v478_v58  ;;  %4787 = vmatprep.subr.mxu1 %v478_v58 }
  0x12   : > { %4526 = vmatpush3.msra.mxu0 %v478_v58  ;;  %4791 = vmatpush3.msra.mxu1 %v478_v58 }
  0x13   : > { %4527 = vmatprep.subr.mxu0 %v477_v59  ;;  %4788 = vmatprep.subr.mxu1 %v477_v59 }
  0x14   : > { %346 = vadd.xlane.f32.xlu0 %v345_v6  ;;  %352 = vadd.xlane.f32.xlu1 %v351_v7 }
  0x15   : > { %4528 = vmatpush3.msra.mxu0 %v477_v59  ;;  %4792 = vmatpush3.msra.mxu1 %v477_v59 }
  0x18   : > { %355 = vadd.xlane.f32.xlu0 %v354_v10  ;;  %358 = vadd.xlane.f32.xlu1 %v357_v11 }
  0x1c   : > { %361 = vadd.xlane.f32.xlu0 %v360_v14  ;;  %364 = vadd.xlane.f32.xlu1 %v363_v15 }
  0x99   : > { %v344_v16 = vpop.xlane.xlu0 %343  ;;  %v350_v17 = vpop.xlane.xlu1 %349 }
  0x9a   : > { %v367_v18 = vmul.f32 0.03125, %v344_v16  ;;  %v369_v19 = vmul.f32 0.03125, %v350_v17 }
  0x9c   : > { %v5063_v20 = vsub.f32 %v333_v0, %v367_v18  ;;  %v5065_v21 = vsub.f32 %v335_v1, %v369_v19 }
  0x9d   : > { %v347_v22 = vpop.xlane.xlu0 %346  ;;  %v353_v23 = vpop.xlane.xlu1 %352 }
  0x9e   : > { %v368_v24 = vmul.f32 0.03125, %v347_v22  ;;  %v370_v25 = vmul.f32 0.03125, %v353_v23  ;;  %v383_v26 = vmul.f32 %v5063_v20, %v5063_v20  ;;  %v385_v27 = vmul.f32 %v5065_v21, %v5065_v21  ;;  %v4243_v22 = vld [vmem:[%s5961_s1] ss:$0 sm:$0xff] }
  0xa0   : > { %v5071_v28 = vsub.f32 %v334_v2, %v368_v24  ;;  %v5073_v29 = vsub.f32 %v336_v5, %v370_v25  ;;  %v391_v30 = vsel %vm341_vm0, %v383_v26, 0.0  ;;  %v397_v33 = vsel %vm341_vm0, %v385_v27, 0.0  ;;  %v4244_v25 = vld [vmem:[%s5962_s2] ss:$0 sm:$0xff] }
  0xa1   : > { %392 = vadd.xlane.f32.xlu0 %v391_v30  ;;  %v356_v31 = vpop.xlane.xlu0 %355  ;;  %v359_v32 = vpop.xlane.xlu1 %358 }
  0xa2   : > { %v371_v34 = vmul.f32 0.03125, %v356_v31  ;;  %v372_v35 = vmul.f32 0.03125, %v359_v32  ;;  %v384_v36 = vmul.f32 %v5071_v28, %v5071_v28  ;;  %v386_v37 = vmul.f32 %v5073_v29, %v5073_v29 }
  0xa4   : > { %v5081_v38 = vsub.f32 %v337_v8, %v371_v34  ;;  %v5083_v39 = vsub.f32 %v338_v9, %v372_v35  ;;  %v394_v40 = vsel %vm341_vm0, %v384_v36, 0.0  ;;  %v400_v43 = vsel %vm341_vm0, %v386_v37, 0.0 }
  0xa5   : > { %398 = vadd.xlane.f32.xlu0 %v397_v33  ;;  %395 = vadd.xlane.f32.xlu1 %v394_v40  ;;  %v362_v41 = vpop.xlane.xlu0 %361  ;;  %v365_v42 = vpop.xlane.xlu1 %364 }
  0xa6   : > { %v373_v44 = vmul.f32 0.03125, %v362_v41  ;;  %v374_v45 = vmul.f32 0.03125, %v365_v42  ;;  %v387_v46 = vmul.f32 %v5081_v38, %v5081_v38  ;;  %v388_v47 = vmul.f32 %v5083_v39, %v5083_v39 }
  0xa8   : > { %v5091_v48 = vsub.f32 %v339_v12, %v373_v44  ;;  %v5093_v49 = vsub.f32 %v340_v13, %v374_v45  ;;  %v403_v50 = vsel %vm341_vm0, %v387_v46, 0.0  ;;  %v406_v51 = vsel %vm341_vm0, %v388_v47, 0.0 }
  0xa9   : > { %401 = vadd.xlane.f32.xlu1 %v400_v43  ;;  %404 = vadd.xlane.f32.xlu0 %v403_v50 }
  0xaa   : > { %v389_v52 = vmul.f32 %v5091_v48, %v5091_v48  ;;  %v390_v53 = vmul.f32 %v5093_v49, %v5093_v49 }
  0xac   : > { %v409_v54 = vsel %vm341_vm0, %v389_v52, 0.0  ;;  %v412_v55 = vsel %vm341_vm0, %v390_v53, 0.0 }
  0xad   : > { %407 = vadd.xlane.f32.xlu1 %v406_v51  ;;  %410 = vadd.xlane.f32.xlu0 %v409_v54 }
  0xb1   : > { %413 = vadd.xlane.f32.xlu1 %v412_v55 }
 0x12a   : > { %v393_v60 = vpop.xlane.xlu0 %392 }
 0x12b   : > { %v415_v61 = vmul.f32 0.03125, %v393_v60 }
 0x12d   : > { %v423_v62 = vadd.f32 1e-05, %v415_v61 }
 0x12e   : > { %v396_v63 = vpop.xlane.xlu1 %395  ;;  %v399_v0 = vpop.xlane.xlu0 %398 }
 0x12f   : > { %4815 = vrsqrt.f32 %v423_v62  ;;  %v416_v1 = vmul.f32 0.03125, %v396_v63  ;;  %v417_v2 = vmul.f32 0.03125, %v399_v0 }
 0x131   : > { %v424_v3 = vadd.f32 1e-05, %v416_v1  ;;  %v425_v4 = vadd.f32 1e-05, %v417_v2 }
 0x132   : > { %v402_v5 = vpop.xlane.xlu1 %401  ;;  %v405_v6 = vpop.xlane.xlu0 %404 }
 0x133   : > { %4817 = vrsqrt.f32 %v424_v3  ;;  %v418_v7 = vmul.f32 0.03125, %v402_v5  ;;  %v419_v8 = vmul.f32 0.03125, %v405_v6 }
 0x134   : > { %4819 = vrsqrt.f32 %v425_v4 }
 0x135   : > { %v426_v9 = vadd.f32 1e-05, %v418_v7  ;;  %v427_v10 = vadd.f32 1e-05, %v419_v8 }
 0x136   : > { %v408_v11 = vpop.xlane.xlu1 %407  ;;  %v411_v12 = vpop.xlane.xlu0 %410 }
 0x137   : > { %4821 = vrsqrt.f32 %v426_v9  ;;  %v420_v13 = vmul.f32 0.03125, %v408_v11  ;;  %v421_v14 = vmul.f32 0.03125, %v411_v12 }
 0x138   : > { %4823 = vrsqrt.f32 %v427_v10 }
 0x139   : > { %v428_v15 = vadd.f32 1e-05, %v420_v13  ;;  %v429_v16 = vadd.f32 1e-05, %v421_v14 }
 0x13a   : > { %v414_v17 = vpop.xlane.xlu1 %413 }
 0x13b   : > { %4825 = vrsqrt.f32 %v428_v15  ;;  %v422_v18 = vmul.f32 0.03125, %v414_v17 }
 0x13c   : > { %v4816_v19 = vpop.eup %4815  ;;  %4827 = vrsqrt.f32 %v429_v16 }
 0x13d   : > { %v430_v23 = vadd.f32 1e-05, %v422_v18  ;;  %v439_v24 = vmul.f32 %v4816_v19, %v5063_v20 }
 0x13f   : > { %4829 = vrsqrt.f32 %v430_v23  ;;  %v454_v26 = vmul.f32 %v4243_v22, %v439_v24 }
 0x140   : > { %v4818_v27 = vpop.eup %4817 }
 0x141   : > { %v4820_v30 = vpop.eup %4819  ;;  %v469_v31 = vadd.f32 %v4244_v25, %v454_v26  ;;  %v440_v32 = vmul.f32 %v4818_v27, %v5071_v28  ;;  %v633_v27 = vld [vmem:[%s5967_s7] sm:$0xff] }
 0x142   : > { %v441_v33 = vmul.f32 %v4820_v30, %v5065_v21  ;;  %v5229_v30 = vld [vmem:[%s5968_s8 + $0x8] sm:$0xff] }
 0x143   : > { %4529 = vmatprep.mubr.msk.f32.mxu0 %vm341_vm0, %v469_v31  ;;  %v455_v34 = vmul.f32 %v4243_v22, %v440_v32 }
 0x144   : > { %v4822_v35 = vpop.eup %4821  ;;  %v456_v36 = vmul.f32 %v4243_v22, %v441_v33  ;;  %v5234_v33 = vld [vmem:[%s5968_s8] sm:$0xff] }
 0x145   : > { %v4824_v37 = vpop.eup %4823  ;;  %v470_v20 = vadd.f32 %v4244_v25, %v455_v34  ;;  %v442_v40 = vmul.f32 %v4822_v35, %v5073_v29 }
 0x146   : > { %v471_v41 = vadd.f32 %v4244_v25, %v456_v36  ;;  %v443_v42 = vmul.f32 %v4824_v37, %v5081_v38 }
 0x147   : > { %4530 = vmatmul.mubr.msk.f32.vlgmr.msra.gmra.mxu0 %vm341_vm0, %v470_v20  ;;  %v457_v43 = vmul.f32 %v4243_v22, %v442_v40 }
 0x148   : > { %v4826_v44 = vpop.eup %4825  ;;  %4532 = vmatprep.mubr.msk.f32.mxu0 %vm341_vm0, %v471_v41  ;;  %v458_v28 = vmul.f32 %v4243_v22, %v443_v42  ;;  %v5249_v42 = vld [vmem:[%s5968_s8 + $0x28] sm:$0xff] }
 0x149   : > { %v4828_v21 = vpop.eup %4827  ;;  %v472_v45 = vadd.f32 %v4244_v25, %v457_v43  ;;  %v444_v46 = vmul.f32 %v4826_v44, %v5083_v39 }
 0x14a   : > { %v473_v47 = vadd.f32 %v4244_v25, %v458_v28  ;;  %v445_v50 = vmul.f32 %v4828_v21, %v5091_v48  ;;  %v4245_v48 = vld [vmem:[%s5964_s4] ss:$0 sm:$0xff] }
 0x14b   : > { %4533 = vmatmul.mubr.msk.f32.gmra.mxu0 %vm341_vm0, %v472_v45  ;;  %v459_v29 = vmul.f32 %v4243_v22, %v444_v46  ;;  %v5254_v28 = vld [vmem:[%s5968_s8 + $0x20] sm:$0xff] }
 0x14c   : > { %v4830_v51 = vpop.eup %4829  ;;  %4535 = vmatprep.mubr.msk.f32.mxu1 %vm341_vm0, %v473_v47  ;;  %v460_v38 = vmul.f32 %v4243_v22, %v445_v50  ;;  %v5260_v50 = vld [vmem:[%s5968_s8 + $0x18] sm:$0xff] }
 0x14d   : > { %v474_v52 = vadd.f32 %v4244_v25, %v459_v29  ;;  %v446_v53 = vmul.f32 %v4830_v51, %v5093_v49 }
 0x14e   : > { %v475_v54 = vadd.f32 %v4244_v25, %v460_v38 }
 0x14f   : > { %4536 = vmatmul.mubr.msk.f32.vlgmr.msra.gmra.mxu1 %vm341_vm0, %v474_v52  ;;  %v461_v55 = vmul.f32 %v4243_v22, %v446_v53  ;;  %v5267_v52 = vld [vmem:[%s5968_s8 + $0x38] sm:$0xff] }
 0x150   : > { %4538 = vmatprep.mubr.msk.f32.mxu1 %vm341_vm0, %v475_v54 }
 0x151   : > { %v476_v39 = vadd.f32 %v4244_v25, %v461_v55  ;;  %v634_v25 = vld [vmem:[%s5967_s7 + $0x8] sm:$0xff] }
 0x153   : > { %4539 = vmatmul.mubr.msk.f32.gmra.mxu1 %vm341_vm0, %v476_v39 }
 0x207   : > { %v4531_v56 = vpop.f32.mrf.mxu0 }
 0x208   : > { %v5140_v57 = vadd.f32 %v4531_v56, %v4245_v48  ;;  %v5274_v56 = vld [vmem:[%s5968_s8 + $0x10] sm:$0xff] }
 0x209   : > { %v578_v58 = vpop.f32.mrf.mxu0 }
 0x20a   : > { %v5142_v59 = vadd.f32 %v4245_v48, %v578_v58  ;;  %639 = vrot.lane.b32.xlu0 %v5140_v57, %s4975_s29  ;;  %v5180_v12 = vmul.f32 0.35355338, %v5140_v57 }
 0x20b   : > { %v4534_v49 = vpop.f32.mrf.mxu0 }
 0x20c   : > { %637 = vrot.lane.b32.xlu1 %v5142_v59, %s4975_s29  ;;  %v5147_v60 = vmul.f32 0.35355338, %v5142_v59  ;;  %v5149_v61 = vadd.f32 %v4534_v49, %v4245_v48 }
 0x20d   : > { %v588_v62 = vpop.f32.mrf.mxu0 }
 0x20e   : > { %4545 = vmatprep.mubr.msk.f32.mxu1 %vm641_vm1, %v5147_v60  ;;  %v5156_v2 = vadd.f32 %v4245_v48, %v588_v62  ;;  %v5197_v18 = vmul.f32 0.35355338, %v5149_v61 }
 0x20f   : > { %v4537_v63 = vpop.f32.mrf.mxu1 }
 0x210   : > { %v5153_v0 = vadd.f32 %v4537_v63, %v4245_v48  ;;  %731 = vrot.lane.b32.xlu1 %v5149_v61, %s4975_s29  ;;  %v5183_v14 = vmul.f32 0.35355338, %v5156_v2 }
 0x211   : > { %v598_v1 = vpop.f32.mrf.mxu1 }
 0x212   : > { %v5158_v3 = vadd.f32 %v4245_v48, %v598_v1  ;;  %822 = vrot.lane.b32.xlu0 %v5153_v0, %s4975_s29  ;;  %v5206_v22 = vmul.f32 0.35355338, %v5153_v0 }
 0x213   : > { %v4540_v4 = vpop.f32.mrf.mxu1 }
 0x214   : > { %v5161_v5 = vadd.f32 %v4540_v4, %v4245_v48  ;;  %729 = vrot.lane.b32.xlu1 %v5156_v2, %s4975_s29  ;;  %v5165_v6 = vmul.f32 0.35355338, %v5158_v3  ;;  %v5283_v4 = vld [vmem:[%s5968_s8 + $0x30] sm:$0xff] }
 0x215   : > { %v608_v7 = vpop.f32.mrf.mxu1 }
 0x216   : > { %4559 = vmatprep.mubr.msk.f32.mxu0 %vm641_vm1, %v5165_v6  ;;  %913 = vrot.lane.b32.xlu0 %v5161_v5, %s4975_s29  ;;  %v5171_v8 = vadd.f32 %v4245_v48, %v608_v7  ;;  %v5216_v24 = vmul.f32 0.35355338, %v5161_v5 }
 0x218   : > { %820 = vrot.lane.b32.xlu1 %v5158_v3, %s4975_s29  ;;  %v5201_v19 = vmul.f32 0.35355338, %v5171_v8 }
 0x21c   : > { %911 = vrot.lane.b32.xlu1 %v5171_v8, %s4975_s29  ;;  %s4983_s29 = smov 72  }
 0x27c   : > { %v640_v9 = vpop.permute.xlu0 %639 }
 0x27d   : > { %4541 = vmatprep.subr.msk.mxu1 %vm641_vm1, %v640_v9 }
 0x27e   : > { %v638_v10 = vpop.permute.xlu1 %637  ;;  %4542 = vmatpush3.xpose.msk.msra.mxu1 %vm641_vm1, %v640_v9 }
 0x27f   : > { %4543 = vmatprep.subr.msk.mxu1 %vm641_vm1, %v638_v10 }
 0x282   : > { %v732_v11 = vpop.permute.xlu1 %731  ;;  %4544 = vmatpush3.xpose.msk.msra.mxu1 %vm641_vm1, %v638_v10 }
 0x283   : > { %4548 = vmatprep.subr.msk.mxu1 %vm641_vm1, %v732_v11 }
 0x284   : > { %v823_v13 = vpop.permute.xlu0 %822 }
 0x285   : > { %4546 = vmatmul.mubr.msk.f32.vlgmr.msra.gmra.mxu1 %vm641_vm1, %v5180_v12  ;;  %4555 = vmatprep.subr.msk.mxu0 %vm641_vm1, %v823_v13 }
 0x286   : > { %v730_v15 = vpop.permute.xlu1 %729  ;;  %4549 = vmatpush3.xpose.msk.msra.mxu1 %vm641_vm1, %v732_v11  ;;  %4552 = vmatprep.mubr.msk.f32.mxu1 %vm641_vm1, %v5183_v14 }
 0x287   : > { %4556 = vmatpush3.xpose.msk.msra.mxu0 %vm641_vm1, %v823_v13  ;;  %4550 = vmatprep.subr.msk.mxu1 %vm641_vm1, %v730_v15 }
 0x288   : > { %v914_v16 = vpop.permute.xlu0 %913 }
 0x28a   : > { %v821_v17 = vpop.permute.xlu1 %820  ;;  %4551 = vmatpush3.xpose.msk.msra.mxu1 %vm641_vm1, %v730_v15 }
 0x28b   : > { %4557 = vmatprep.subr.msk.mxu0 %vm641_vm1, %v821_v17  ;;  %4562 = vmatprep.subr.msk.mxu1 %vm641_vm1, %v914_v16 }
 0x28c   : > { %4558 = vmatpush3.xpose.msk.msra.mxu0 %vm641_vm1, %v821_v17 }
 0x28d   : > { %4553 = vmatmul.mubr.msk.f32.vlgmr.msra.gmra.mxu1 %vm641_vm1, %v5197_v18 }
 0x28e   : > { %v912_v23 = vpop.permute.xlu1 %911  ;;  %4563 = vmatpush3.xpose.msk.msra.mxu1 %vm641_vm1, %v914_v16  ;;  %4566 = vmatprep.mubr.msk.f32.mxu1 %vm641_vm1, %v5201_v19 }
 0x28f   : > { %4560 = vmatmul.mubr.msk.f32.vlgmr.msra.gmra.mxu0 %vm641_vm1, %v5206_v22  ;;  %4564 = vmatprep.subr.msk.mxu1 %vm641_vm1, %v912_v23 }
 0x292   : > { %4565 = vmatpush3.xpose.msk.msra.mxu1 %vm641_vm1, %v912_v23 }
 0x295   : > { %4567 = vmatmul.mubr.msk.f32.vlgmr.msra.gmra.mxu1 %vm641_vm1, %v5216_v24 }
 0x345   : > { %v4547_v26 = vpop.f32.mrf.mxu1 }
 0x346   : > { %v724_v31 = vadd.f32 %v4547_v26, %v634_v25 }
 0x347   : > { %v718_v32 = vpop.f32.mrf.mxu1 }
 0x348   : > { %v719_v34 = vadd.f32 %v718_v32, %v633_v27  ;;  %v5237_v35 = vadd.f32 %v724_v31, %v5229_v30 }
 0x34a   : > { %v1012_v36 = vsel %vm1008_vm2, %v5237_v35, -inf  ;;  %v5242_v37 = vadd.f32 %v719_v34, %v5234_v33 }
 0x34b   : > { %1013 = vmax.xlane.f32.xlu1 %v1012_v36 }
 0x34c   : > { %v1009_v20 = vsel %vm1008_vm2, %v5242_v37, -inf }
 0x34d   : > { %1010 = vmax.xlane.f32.xlu0 %v1009_v20  ;;  %v4554_v40 = vpop.f32.mrf.mxu1 }
 0x34e   : > { %v815_v21 = vadd.f32 %v4554_v40, %v634_v25 }
 0x34f   : > { %v4561_v41 = vpop.f32.mrf.mxu0  ;;  %v809_v47 = vpop.f32.mrf.mxu1 }
 0x350   : > { %v906_v43 = vadd.f32 %v4561_v41, %v634_v25  ;;  %v810_v53 = vadd.f32 %v809_v47, %v633_v27  ;;  %v1003_v39 = vadd.f32 %v815_v21, %v5260_v50 }
 0x351   : > { %v900_v44 = vpop.f32.mrf.mxu0 }
 0x352   : > { %v901_v45 = vadd.f32 %v900_v44, %v633_v27  ;;  %v1005_v46 = vadd.f32 %v906_v43, %v5249_v42  ;;  %v1018_v62 = vsel %vm1008_vm2, %v1003_v39, -inf  ;;  %v1002_v1 = vadd.f32 %v810_v53, %v5274_v56 }
 0x354   : > { %v1024_v29 = vsel %vm1008_vm2, %v1005_v46, -inf  ;;  %v1004_v51 = vadd.f32 %v901_v45, %v5254_v28  ;;  %v1015_v7 = vsel %vm1008_vm2, %v1002_v1, -inf }
 0x355   : > { %1025 = vmax.xlane.f32.xlu1 %v1024_v29  ;;  %v4568_v38 = vpop.f32.mrf.mxu1 }
 0x356   : > { %v997_v54 = vadd.f32 %v4568_v38, %v634_v25  ;;  %v1021_v55 = vsel %vm1008_vm2, %v1004_v51, -inf }
 0x357   : > { %1022 = vmax.xlane.f32.xlu0 %v1021_v55  ;;  %v991_v48 = vpop.f32.mrf.mxu1 }
 0x358   : > { %v1007_v58 = vadd.f32 %v997_v54, %v5267_v52  ;;  %v992_v49 = vadd.f32 %v991_v48, %v633_v27 }
 0x35a   : > { %v1030_v63 = vsel %vm1008_vm2, %v1007_v58, -inf  ;;  %v5287_v9 = vadd.f32 %v992_v49, %v5283_v4 }
 0x35b   : > { %1019 = vmax.xlane.f32.xlu0 %v1018_v62  ;;  %1031 = vmax.xlane.f32.xlu1 %v1030_v63 }
 0x35c   : > { %v1027_v10 = vsel %vm1008_vm2, %v5287_v9, -inf }
 0x35f   : > { %1016 = vmax.xlane.f32.xlu0 %v1015_v7 }
 0x363   : > { %1028 = vmax.xlane.f32.xlu0 %v1027_v10 }
 0x36c   : > { %1105 = vrot.lane.b32.xlu1 %v5142_v59, %s4976_s14 }
 0x370   : > { %1194 = vrot.lane.b32.xlu1 %v5149_v61, %s4976_s14 }
 0x374   : > { %1281 = vrot.lane.b32.xlu1 %v5153_v0, %s4976_s14 }
 0x378   : > { %1279 = vrot.lane.b32.xlu1 %v5158_v3, %s4976_s14 }
 0x379   : > { %1107 = vrot.lane.b32.xlu0 %v5140_v57, %s4976_s14 }
 0x37c   : > { %1462 = vrot.lane.b32.xlu1 %v5140_v57, %s4977_s15 }
 0x37d   : > { %1192 = vrot.lane.b32.xlu0 %v5156_v2, %s4976_s14 }
 0x380   : > { %1460 = vrot.lane.b32.xlu1 %v5142_v59, %s4977_s15 }
 0x381   : > { %1368 = vrot.lane.b32.xlu0 %v5161_v5, %s4976_s14 }
 0x384   : > { %1456 = vrot.lane.b32.xlu1 %v5147_v60, %s4978_s16 }
 0x385   : > { %1366 = vrot.lane.b32.xlu0 %v5171_v8, %s4976_s14 }
 0x388   : > { %1644 = vrot.lane.b32.xlu1 %v5153_v0, %s4977_s15 }
 0x389   : > { %1553 = vrot.lane.b32.xlu0 %v5149_v61, %s4977_s15 }
 0x38c   : > { %1547 = vrot.lane.b32.xlu1 %v5183_v14, %s4978_s16 }
 0x38d   : > { %1551 = vrot.lane.b32.xlu0 %v5156_v2, %s4977_s15 }
 0x391   : > { %1458 = vrot.lane.b32.xlu0 %v5180_v12, %s4978_s16 }
 0x3d4   : > { %v1014_v11 = vpop.xlane.xlu1 %1013 }
 0x3d5   : > { %v1034_v13 = vsub.f32 %v5237_v35, %v1014_v11 }
 0x3d6   : > { %v1011_v15 = vpop.xlane.xlu0 %1010 }
 0x3d7   : > { %v1043_v16 = vmul.f32 1.442695, %v1034_v13  ;;  %v1033_v17 = vsub.f32 %v5242_v37, %v1011_v15 }
 0x3d9   : > { %4831 = vpow2.f32 %v1043_v16  ;;  %v1041_v23 = vmul.f32 1.442695, %v1033_v17 }
 0x3db   : > { %4833 = vpow2.f32 %v1041_v23 }
 0x3de   : > { %v1026_v25 = vpop.xlane.xlu1 %1025 }
 0x3df   : > { %v1038_v26 = vsub.f32 %v1005_v46, %v1026_v25 }
 0x3e0   : > { %v1023_v27 = vpop.xlane.xlu0 %1022 }
 0x3e1   : > { %v1051_v31 = vmul.f32 1.442695, %v1038_v26  ;;  %v1037_v32 = vsub.f32 %v1004_v51, %v1023_v27 }
 0x3e3   : > { %4835 = vpow2.f32 %v1051_v31  ;;  %v1049_v34 = vmul.f32 1.442695, %v1037_v32 }
 0x3e4   : > { %v1032_v36 = vpop.xlane.xlu1 %1031  ;;  %v1020_v20 = vpop.xlane.xlu0 %1019 }
 0x3e5   : > { %4837 = vpow2.f32 %v1049_v34  ;;  %v1040_v40 = vsub.f32 %v1007_v58, %v1032_v36  ;;  %v1036_v41 = vsub.f32 %v1003_v39, %v1020_v20 }
 0x3e6   : > { %v5317_v35 = vpop.eup %4831 }
 0x3e7   : > { %v1055_v43 = vmul.f32 1.442695, %v1040_v40  ;;  %v1047_v44 = vmul.f32 1.442695, %v1036_v41  ;;  %v1060_v37 = vsel %vm1008_vm2, %v5317_v35, 0.0 }
 0x3e8   : > { %v5321_v21 = vpop.eup %4833  ;;  %1061 = vadd.xlane.f32.xlu1 %v1060_v37  ;;  %v1106_v45 = vpop.permute.xlu1 %1105 }
 0x3e9   : > { %v1017_v46 = vpop.xlane.xlu0 %1016  ;;  %4839 = vpow2.f32 %v1055_v43  ;;  %v1057_v29 = vsel %vm1008_vm2, %v5321_v21, 0.0 }
 0x3ea   : > { %v1035_v47 = vsub.f32 %v1002_v1, %v1017_v46  ;;  %4841 = vpow2.f32 %v1047_v44  ;;  %1058 = vadd.xlane.f32.xlu0 %v1057_v29 }
 0x3ec   : > { %v1045_v51 = vmul.f32 1.442695, %v1035_v47  ;;  %v1195_v38 = vpop.permute.xlu1 %1194 }
 0x3ed   : > { %v1029_v53 = vpop.xlane.xlu0 %1028  ;;  %4576 = vmatprep.subr.mxu1 %v1195_v38 }
 0x3ee   : > { %4843 = vpow2.f32 %v1045_v51  ;;  %v1039_v54 = vsub.f32 %v5287_v9, %v1029_v53  ;;  %4577 = vmatpush3.msra.mxu1 %v1195_v38 }
 0x3f0   : > { %v1053_v55 = vmul.f32 1.442695, %v1039_v54  ;;  %v5326_v39 = vpop.eup %4835  ;;  %v1282_v62 = vpop.permute.xlu1 %1281 }
 0x3f1   : > { %v1108_v48 = vpop.permute.xlu0 %1107  ;;  %v1072_v58 = vsel %vm1008_vm2, %v5326_v39, 0.0 }
 0x3f2   : > { %4845 = vpow2.f32 %v1053_v55  ;;  %4569 = vmatprep.subr.mxu0 %v1108_v48  ;;  %v5330_v49 = vpop.eup %4837  ;;  %1073 = vadd.xlane.f32.xlu1 %v1072_v58 }
 0x3f3   : > { %4570 = vmatpush3.msra.mxu0 %v1108_v48  ;;  %v1069_v1 = vsel %vm1008_vm2, %v5330_v49, 0.0 }
 0x3f4   : > { %4571 = vmatprep.subr.mxu0 %v1106_v45  ;;  %v1280_v25 = vpop.permute.xlu1 %1279 }
 0x3f5   : > { %4572 = vmatpush3.msra.mxu0 %v1106_v45  ;;  %v1193_v63 = vpop.permute.xlu0 %1192 }
 0x3f6   : > { %4578 = vmatprep.subr.mxu1 %v1193_v63  ;;  %4583 = vmatprep.subr.mxu0 %v1282_v62  ;;  %v5334_v7 = vpop.eup %4839 }
 0x3f7   : > { %1070 = vadd.xlane.f32.xlu1 %v1069_v1  ;;  %4579 = vmatpush3.msra.mxu1 %v1193_v63  ;;  %v5336_v9 = vpop.eup %4841  ;;  %v1078_v13 = vsel %vm1008_vm2, %v5334_v7, 0.0 }
 0x3f8   : > { %v1066_v10 = vsel %vm1008_vm2, %v5336_v9, 0.0  ;;  %v1463_v26 = vpop.permute.xlu1 %1462 }
 0x3f9   : > { %v5340_v11 = vpop.permute.xlu0 %1368  ;;  %1067 = vadd.xlane.f32.xlu0 %v1066_v10 }
 0x3fa   : > { %4590 = vmatprep.subr.mxu1 %v5340_v11 }
 0x3fb   : > { %v5345_v15 = vpop.eup %4843  ;;  %1079 = vadd.xlane.f32.xlu1 %v1078_v13 }
 0x3fc   : > { %v1063_v16 = vsel %vm1008_vm2, %v5345_v15, 0.0  ;;  %v1461_v27 = vpop.permute.xlu1 %1460 }
 0x3fd   : > { %1064 = vadd.xlane.f32.xlu0 %v1063_v16  ;;  %v1367_v31 = vpop.permute.xlu0 %1366 }
 0x3ff   : > { %v5349_v17 = vpop.eup %4845 }
 0x400   : > { %v1075_v23 = vsel %vm1008_vm2, %v5349_v17, 0.0  ;;  %v1457_v32 = vpop.permute.xlu1 %1456 }
 0x401   : > { %1076 = vadd.xlane.f32.xlu0 %v1075_v23  ;;  %v5369_v34 = vpop.permute.xlu0 %1553 }
 0x404   : > { %v1645_v36 = vpop.permute.xlu1 %1644 }
 0x405   : > { %v5371_v20 = vpop.permute.xlu0 %1551 }
 0x408   : > { %v5373_v40 = vpop.permute.xlu1 %1547 }
 0x409   : > { %v1459_v41 = vpop.permute.xlu0 %1458 }
 0x40c   : > { %1735 = vrot.lane.b32.xlu1 %v5161_v5, %s4977_s15 }
 0x410   : > { %1638 = vrot.lane.b32.xlu1 %v5165_v6, %s4978_s16 }
 0x414   : > { %1733 = vrot.lane.b32.xlu1 %v5171_v8, %s4977_s15 }
 0x417   : > { %1642 = vrot.lane.b32.xlu0 %v5158_v3, %s4977_s15  ;;  %s4985_s15 = smov 40  }
 0x418   : > { %1731 = vrot.lane.b32.xlu1 %v5216_v24, %s4978_s16 }
 0x41b   : > { %1549 = vrot.lane.b32.xlu0 %v5197_v18, %s4978_s16 }
 0x41f   : > { %1640 = vrot.lane.b32.xlu0 %v5206_v22, %s4978_s16 }
 0x423   : > { %1729 = vrot.lane.b32.xlu0 %v5201_v19, %s4978_s16  ;;  %s4986_s16 = smov 8  }
 0x471   : > { %v1062_v43 = vpop.xlane.xlu1 %1061 }
 0x472   : > { %4847 = vrcp.f32 %v1062_v43 }
 0x473   : > { %v1059_v44 = vpop.xlane.xlu0 %1058 }
 0x474   : > { %4849 = vrcp.f32 %v1059_v44 }
 0x47b   : > { %v1074_v37 = vpop.xlane.xlu1 %1073 }
 0x47c   : > { %4851 = vrcp.f32 %v1074_v37 }
 0x47f   : > { %v4848_v46 = vpop.eup %4847 }
 0x480   : > { %v1071_v45 = vpop.xlane.xlu1 %1070  ;;  %v1098_v38 = vmul.f32 %v4848_v46, %v5317_v35 }
 0x481   : > { %4853 = vrcp.f32 %v1071_v45  ;;  %v4850_v47 = vpop.eup %4849 }
 0x482   : > { %v1068_v29 = vpop.xlane.xlu0 %1067  ;;  %v1097_v51 = vmul.f32 %v4850_v47, %v5321_v21 }
 0x483   : > { %4855 = vrcp.f32 %v1068_v29 }
 0x484   : > { %4573 = vmatprep.mubr.msk.f32.mxu0 %vm1008_vm2, %v1097_v51  ;;  %v1080_v54 = vpop.xlane.xlu1 %1079 }
 0x485   : > { %4574 = vmatmul.mubr.msk.f32.vlgmr.msra.gmra.mxu0 %vm1008_vm2, %v1098_v38 }
 0x486   : > { %4584 = vmatpush3.msra.mxu0 %v1282_v62  ;;  %v1065_v53 = vpop.xlane.xlu0 %1064 }
 0x487   : > { %4857 = vrcp.f32 %v1065_v53  ;;  %4585 = vmatprep.subr.mxu0 %v1280_v25 }
 0x488   : > { %4586 = vmatpush3.msra.mxu0 %v1280_v25  ;;  %4859 = vrcp.f32 %v1080_v54  ;;  %v1736_v10 = vpop.permute.xlu1 %1735 }
 0x489   : > { %4597 = vmatprep.subr.msk.mxu0 %vm641_vm1, %v1463_v26  ;;  %v4852_v48 = vpop.eup %4851 }
 0x48a   : > { %v1077_v55 = vpop.xlane.xlu0 %1076  ;;  %v1102_v58 = vmul.f32 %v4852_v48, %v5326_v39 }
 0x48b   : > { %4861 = vrcp.f32 %v1077_v55 }
 0x48e   : > { %v4854_v21 = vpop.eup %4853  ;;  %v1643_v63 = vpop.permute.xlu0 %1642 }
 0x48f   : > { %v1101_v35 = vmul.f32 %v4854_v21, %v5330_v49 }
 0x490   : > { %v4856_v62 = vpop.eup %4855 }
 0x491   : > { %4587 = vmatprep.mubr.msk.f32.mxu0 %vm1008_vm2, %v1101_v35  ;;  %v1100_v39 = vmul.f32 %v4856_v62, %v5336_v9 }
 0x492   : > { %4588 = vmatmul.mubr.msk.f32.vlgmr.msra.gmra.mxu0 %vm1008_vm2, %v1102_v58  ;;  %v1550_v23 = vpop.permute.xlu0 %1549 }
 0x493   : > { %4598 = vmatpush3.xpose.msk.msra.mxu0 %vm641_vm1, %v1463_v26  ;;  %4601 = vmatprep.mubr.msk.f32.mxu0 %vm641_vm1, %v1457_v32 }
 0x494   : > { %4599 = vmatprep.subr.msk.mxu0 %vm641_vm1, %v1461_v27  ;;  %v4858_v1 = vpop.eup %4857 }
 0x495   : > { %v1099_v13 = vmul.f32 %v4858_v1, %v5345_v15  ;;  %v4860_v49 = vpop.eup %4859  ;;  %v1639_v15 = vpop.permute.xlu1 %1638 }
 0x496   : > { %v1104_v9 = vmul.f32 %v4860_v49, %v5334_v7 }
 0x497   : > { %4600 = vmatpush3.xpose.msk.msra.mxu0 %vm641_vm1, %v1461_v27  ;;  %4580 = vmatprep.mubr.msk.f32.mxu1 %vm1008_vm2, %v1099_v13 }
 0x498   : > { %4611 = vmatprep.subr.msk.mxu0 %vm641_vm1, %v1645_v36  ;;  %v4862_v16 = vpop.eup %4861  ;;  %4581 = vmatmul.mubr.msk.f32.vlgmr.msra.gmra.mxu1 %vm1008_vm2, %v1100_v39 }
 0x499   : > { %4591 = vmatpush3.msra.mxu1 %v5340_v11  ;;  %v1103_v25 = vmul.f32 %v4862_v16, %v5349_v17  ;;  %v1641_v11 = vpop.permute.xlu0 %1640  ;;  %v1734_v17 = vpop.permute.xlu1 %1733 }
 0x49a   : > { %4602 = vmatmul.mubr.msk.f32.vlgmr.msra.gmra.mxu0 %vm641_vm1, %v1459_v41  ;;  %4592 = vmatprep.subr.mxu1 %v1367_v31  ;;  %v4278_v41 = vld [vmem:[%s5967_s7 + $0x10] sm:$0xff] }
 0x49b   : > { %4612 = vmatpush3.xpose.msk.msra.mxu0 %vm641_vm1, %v1645_v36  ;;  %4593 = vmatpush3.msra.mxu1 %v1367_v31  ;;  %v4279_v36 = vld [vmem:[%s5967_s7 + $0x18] sm:$0xff] }
 0x49c   : > { %4615 = vmatprep.mubr.msk.f32.mxu0 %vm641_vm1, %v1639_v15  ;;  %4594 = vmatprep.mubr.msk.f32.mxu1 %vm1008_vm2, %v1103_v25 }
 0x49d   : > { %4604 = vmatprep.subr.msk.mxu1 %vm641_vm1, %v5369_v34  ;;  %4613 = vmatprep.subr.msk.mxu0 %vm641_vm1, %v1643_v63  ;;  %v1730_v7 = vpop.permute.xlu0 %1729  ;;  %v1732_v26 = vpop.permute.xlu1 %1731 }
 0x49e   : > { %4595 = vmatmul.mubr.msk.f32.vlgmr.msra.gmra.mxu1 %vm1008_vm2, %v1104_v9 }
 0x49f   : > { %4605 = vmatpush3.xpose.msk.msra.mxu1 %vm641_vm1, %v5369_v34  ;;  %4608 = vmatprep.mubr.msk.f32.mxu1 %vm641_vm1, %v5373_v40 }
 0x4a0   : > { %4606 = vmatprep.subr.msk.mxu1 %vm641_vm1, %v5371_v20  ;;  %4614 = vmatpush3.xpose.msk.msra.mxu0 %vm641_vm1, %v1643_v63 }
 0x4a3   : > { %4607 = vmatpush3.xpose.msk.msra.mxu1 %vm641_vm1, %v5371_v20  ;;  %4616 = vmatmul.mubr.msk.f32.vlgmr.msra.gmra.mxu0 %vm641_vm1, %v1641_v11 }
 0x4a4   : > { %4618 = vmatprep.subr.msk.mxu1 %vm641_vm1, %v1736_v10 }
 0x4a6   : > { %4609 = vmatmul.mubr.msk.f32.vlgmr.msra.gmra.mxu1 %vm641_vm1, %v1550_v23 }
 0x4a7   : > { %4619 = vmatpush3.xpose.msk.msra.mxu1 %vm641_vm1, %v1736_v10  ;;  %4622 = vmatprep.mubr.msk.f32.mxu1 %vm641_vm1, %v1730_v7 }
 0x4a8   : > { %4620 = vmatprep.subr.msk.mxu1 %vm641_vm1, %v1734_v17 }
 0x4ab   : > { %4621 = vmatpush3.xpose.msk.msra.mxu1 %vm641_vm1, %v1734_v17 }
 0x4ae   : > { %4623 = vmatmul.mubr.msk.f32.vlgmr.msra.gmra.mxu1 %vm641_vm1, %v1732_v26 }
 0x545   : > { %v5421_v27 = vpop.f32.mrf.mxu0 }
 0x547   : > { %v5423_v31 = vpop.f32.mrf.mxu0 }
 0x552   : > { %v5425_v32 = vpop.f32.mrf.mxu0 }
 0x554   : > { %v5427_v34 = vpop.f32.mrf.mxu0 }
 0x558   : > { %v5432_v20 = vpop.f32.mrf.mxu1 }
 0x55a   : > { %v4603_v40 = vpop.f32.mrf.mxu0  ;;  %v5437_v44 = vpop.f32.mrf.mxu1 }
 0x55b   : > { %v1544_v43 = vadd.f32 %v4603_v40, %v4279_v36 }
 0x55c   : > { %v1538_v37 = vpop.f32.mrf.mxu0 }
 0x55d   : > { %v1539_v45 = vadd.f32 %v4278_v41, %v1538_v37  ;;  %v1821_v46 = vadd.f32 %v1544_v43, %v5229_v30 }
 0x55e   : > { %v5442_v51 = vpop.f32.mrf.mxu1 }
 0x55f   : > { %v1831_v47 = vsel %vm1008_vm2, %v1821_v46, -inf  ;;  %v1820_v29 = vadd.f32 %v1539_v45, %v5234_v33 }
 0x560   : > { %1832 = vmax.xlane.f32.xlu1 %v1831_v47  ;;  %v5445_v54 = vpop.f32.mrf.mxu1 }
 0x561   : > { %v1828_v38 = vsel %vm1008_vm2, %v1820_v29, -inf }
 0x562   : > { %1829 = vmax.xlane.f32.xlu0 %v1828_v38 }
 0x563   : > { %v4617_v53 = vpop.f32.mrf.mxu0 }
 0x564   : > { %v1726_v55 = vadd.f32 %v4617_v53, %v4279_v36 }
 0x565   : > { %v1720_v48 = vpop.f32.mrf.mxu0 }
 0x566   : > { %v4610_v21 = vpop.f32.mrf.mxu1  ;;  %v1721_v35 = vadd.f32 %v4278_v41, %v1720_v48  ;;  %v1825_v58 = vadd.f32 %v1726_v55, %v5249_v42 }
 0x567   : > { %v1635_v62 = vadd.f32 %v4610_v21, %v4279_v36 }
 0x568   : > { %v1629_v63 = vpop.f32.mrf.mxu1  ;;  %v1843_v1 = vsel %vm1008_vm2, %v1825_v58, -inf  ;;  %v1824_v10 = vadd.f32 %v1721_v35, %v5254_v28 }
 0x569   : > { %1844 = vmax.xlane.f32.xlu1 %v1843_v1  ;;  %v1630_v13 = vadd.f32 %v4278_v41, %v1629_v63  ;;  %v1823_v49 = vadd.f32 %v1635_v62, %v5260_v50 }
 0x56a   : > { %v1840_v39 = vsel %vm1008_vm2, %v1824_v10, -inf }
 0x56b   : > { %1841 = vmax.xlane.f32.xlu0 %v1840_v39  ;;  %v1837_v23 = vsel %vm1008_vm2, %v1823_v49, -inf  ;;  %v1822_v25 = vadd.f32 %v1630_v13, %v5274_v56 }
 0x56d   : > { %v1834_v17 = vsel %vm1008_vm2, %v1822_v25, -inf }
 0x56e   : > { %v4624_v16 = vpop.f32.mrf.mxu1 }
 0x56f   : > { %v1817_v15 = vadd.f32 %v4624_v16, %v4279_v36  ;;  %1838 = vmax.xlane.f32.xlu0 %v1837_v23 }
 0x570   : > { %v1811_v9 = vpop.f32.mrf.mxu1 }
 0x571   : > { %v1812_v11 = vadd.f32 %v4278_v41, %v1811_v9  ;;  %v1827_v7 = vadd.f32 %v1817_v15, %v5267_v52 }
 0x573   : > { %1835 = vmax.xlane.f32.xlu0 %v1834_v17  ;;  %v1849_v26 = vsel %vm1008_vm2, %v1827_v7, -inf  ;;  %v1826_v40 = vadd.f32 %v1812_v11, %v5283_v4 }
 0x574   : > { %1850 = vmax.xlane.f32.xlu1 %v1849_v26 }
 0x575   : > { %v1846_v43 = vsel %vm1008_vm2, %v1826_v40, -inf }
 0x577   : > { %1847 = vmax.xlane.f32.xlu0 %v1846_v43 }
 0x585   : > { %1924 = vrot.lane.b32.xlu1 %v5142_v59, %s4979_s21 }
 0x589   : > { %2013 = vrot.lane.b32.xlu1 %v5149_v61, %s4979_s21 }
 0x58d   : > { %2100 = vrot.lane.b32.xlu1 %v5153_v0, %s4979_s21  ;;  %1926 = vrot.lane.b32.xlu0 %v5140_v57, %s4979_s21 }
 0x591   : > { %2098 = vrot.lane.b32.xlu1 %v5158_v3, %s4979_s21  ;;  %2011 = vrot.lane.b32.xlu0 %v5156_v2, %s4979_s21 }
 0x595   : > { %2281 = vrot.lane.b32.xlu1 %v5140_v57, %s4980_s22  ;;  %2187 = vrot.lane.b32.xlu0 %v5161_v5, %s4979_s21 }
 0x599   : > { %2279 = vrot.lane.b32.xlu1 %v5142_v59, %s4980_s22  ;;  %2185 = vrot.lane.b32.xlu0 %v5171_v8, %s4979_s21 }
 0x59d   : > { %2275 = vrot.lane.b32.xlu1 %v5147_v60, %s4981_s23  ;;  %2372 = vrot.lane.b32.xlu0 %v5149_v61, %s4980_s22 }
 0x5a1   : > { %2463 = vrot.lane.b32.xlu1 %v5153_v0, %s4980_s22  ;;  %2370 = vrot.lane.b32.xlu0 %v5156_v2, %s4980_s22 }
 0x5a5   : > { %2366 = vrot.lane.b32.xlu1 %v5183_v14, %s4981_s23  ;;  %2277 = vrot.lane.b32.xlu0 %v5180_v12, %s4981_s23 }
 0x5e9   : > { %v1833_v36 = vpop.xlane.xlu1 %1832 }
 0x5ea   : > { %v1853_v41 = vsub.f32 %v1821_v46, %v1833_v36 }
 0x5eb   : > { %v1830_v37 = vpop.xlane.xlu0 %1829 }
 0x5ec   : > { %v1862_v45 = vmul.f32 1.442695, %v1853_v41  ;;  %v1852_v47 = vsub.f32 %v1820_v29, %v1830_v37 }
 0x5ee   : > { %4863 = vpow2.f32 %v1862_v45  ;;  %v1860_v38 = vmul.f32 1.442695, %v1852_v47 }
 0x5f0   : > { %4865 = vpow2.f32 %v1860_v38 }
 0x5f2   : > { %v1845_v53 = vpop.xlane.xlu1 %1844 }
 0x5f3   : > { %v1857_v55 = vsub.f32 %v1825_v58, %v1845_v53 }
 0x5f4   : > { %v1842_v48 = vpop.xlane.xlu0 %1841 }
 0x5f5   : > { %v1870_v21 = vmul.f32 1.442695, %v1857_v55  ;;  %v1856_v35 = vsub.f32 %v1824_v10, %v1842_v48 }
 0x5f7   : > { %4867 = vpow2.f32 %v1870_v21  ;;  %v1868_v62 = vmul.f32 1.442695, %v1856_v35 }
 0x5f8   : > { %v1839_v63 = vpop.xlane.xlu0 %1838 }
 0x5f9   : > { %4869 = vpow2.f32 %v1868_v62  ;;  %v1855_v1 = vsub.f32 %v1823_v49, %v1839_v63 }
 0x5fb   : > { %v5483_v13 = vpop.eup %4863  ;;  %v1866_v39 = vmul.f32 1.442695, %v1855_v1 }
 0x5fc   : > { %v1836_v46 = vpop.xlane.xlu0 %1835  ;;  %v1879_v29 = vsel %vm1008_vm2, %v5483_v13, 0.0 }
 0x5fd   : > { %v5487_v16 = vpop.eup %4865  ;;  %4871 = vpow2.f32 %v1866_v39  ;;  %v1851_v23 = vpop.xlane.xlu1 %1850  ;;  %v1854_v58 = vsub.f32 %v1822_v25, %v1836_v46  ;;  %1880 = vadd.xlane.f32.xlu1 %v1879_v29 }
 0x5fe   : > { %v1859_v15 = vsub.f32 %v1827_v7, %v1851_v23  ;;  %v1876_v10 = vsel %vm1008_vm2, %v5487_v16, 0.0 }
 0x5ff   : > { %v1864_v9 = vmul.f32 1.442695, %v1854_v58  ;;  %1877 = vadd.xlane.f32.xlu0 %v1876_v10 }
 0x600   : > { %v1874_v49 = vmul.f32 1.442695, %v1859_v15  ;;  %v1848_v11 = vpop.xlane.xlu0 %1847 }
 0x601   : > { %4873 = vpow2.f32 %v1864_v9  ;;  %v1925_v17 = vpop.permute.xlu1 %1924  ;;  %v1858_v26 = vsub.f32 %v1826_v40, %v1848_v11 }
 0x602   : > { %4875 = vpow2.f32 %v1874_v49 }
 0x603   : > { %v1872_v43 = vmul.f32 1.442695, %v1858_v26 }
 0x604   : > { %v5491_v36 = vpop.eup %4867  ;;  %v1927_v41 = vpop.permute.xlu0 %1926 }
 0x605   : > { %4877 = vpow2.f32 %v1872_v43  ;;  %v2014_v37 = vpop.permute.xlu1 %2013  ;;  %4625 = vmatprep.subr.mxu0 %v1927_v41  ;;  %v1891_v25 = vsel %vm1008_vm2, %v5491_v36, 0.0 }
 0x606   : > { %v5495_v7 = vpop.eup %4869  ;;  %4632 = vmatprep.subr.mxu1 %v2014_v37  ;;  %1892 = vadd.xlane.f32.xlu1 %v1891_v25 }
 0x607   : > { %4626 = vmatpush3.msra.mxu0 %v1927_v41  ;;  %4633 = vmatpush3.msra.mxu1 %v2014_v37  ;;  %v1888_v47 = vsel %vm1008_vm2, %v5495_v7, 0.0 }
 0x608   : > { %4627 = vmatprep.subr.mxu0 %v1925_v17  ;;  %v2012_v45 = vpop.permute.xlu0 %2011 }
 0x609   : > { %v2101_v40 = vpop.permute.xlu1 %2100  ;;  %4628 = vmatpush3.msra.mxu0 %v1925_v17  ;;  %4634 = vmatprep.subr.mxu1 %v2012_v45 }
 0x60a   : > { %v5499_v38 = vpop.eup %4871  ;;  %4639 = vmatprep.subr.mxu0 %v2101_v40  ;;  %1889 = vadd.xlane.f32.xlu1 %v1888_v47 }
 0x60b   : > { %4635 = vmatpush3.msra.mxu1 %v2012_v45  ;;  %v1885_v53 = vsel %vm1008_vm2, %v5499_v38, 0.0 }
 0x60c   : > { %1886 = vadd.xlane.f32.xlu0 %v1885_v53  ;;  %v5503_v55 = vpop.permute.xlu0 %2187 }
 0x60d   : > { %4646 = vmatprep.subr.mxu1 %v5503_v55  ;;  %v2099_v39 = vpop.permute.xlu1 %2098 }
 0x60e   : > { %v5506_v48 = vpop.eup %4873 }
 0x60f   : > { %v5508_v21 = vpop.eup %4875  ;;  %v1882_v35 = vsel %vm1008_vm2, %v5506_v48, 0.0 }
 0x610   : > { %v1897_v62 = vsel %vm1008_vm2, %v5508_v21, 0.0  ;;  %1883 = vadd.xlane.f32.xlu0 %v1882_v35  ;;  %v2186_v23 = vpop.permute.xlu0 %2185 }
 0x611   : > { %1898 = vadd.xlane.f32.xlu1 %v1897_v62  ;;  %v2282_v46 = vpop.permute.xlu1 %2281 }
 0x612   : > { %v5514_v63 = vpop.eup %4877 }
 0x613   : > { %v1894_v1 = vsel %vm1008_vm2, %v5514_v63, 0.0 }
 0x614   : > { %1895 = vadd.xlane.f32.xlu0 %v1894_v1  ;;  %v5534_v15 = vpop.permute.xlu0 %2372 }
 0x615   : > { %v2280_v29 = vpop.permute.xlu1 %2279 }
 0x618   : > { %v5536_v9 = vpop.permute.xlu0 %2370 }
 0x619   : > { %v2276_v58 = vpop.permute.xlu1 %2275 }
 0x61c   : > { %v2278_v11 = vpop.permute.xlu0 %2277 }
 0x61d   : > { %v2464_v10 = vpop.permute.xlu1 %2463 }
 0x621   : > { %v5538_v49 = vpop.permute.xlu1 %2366 }
 0x622   : > { %2554 = vrot.lane.b32.xlu1 %v5161_v5, %s4980_s22 }
 0x626   : > { %2457 = vrot.lane.b32.xlu1 %v5165_v6, %s4981_s23 }
 0x62a   : > { %2552 = vrot.lane.b32.xlu1 %v5171_v8, %s4980_s22  ;;  %2461 = vrot.lane.b32.xlu0 %v5158_v3, %s4980_s22 }
 0x62e   : > { %2550 = vrot.lane.b32.xlu1 %v5216_v24, %s4981_s23  ;;  %2368 = vrot.lane.b32.xlu0 %v5197_v18, %s4981_s23 }
 0x632   : > { %2459 = vrot.lane.b32.xlu0 %v5206_v22, %s4981_s23 }
 0x636   : > { %2548 = vrot.lane.b32.xlu0 %v5201_v19, %s4981_s23 }
 0x686   : > { %v1881_v17 = vpop.xlane.xlu1 %1880 }
 0x687   : > { %4879 = vrcp.f32 %v1881_v17 }
 0x688   : > { %v1878_v26 = vpop.xlane.xlu0 %1877 }
 0x689   : > { %4881 = vrcp.f32 %v1878_v26 }
 0x68f   : > { %v1893_v43 = vpop.xlane.xlu1 %1892 }
 0x690   : > { %4883 = vrcp.f32 %v1893_v43 }
 0x693   : > { %v1890_v41 = vpop.xlane.xlu1 %1889 }
 0x694   : > { %4885 = vrcp.f32 %v1890_v41  ;;  %v4880_v37 = vpop.eup %4879 }
 0x695   : > { %v1887_v25 = vpop.xlane.xlu0 %1886  ;;  %v1917_v53 = vmul.f32 %v4880_v37, %v5483_v13 }
 0x696   : > { %v4882_v45 = vpop.eup %4881  ;;  %4887 = vrcp.f32 %v1887_v25 }
 0x697   : > { %v1916_v47 = vmul.f32 %v4882_v45, %v5487_v16 }
 0x699   : > { %v1884_v35 = vpop.xlane.xlu0 %1883  ;;  %4629 = vmatprep.mubr.msk.f32.mxu0 %vm1008_vm2, %v1916_v47  ;;  %v4304_v47 = vld [vmem:[%s5967_s7 + $0x20] sm:$0xff] }
 0x69a   : > { %4889 = vrcp.f32 %v1884_v35  ;;  %4630 = vmatmul.mubr.msk.f32.vlgmr.msra.gmra.mxu0 %vm1008_vm2, %v1917_v53  ;;  %v1899_v62 = vpop.xlane.xlu1 %1898 }
 0x69b   : > { %4640 = vmatpush3.msra.mxu0 %v2101_v40 }
 0x69c   : > { %4641 = vmatprep.subr.mxu0 %v2099_v39 }
 0x69d   : > { %4642 = vmatpush3.msra.mxu0 %v2099_v39  ;;  %v1896_v1 = vpop.xlane.xlu0 %1895  ;;  %v4884_v17 = vpop.eup %4883 }
 0x69e   : > { %4891 = vrcp.f32 %v1896_v1  ;;  %4653 = vmatprep.subr.msk.mxu0 %vm641_vm1, %v2282_v46  ;;  %v1921_v26 = vmul.f32 %v4884_v17, %v5491_v36  ;;  %v2555_v41 = vpop.permute.xlu1 %2554 }
 0x69f   : > { %4893 = vrcp.f32 %v1899_v62 }
 0x6a1   : > { %v4886_v16 = vpop.eup %4885  ;;  %v2462_v39 = vpop.permute.xlu0 %2461 }
 0x6a2   : > { %v1920_v13 = vmul.f32 %v4886_v16, %v5495_v7 }
 0x6a3   : > { %v4888_v43 = vpop.eup %4887 }
 0x6a4   : > { %4643 = vmatprep.mubr.msk.f32.mxu0 %vm1008_vm2, %v1920_v13  ;;  %v1919_v7 = vmul.f32 %v4888_v43, %v5499_v38 }
 0x6a5   : > { %4644 = vmatmul.mubr.msk.f32.vlgmr.msra.gmra.mxu0 %vm1008_vm2, %v1921_v26  ;;  %v2369_v25 = vpop.permute.xlu0 %2368 }
 0x6a6   : > { %4654 = vmatpush3.xpose.msk.msra.mxu0 %vm641_vm1, %v2282_v46  ;;  %4657 = vmatprep.mubr.msk.f32.mxu0 %vm641_vm1, %v2276_v58 }
 0x6a7   : > { %v4890_v40 = vpop.eup %4889  ;;  %4655 = vmatprep.subr.msk.mxu0 %vm641_vm1, %v2280_v29 }
 0x6a8   : > { %v1918_v37 = vmul.f32 %v4890_v40, %v5506_v48  ;;  %v2458_v48 = vpop.permute.xlu1 %2457 }
 0x6aa   : > { %4656 = vmatpush3.xpose.msk.msra.mxu0 %vm641_vm1, %v2280_v29  ;;  %4636 = vmatprep.mubr.msk.f32.mxu1 %vm1008_vm2, %v1918_v37 }
 0x6ab   : > { %v4892_v36 = vpop.eup %4891  ;;  %4667 = vmatprep.subr.msk.mxu0 %vm641_vm1, %v2464_v10  ;;  %4637 = vmatmul.mubr.msk.f32.vlgmr.msra.gmra.mxu1 %vm1008_vm2, %v1919_v7 }
 0x6ac   : > { %v4894_v46 = vpop.eup %4893  ;;  %4647 = vmatpush3.msra.mxu1 %v5503_v55  ;;  %v1922_v58 = vmul.f32 %v4892_v36, %v5514_v63  ;;  %v2460_v55 = vpop.permute.xlu0 %2459 }
 0x6ad   : > { %4648 = vmatprep.subr.mxu1 %v2186_v23  ;;  %4658 = vmatmul.mubr.msk.f32.vlgmr.msra.gmra.mxu0 %vm641_vm1, %v2278_v11  ;;  %v1923_v38 = vmul.f32 %v4894_v46, %v5508_v21  ;;  %v2553_v63 = vpop.permute.xlu1 %2552  ;;  %v4305_v11 = vld [vmem:[%s5967_s7 + $0x28] sm:$0xff] }
 0x6ae   : > { %4649 = vmatpush3.msra.mxu1 %v2186_v23  ;;  %4668 = vmatpush3.xpose.msk.msra.mxu0 %vm641_vm1, %v2464_v10 }
 0x6af   : > { %4671 = vmatprep.mubr.msk.f32.mxu0 %vm641_vm1, %v2458_v48  ;;  %4650 = vmatprep.mubr.msk.f32.mxu1 %vm1008_vm2, %v1922_v58 }
 0x6b0   : > { %4660 = vmatprep.subr.msk.mxu1 %vm641_vm1, %v5534_v15  ;;  %4669 = vmatprep.subr.msk.mxu0 %vm641_vm1, %v2462_v39  ;;  %v2549_v21 = vpop.permute.xlu0 %2548 }
 0x6b1   : > { %4651 = vmatmul.mubr.msk.f32.vlgmr.msra.gmra.mxu1 %vm1008_vm2, %v1923_v38  ;;  %v2551_v29 = vpop.permute.xlu1 %2550 }
 0x6b2   : > { %4661 = vmatpush3.xpose.msk.msra.mxu1 %vm641_vm1, %v5534_v15  ;;  %4664 = vmatprep.mubr.msk.f32.mxu1 %vm641_vm1, %v5538_v49 }
 0x6b3   : > { %4662 = vmatprep.subr.msk.mxu1 %vm641_vm1, %v5536_v9  ;;  %4670 = vmatpush3.xpose.msk.msra.mxu0 %vm641_vm1, %v2462_v39 }
 0x6b6   : > { %4663 = vmatpush3.xpose.msk.msra.mxu1 %vm641_vm1, %v5536_v9  ;;  %4672 = vmatmul.mubr.msk.f32.vlgmr.msra.gmra.mxu0 %vm641_vm1, %v2460_v55 }
 0x6b7   : > { %4674 = vmatprep.subr.msk.mxu1 %vm641_vm1, %v2555_v41 }
 0x6b9   : > { %4665 = vmatmul.mubr.msk.f32.vlgmr.msra.gmra.mxu1 %vm641_vm1, %v2369_v25 }
 0x6ba   : > { %4675 = vmatpush3.xpose.msk.msra.mxu1 %vm641_vm1, %v2555_v41  ;;  %4678 = vmatprep.mubr.msk.f32.mxu1 %vm641_vm1, %v2549_v21 }
 0x6bb   : > { %4676 = vmatprep.subr.msk.mxu1 %vm641_vm1, %v2553_v63 }
 0x6be   : > { %4677 = vmatpush3.xpose.msk.msra.mxu1 %vm641_vm1, %v2553_v63 }
 0x6c1   : > { %4679 = vmatmul.mubr.msk.f32.vlgmr.msra.gmra.mxu1 %vm641_vm1, %v2551_v29 }
 0x75a   : > { %v5586_v23 = vpop.f32.mrf.mxu0 }
 0x75c   : > { %v5588_v15 = vpop.f32.mrf.mxu0 }
 0x765   : > { %v5590_v10 = vpop.f32.mrf.mxu0 }
 0x767   : > { %v5592_v9 = vpop.f32.mrf.mxu0 }
 0x76b   : > { %v5594_v49 = vpop.f32.mrf.mxu1 }
 0x76d   : > { %v4659_v45 = vpop.f32.mrf.mxu0  ;;  %v5602_v35 = vpop.f32.mrf.mxu1 }
 0x76e   : > { %v2363_v53 = vadd.f32 %v4659_v45, %v4305_v11 }
 0x76f   : > { %v2357_v62 = vpop.f32.mrf.mxu0 }
 0x770   : > { %v2640_v1 = vadd.f32 %v2363_v53, %v5229_v30  ;;  %v2358_v17 = vadd.f32 %v4304_v47, %v2357_v62 }
 0x771   : > { %v5607_v26 = vpop.f32.mrf.mxu1 }
 0x772   : > { %v2639_v16 = vadd.f32 %v2358_v17, %v5234_v33  ;;  %v2650_v13 = vsel %vm1008_vm2, %v2640_v1, -inf }
 0x773   : > { %2651 = vmax.xlane.f32.xlu1 %v2650_v13  ;;  %v5610_v39 = vpop.f32.mrf.mxu1 }
 0x774   : > { %v2647_v43 = vsel %vm1008_vm2, %v2639_v16, -inf }
 0x775   : > { %2648 = vmax.xlane.f32.xlu0 %v2647_v43 }
 0x776   : > { %v4673_v40 = vpop.f32.mrf.mxu0 }
 0x777   : > { %v2545_v41 = vadd.f32 %v4673_v40, %v4305_v11 }
 0x778   : > { %v2539_v37 = vpop.f32.mrf.mxu0 }
 0x779   : > { %v2644_v7 = vadd.f32 %v2545_v41, %v5249_v42  ;;  %v4666_v36 = vpop.f32.mrf.mxu1  ;;  %v2540_v30 = vadd.f32 %v4304_v47, %v2539_v37 }
 0x77a   : > { %v2454_v46 = vadd.f32 %v4666_v36, %v4305_v11 }
 0x77b   : > { %v2643_v33 = vadd.f32 %v2540_v30, %v5254_v28  ;;  %v2448_v58 = vpop.f32.mrf.mxu1  ;;  %v2662_v25 = vsel %vm1008_vm2, %v2644_v7, -inf }
 0x77c   : > { %2663 = vmax.xlane.f32.xlu1 %v2662_v25  ;;  %v2642_v48 = vadd.f32 %v2454_v46, %v5260_v50  ;;  %v2449_v38 = vadd.f32 %v4304_v47, %v2448_v58 }
 0x77d   : > { %v2659_v55 = vsel %vm1008_vm2, %v2643_v33, -inf }
 0x77e   : > { %2660 = vmax.xlane.f32.xlu0 %v2659_v55  ;;  %v5618_v21 = vadd.f32 %v2449_v38, %v5274_v56  ;;  %v2656_v42 = vsel %vm1008_vm2, %v2642_v48, -inf }
 0x780   : > { %v2653_v62 = vsel %vm1008_vm2, %v5618_v21, -inf }
 0x781   : > { %v4680_v63 = vpop.f32.mrf.mxu1 }
 0x782   : > { %v2636_v29 = vadd.f32 %v4680_v63, %v4305_v11  ;;  %2657 = vmax.xlane.f32.xlu0 %v2656_v42 }
 0x783   : > { %v2630_v45 = vpop.f32.mrf.mxu1 }
 0x784   : > { %v2646_v28 = vadd.f32 %v2636_v29, %v5267_v52  ;;  %v2631_v53 = vadd.f32 %v4304_v47, %v2630_v45 }
 0x786   : > { %v2645_v50 = vadd.f32 %v2631_v53, %v5283_v4  ;;  %2654 = vmax.xlane.f32.xlu0 %v2653_v62  ;;  %v2668_v17 = vsel %vm1008_vm2, %v2646_v28, -inf }
 0x787   : > { %2669 = vmax.xlane.f32.xlu1 %v2668_v17 }
 0x788   : > { %v2665_v56 = vsel %vm1008_vm2, %v2645_v50, -inf }
 0x78a   : > { %2666 = vmax.xlane.f32.xlu0 %v2665_v56 }
 0x798   : > { %2743 = vrot.lane.b32.xlu1 %v5142_v59, %s4982_s28 }
 0x79c   : > { %2832 = vrot.lane.b32.xlu1 %v5149_v61, %s4982_s28 }
 0x7a0   : > { %2919 = vrot.lane.b32.xlu1 %v5153_v0, %s4982_s28  ;;  %2745 = vrot.lane.b32.xlu0 %v5140_v57, %s4982_s28 }
 0x7a4   : > { %2917 = vrot.lane.b32.xlu1 %v5158_v3, %s4982_s28  ;;  %2830 = vrot.lane.b32.xlu0 %v5156_v2, %s4982_s28 }
 0x7a8   : > { %3100 = vrot.lane.b32.xlu1 %v5140_v57, %s4983_s29  ;;  %3006 = vrot.lane.b32.xlu0 %v5161_v5, %s4982_s28 }
 0x7ac   : > { %3098 = vrot.lane.b32.xlu1 %v5142_v59, %s4983_s29  ;;  %3004 = vrot.lane.b32.xlu0 %v5171_v8, %s4982_s28 }
 0x7b0   : > { %3094 = vrot.lane.b32.xlu1 %v5147_v60, %s4984_s12  ;;  %3191 = vrot.lane.b32.xlu0 %v5149_v61, %s4983_s29 }
 0x7b4   : > { %3189 = vrot.lane.b32.xlu1 %v5156_v2, %s4983_s29  ;;  %3096 = vrot.lane.b32.xlu0 %v5180_v12, %s4984_s12 }
 0x7b8   : > { %3185 = vrot.lane.b32.xlu1 %v5183_v14, %s4984_s12  ;;  %3282 = vrot.lane.b32.xlu0 %v5153_v0, %s4983_s29 }
 0x7fc   : > { %v2652_v52 = vpop.xlane.xlu1 %2651 }
 0x7fd   : > { %v2672_v4 = vsub.f32 %v2640_v1, %v2652_v52 }
 0x7fe   : > { %v2649_v11 = vpop.xlane.xlu0 %2648 }
 0x7ff   : > { %v2681_v47 = vmul.f32 1.442695, %v2672_v4  ;;  %v2671_v60 = vsub.f32 %v2639_v16, %v2649_v11 }
 0x801   : > { %4895 = vpow2.f32 %v2681_v47  ;;  %v2679_v13 = vmul.f32 1.442695, %v2671_v60 }
 0x803   : > { %4897 = vpow2.f32 %v2679_v13 }
 0x805   : > { %v2664_v43 = vpop.xlane.xlu1 %2663 }
 0x806   : > { %v2676_v40 = vsub.f32 %v2644_v7, %v2664_v43 }
 0x807   : > { %v2661_v41 = vpop.xlane.xlu0 %2660 }
 0x808   : > { %v2689_v37 = vmul.f32 1.442695, %v2676_v40  ;;  %v2675_v36 = vsub.f32 %v2643_v33, %v2661_v41 }
 0x80a   : > { %4899 = vpow2.f32 %v2689_v37  ;;  %v2687_v12 = vmul.f32 1.442695, %v2675_v36 }
 0x80b   : > { %v2658_v30 = vpop.xlane.xlu0 %2657 }
 0x80c   : > { %4901 = vpow2.f32 %v2687_v12  ;;  %v2674_v14 = vsub.f32 %v2642_v48, %v2658_v30 }
 0x80e   : > { %v5651_v46 = vpop.eup %4895  ;;  %v2685_v58 = vmul.f32 1.442695, %v2674_v14 }
 0x80f   : > { %v2655_v1 = vpop.xlane.xlu0 %2654  ;;  %v2698_v16 = vsel %vm1008_vm2, %v5651_v46, 0.0 }
 0x810   : > { %v5655_v25 = vpop.eup %4897  ;;  %4903 = vpow2.f32 %v2685_v58  ;;  %v2670_v38 = vpop.xlane.xlu1 %2669  ;;  %v2673_v7 = vsub.f32 %v5618_v21, %v2655_v1  ;;  %2699 = vadd.xlane.f32.xlu1 %v2698_v16 }
 0x811   : > { %v2678_v33 = vsub.f32 %v2646_v28, %v2670_v38  ;;  %v2695_v55 = vsel %vm1008_vm2, %v5655_v25, 0.0 }
 0x812   : > { %v2683_v63 = vmul.f32 1.442695, %v2673_v7  ;;  %2696 = vadd.xlane.f32.xlu0 %v2695_v55 }
 0x813   : > { %v2693_v48 = vmul.f32 1.442695, %v2678_v33  ;;  %v2667_v42 = vpop.xlane.xlu0 %2666 }
 0x814   : > { %4905 = vpow2.f32 %v2683_v63  ;;  %v2744_v29 = vpop.permute.xlu1 %2743  ;;  %v2677_v45 = vsub.f32 %v2645_v50, %v2667_v42 }
 0x815   : > { %4907 = vpow2.f32 %v2693_v48 }
 0x816   : > { %v2691_v53 = vmul.f32 1.442695, %v2677_v45 }
 0x817   : > { %v5660_v62 = vpop.eup %4899  ;;  %v2746_v17 = vpop.permute.xlu0 %2745 }
 0x818   : > { %4909 = vpow2.f32 %v2691_v53  ;;  %v2833_v56 = vpop.permute.xlu1 %2832  ;;  %4681 = vmatprep.subr.mxu0 %v2746_v17  ;;  %v2710_v21 = vsel %vm1008_vm2, %v5660_v62, 0.0 }
 0x819   : > { %v5664_v28 = vpop.eup %4901  ;;  %4688 = vmatprep.subr.mxu1 %v2833_v56  ;;  %2711 = vadd.xlane.f32.xlu1 %v2710_v21 }
 0x81a   : > { %4682 = vmatpush3.msra.mxu0 %v2746_v17  ;;  %4689 = vmatpush3.msra.mxu1 %v2833_v56  ;;  %v2707_v4 = vsel %vm1008_vm2, %v5664_v28, 0.0 }
 0x81b   : > { %4683 = vmatprep.subr.mxu0 %v2744_v29  ;;  %v2831_v52 = vpop.permute.xlu0 %2830 }
 0x81c   : > { %v2920_v50 = vpop.permute.xlu1 %2919  ;;  %4684 = vmatpush3.msra.mxu0 %v2744_v29  ;;  %4690 = vmatprep.subr.mxu1 %v2831_v52 }
 0x81d   : > { %v5668_v11 = vpop.eup %4903  ;;  %4695 = vmatprep.subr.mxu0 %v2920_v50  ;;  %2708 = vadd.xlane.f32.xlu1 %v2707_v4 }
 0x81e   : > { %4691 = vmatpush3.msra.mxu1 %v2831_v52  ;;  %v2704_v47 = vsel %vm1008_vm2, %v5668_v11, 0.0 }
 0x81f   : > { %2705 = vadd.xlane.f32.xlu0 %v2704_v47  ;;  %v5672_v60 = vpop.permute.xlu0 %3006 }
 0x820   : > { %4702 = vmatprep.subr.mxu1 %v5672_v60  ;;  %v2918_v12 = vpop.permute.xlu1 %2917 }
 0x821   : > { %v5675_v13 = vpop.eup %4905 }
 0x822   : > { %v5677_v43 = vpop.eup %4907  ;;  %v2701_v40 = vsel %vm1008_vm2, %v5675_v13, 0.0 }
 0x823   : > { %v2716_v41 = vsel %vm1008_vm2, %v5677_v43, 0.0  ;;  %2702 = vadd.xlane.f32.xlu0 %v2701_v40  ;;  %v3005_v14 = vpop.permute.xlu0 %3004 }
 0x824   : > { %2717 = vadd.xlane.f32.xlu1 %v2716_v41 }
 0x825   : > { %v5683_v37 = vpop.eup %4909 }
 0x826   : > { %v2713_v36 = vsel %vm1008_vm2, %v5683_v37, 0.0 }
 0x827   : > { %2714 = vadd.xlane.f32.xlu0 %v2713_v36  ;;  %v5703_v1 = vpop.permute.xlu0 %3191 }
 0x82b   : > { %v3097_v16 = vpop.permute.xlu0 %3096 }
 0x82f   : > { %v3283_v38 = vpop.permute.xlu0 %3282 }
 0x835   : > { %3280 = vrot.lane.b32.xlu1 %v5158_v3, %s4983_s29 }
 0x839   : > { %3276 = vrot.lane.b32.xlu1 %v5165_v6, %s4984_s12  ;;  %v3101_v6 = vpop.permute.xlu1 %3100 }
 0x83d   : > { %3371 = vrot.lane.b32.xlu1 %v5171_v8, %s4983_s29  ;;  %3187 = vrot.lane.b32.xlu0 %v5197_v18, %s4984_s12  ;;  %v3099_v30 = vpop.permute.xlu1 %3098 }
 0x841   : > { %3369 = vrot.lane.b32.xlu1 %v5216_v24, %s4984_s12  ;;  %3373 = vrot.lane.b32.xlu0 %v5161_v5, %s4983_s29  ;;  %v3095_v58 = vpop.permute.xlu1 %3094 }
 0x845   : > { %3278 = vrot.lane.b32.xlu0 %v5206_v22, %s4984_s12  ;;  %v5705_v18 = vpop.permute.xlu1 %3189 }
 0x849   : > { %3367 = vrot.lane.b32.xlu0 %v5201_v19, %s4984_s12  ;;  %v5707_v24 = vpop.permute.xlu1 %3185 }
 0x899   : > { %v2700_v7 = vpop.xlane.xlu1 %2699 }
 0x89a   : > { %4911 = vrcp.f32 %v2700_v7 }
 0x89b   : > { %v2697_v33 = vpop.xlane.xlu0 %2696 }
 0x89c   : > { %4913 = vrcp.f32 %v2697_v33 }
 0x8a2   : > { %v2712_v22 = vpop.xlane.xlu1 %2711 }
 0x8a3   : > { %4915 = vrcp.f32 %v2712_v22 }
 0x8a6   : > { %v2709_v19 = vpop.xlane.xlu1 %2708 }
 0x8a7   : > { %4917 = vrcp.f32 %v2709_v19  ;;  %v4912_v55 = vpop.eup %4911  ;;  %v4959_v19 = vld [vmem:[%s5968_s8 + $0x8] sm:$0xff] }
 0x8a8   : > { %v2706_v63 = vpop.xlane.xlu0 %2705  ;;  %v2736_v29 = vmul.f32 %v4912_v55, %v5651_v46 }
 0x8a9   : > { %v4914_v48 = vpop.eup %4913  ;;  %4919 = vrcp.f32 %v2706_v63 }
 0x8aa   : > { %v2735_v42 = vmul.f32 %v4914_v48, %v5655_v25  ;;  %v4960_v48 = vld [vmem:[%s5968_s8] sm:$0xff] }
 0x8ac   : > { %v2703_v45 = vpop.xlane.xlu0 %2702  ;;  %4685 = vmatprep.mubr.msk.f32.mxu0 %vm1008_vm2, %v2735_v42 }
 0x8ad   : > { %4921 = vrcp.f32 %v2703_v45  ;;  %4686 = vmatmul.mubr.msk.f32.vlgmr.msra.gmra.mxu0 %vm1008_vm2, %v2736_v29  ;;  %v2718_v53 = vpop.xlane.xlu1 %2717 }
 0x8ae   : > { %4696 = vmatpush3.msra.mxu0 %v2920_v50 }
 0x8af   : > { %4697 = vmatprep.subr.mxu0 %v2918_v12 }
 0x8b0   : > { %4698 = vmatpush3.msra.mxu0 %v2918_v12  ;;  %v2715_v17 = vpop.xlane.xlu0 %2714  ;;  %v4916_v56 = vpop.eup %4915 }
 0x8b1   : > { %4923 = vrcp.f32 %v2715_v17  ;;  %4709 = vmatprep.subr.msk.mxu0 %vm641_vm1, %v3101_v6  ;;  %v2740_v21 = vmul.f32 %v4916_v56, %v5660_v62  ;;  %v3281_v47 = vpop.permute.xlu1 %3280 }
 0x8b2   : > { %4925 = vrcp.f32 %v2718_v53 }
 0x8b4   : > { %v4918_v25 = vpop.eup %4917  ;;  %v3188_v4 = vpop.permute.xlu0 %3187 }
 0x8b5   : > { %v2739_v46 = vmul.f32 %v4918_v25, %v5664_v28 }
 0x8b6   : > { %v4920_v52 = vpop.eup %4919 }
 0x8b7   : > { %4699 = vmatprep.mubr.msk.f32.mxu0 %vm1008_vm2, %v2739_v46  ;;  %v2738_v28 = vmul.f32 %v4920_v52, %v5668_v11  ;;  %v4961_v46 = vld [vmem:[%s5968_s8 + $0x28] sm:$0xff] }
 0x8b8   : > { %4700 = vmatmul.mubr.msk.f32.vlgmr.msra.gmra.mxu0 %vm1008_vm2, %v2740_v21  ;;  %v3374_v12 = vpop.permute.xlu0 %3373 }
 0x8b9   : > { %4710 = vmatpush3.xpose.msk.msra.mxu0 %vm641_vm1, %v3101_v6  ;;  %4713 = vmatprep.mubr.msk.f32.mxu0 %vm641_vm1, %v3095_v58 }
 0x8ba   : > { %v4922_v50 = vpop.eup %4921  ;;  %4711 = vmatprep.subr.msk.mxu0 %vm641_vm1, %v3099_v30 }
 0x8bb   : > { %v2737_v40 = vmul.f32 %v4922_v50, %v5675_v13  ;;  %v3277_v13 = vpop.permute.xlu1 %3276 }
 0x8bd   : > { %4712 = vmatpush3.xpose.msk.msra.mxu0 %vm641_vm1, %v3099_v30  ;;  %4692 = vmatprep.mubr.msk.f32.mxu1 %vm1008_vm2, %v2737_v40 }
 0x8be   : > { %v4924_v62 = vpop.eup %4923  ;;  %4723 = vmatprep.subr.msk.mxu0 %vm641_vm1, %v3283_v38  ;;  %4693 = vmatmul.mubr.msk.f32.vlgmr.msra.gmra.mxu1 %vm1008_vm2, %v2738_v28  ;;  %v4962_v28 = vld [vmem:[%s5968_s8 + $0x18] sm:$0xff] }
 0x8bf   : > { %v4926_v41 = vpop.eup %4925  ;;  %4703 = vmatpush3.msra.mxu1 %v5672_v60  ;;  %v2741_v36 = vmul.f32 %v4924_v62, %v5683_v37  ;;  %v3279_v60 = vpop.permute.xlu0 %3278 }
 0x8c0   : > { %4704 = vmatprep.subr.mxu1 %v3005_v14  ;;  %4714 = vmatmul.mubr.msk.f32.vlgmr.msra.gmra.mxu0 %vm641_vm1, %v3097_v16  ;;  %v2742_v11 = vmul.f32 %v4926_v41, %v5677_v43  ;;  %v3372_v37 = vpop.permute.xlu1 %3371  ;;  %v4331_v16 = vld [vmem:[%s5967_s7 + $0x38] sm:$0xff] }
 0x8c1   : > { %4705 = vmatpush3.msra.mxu1 %v3005_v14  ;;  %4724 = vmatpush3.xpose.msk.msra.mxu0 %vm641_vm1, %v3283_v38  ;;  %v4330_v38 = vld [vmem:[%s5967_s7 + $0x30] sm:$0xff] }
 0x8c2   : > { %4727 = vmatprep.mubr.msk.f32.mxu0 %vm641_vm1, %v3277_v13  ;;  %4706 = vmatprep.mubr.msk.f32.mxu1 %vm1008_vm2, %v2741_v36 }
 0x8c3   : > { %4716 = vmatprep.subr.msk.mxu1 %vm641_vm1, %v5703_v1  ;;  %4725 = vmatprep.subr.msk.mxu0 %vm641_vm1, %v3281_v47  ;;  %v3368_v43 = vpop.permute.xlu0 %3367 }
 0x8c4   : > { %4707 = vmatmul.mubr.msk.f32.vlgmr.msra.gmra.mxu1 %vm1008_vm2, %v2742_v11  ;;  %v3370_v6 = vpop.permute.xlu1 %3369 }
 0x8c5   : > { %4717 = vmatpush3.xpose.msk.msra.mxu1 %vm641_vm1, %v5703_v1  ;;  %4720 = vmatprep.mubr.msk.f32.mxu1 %vm641_vm1, %v5707_v24 }
 0x8c6   : > { %4718 = vmatprep.subr.msk.mxu1 %vm641_vm1, %v5705_v18  ;;  %4726 = vmatpush3.xpose.msk.msra.mxu0 %vm641_vm1, %v3281_v47 }
 0x8c9   : > { %4719 = vmatpush3.xpose.msk.msra.mxu1 %vm641_vm1, %v5705_v18  ;;  %4728 = vmatmul.mubr.msk.f32.vlgmr.msra.gmra.mxu0 %vm641_vm1, %v3279_v60 }
 0x8ca   : > { %4730 = vmatprep.subr.msk.mxu1 %vm641_vm1, %v3374_v12 }
 0x8cc   : > { %4721 = vmatmul.mubr.msk.f32.vlgmr.msra.gmra.mxu1 %vm641_vm1, %v3188_v4 }
 0x8cd   : > { %4731 = vmatpush3.xpose.msk.msra.mxu1 %vm641_vm1, %v3374_v12  ;;  %4734 = vmatprep.mubr.msk.f32.mxu1 %vm641_vm1, %v3368_v43  ;;  %v4963_v12 = vld [vmem:[%s5968_s8 + $0x10] sm:$0xff]  ;;  %v4964_v43 = vld [vmem:[%s5968_s8 + $0x20] sm:$0xff] }
 0x8ce   : > { %4732 = vmatprep.subr.msk.mxu1 %vm641_vm1, %v3372_v37 }
 0x8d1   : > { %4733 = vmatpush3.xpose.msk.msra.mxu1 %vm641_vm1, %v3372_v37 }
 0x8d4   : > { %4735 = vmatmul.mubr.msk.f32.vlgmr.msra.gmra.mxu1 %vm641_vm1, %v3370_v6 }
 0x96d   : > { %v5755_v30 = vpop.f32.mrf.mxu0 }
 0x96f   : > { %v5757_v14 = vpop.f32.mrf.mxu0 }
 0x978   : > { %v5759_v58 = vpop.f32.mrf.mxu0 }
 0x97a   : > { %v5761_v1 = vpop.f32.mrf.mxu0 }
 0x97e   : > { %v5763_v18 = vpop.f32.mrf.mxu1 }
 0x980   : > { %v4715_v24 = vpop.f32.mrf.mxu0  ;;  %v5771_v33 = vpop.f32.mrf.mxu1 }
 0x981   : > { %v3182_v7 = vadd.f32 %v4715_v24, %v4331_v16 }
 0x982   : > { %v3176_v22 = vpop.f32.mrf.mxu0 }
 0x983   : > { %v3459_v55 = vadd.f32 %v4959_v19, %v3182_v7  ;;  %v3177_v63 = vadd.f32 %v4330_v38, %v3176_v22  ;;  %v4965_v22 = vld [vmem:[%s5968_s8 + $0x38] sm:$0xff] }
 0x984   : > { %v5780_v45 = vpop.f32.mrf.mxu1 }
 0x985   : > { %v3458_v42 = vadd.f32 %v4960_v48, %v3177_v63  ;;  %v3469_v29 = vsel %vm1008_vm2, %v3459_v55, -inf  ;;  %v4966_v48 = vld [vmem:[%s5968_s8 + $0x30] sm:$0xff] }
 0x986   : > { %3470 = vmax.xlane.f32.xlu1 %v3469_v29  ;;  %v5783_v56 = vpop.f32.mrf.mxu1 }
 0x987   : > { %v3466_v53 = vsel %vm1008_vm2, %v3458_v42, -inf }
 0x988   : > { %3467 = vmax.xlane.f32.xlu0 %v3466_v53 }
 0x989   : > { %v4729_v17 = vpop.f32.mrf.mxu0 }
 0x98a   : > { %v3364_v25 = vadd.f32 %v4729_v17, %v4331_v16 }
 0x98b   : > { %v3358_v4 = vpop.f32.mrf.mxu0 }
 0x98c   : > { %v3463_v21 = vadd.f32 %v4961_v46, %v3364_v25  ;;  %v4722_v52 = vpop.f32.mrf.mxu1  ;;  %v3359_v36 = vadd.f32 %v4330_v38, %v3358_v4 }
 0x98d   : > { %v3273_v50 = vadd.f32 %v4722_v52, %v4331_v16 }
 0x98e   : > { %v3267_v47 = vpop.f32.mrf.mxu1  ;;  %v3481_v40 = vsel %vm1008_vm2, %v3463_v21, -inf  ;;  %v3462_v37 = vadd.f32 %v4964_v43, %v3359_v36 }
 0x98f   : > { %v3461_v62 = vadd.f32 %v4962_v28, %v3273_v50  ;;  %v3268_v41 = vadd.f32 %v4330_v38, %v3267_v47  ;;  %3482 = vmax.xlane.f32.xlu1 %v3481_v40 }
 0x990   : > { %v3478_v53 = vsel %vm1008_vm2, %v3462_v37, -inf }
 0x991   : > { %v3460_v13 = vadd.f32 %v4963_v12, %v3268_v41  ;;  %v3475_v11 = vsel %vm1008_vm2, %v3461_v62, -inf }
 0x992   : > { %3476 = vmax.xlane.f32.xlu0 %v3475_v11 }
 0x993   : > { %v3472_v24 = vsel %vm1008_vm2, %v3460_v13, -inf }
 0x994   : > { %v4736_v60 = vpop.f32.mrf.mxu1 }
 0x995   : > { %v3455_v6 = vadd.f32 %v4736_v60, %v4331_v16 }
 0x996   : > { %3473 = vmax.xlane.f32.xlu0 %v3472_v24  ;;  %v3449_v7 = vpop.f32.mrf.mxu1 }
 0x997   : > { %v3465_v19 = vadd.f32 %v4965_v22, %v3455_v6  ;;  %v3450_v63 = vadd.f32 %v4330_v38, %v3449_v7 }
 0x999   : > { %v3464_v29 = vadd.f32 %v4966_v48, %v3450_v63  ;;  %v3487_v17 = vsel %vm1008_vm2, %v3465_v19, -inf }
 0x99a   : > { %3479 = vmax.xlane.f32.xlu0 %v3478_v53  ;;  %3488 = vmax.xlane.f32.xlu1 %v3487_v17 }
 0x99b   : > { %v3484_v16 = vsel %vm1008_vm2, %v3464_v29, -inf }
 0x99e   : > { %3485 = vmax.xlane.f32.xlu0 %v3484_v16 }
 0x9ab   : > { %3562 = vrot.lane.b32.xlu1 %v5142_v59, %s4985_s15 }
 0x9af   : > { %3651 = vrot.lane.b32.xlu1 %v5149_v61, %s4985_s15 }
 0x9b3   : > { %3649 = vrot.lane.b32.xlu1 %v5156_v2, %s4985_s15 }
 0x9b4   : > { %3564 = vrot.lane.b32.xlu0 %v5140_v57, %s4985_s15 }
 0x9b7   : > { %3736 = vrot.lane.b32.xlu1 %v5158_v3, %s4985_s15 }
 0x9b8   : > { %3738 = vrot.lane.b32.xlu0 %v5153_v0, %s4985_s15 }
 0xa0f   : > { %v3471_v38 = vpop.xlane.xlu1 %3470 }
 0xa10   : > { %v3491_v25 = vsub.f32 %v3459_v55, %v3471_v38 }
 0xa11   : > { %v3468_v46 = vpop.xlane.xlu0 %3467 }
 0xa12   : > { %v3500_v52 = vmul.f32 1.442695, %v3491_v25  ;;  %v3490_v59 = vsub.f32 %v3458_v42, %v3468_v46 }
 0xa14   : > { %4927 = vpow2.f32 %v3500_v52  ;;  %v3498_v50 = vmul.f32 1.442695, %v3490_v59 }
 0xa16   : > { %4929 = vpow2.f32 %v3498_v50 }
 0xa18   : > { %v3483_v61 = vpop.xlane.xlu1 %3482 }
 0xa19   : > { %v3495_v4 = vsub.f32 %v3463_v21, %v3483_v61 }
 0xa1b   : > { %v3508_v2 = vmul.f32 1.442695, %v3495_v4  ;;  %v3477_v47 = vpop.xlane.xlu0 %3476 }
 0xa1c   : > { %v3493_v40 = vsub.f32 %v3461_v62, %v3477_v47 }
 0xa1d   : > { %4931 = vpow2.f32 %v3508_v2 }
 0xa1e   : > { %v3504_v57 = vmul.f32 1.442695, %v3493_v40 }
 0xa1f   : > { %v3474_v28 = vpop.xlane.xlu0 %3473 }
 0xa20   : > { %4933 = vpow2.f32 %v3504_v57  ;;  %v3492_v42 = vsub.f32 %v3460_v13, %v3474_v28 }
 0xa21   : > { %v5821_v3 = vpop.eup %4927 }
 0xa22   : > { %v3517_v0 = vsel %vm1008_vm2, %v5821_v3, 0.0  ;;  %v3502_v43 = vmul.f32 1.442695, %v3492_v42 }
 0xa23   : > { %v5825_v55 = vpop.eup %4929  ;;  %v3489_v41 = vpop.xlane.xlu1 %3488  ;;  %3518 = vadd.xlane.f32.xlu1 %v3517_v0 }
 0xa24   : > { %v3480_v36 = vpop.xlane.xlu0 %3479  ;;  %v3497_v12 = vsub.f32 %v3465_v19, %v3489_v41  ;;  %v3514_v62 = vsel %vm1008_vm2, %v5825_v55, 0.0 }
 0xa25   : > { %v3494_v21 = vsub.f32 %v3462_v37, %v3480_v36  ;;  %3515 = vadd.xlane.f32.xlu0 %v3514_v62  ;;  %v4034_v36 = vld [vmem:[%s5965_s5 + $0x18] sm:$0xff]  ;;  %v4031_v62 = vld [vmem:[%s5965_s5] sm:$0xff] }
 0xa26   : > { %v3512_v11 = vmul.f32 1.442695, %v3497_v12  ;;  %v4033_v12 = vld [vmem:[%s5965_s5 + $0x10] sm:$0xff] }
 0xa27   : > { %v3506_v60 = vmul.f32 1.442695, %v3494_v21  ;;  %v3563_v6 = vpop.permute.xlu1 %3562  ;;  %v4032_v21 = vld [vmem:[%s5965_s5 + $0x8] sm:$0xff] }
 0xa28   : > { %v3486_v24 = vpop.xlane.xlu0 %3485  ;;  %4935 = vpow2.f32 %v3512_v11 }
 0xa29   : > { %v3496_v7 = vsub.f32 %v3464_v29, %v3486_v24  ;;  %4937 = vpow2.f32 %v3506_v60 }
 0xa2a   : > { %v5829_v22 = vpop.eup %4931  ;;  %4939 = vpow2.f32 %v3502_v43 }
 0xa2b   : > { %v3510_v13 = vmul.f32 1.442695, %v3496_v7  ;;  %v3652_v63 = vpop.permute.xlu1 %3651  ;;  %v3529_v37 = vsel %vm1008_vm2, %v5829_v22, 0.0 }
 0xa2c   : > { %v3565_v48 = vpop.permute.xlu0 %3564  ;;  %4744 = vmatprep.subr.mxu1 %v3652_v63  ;;  %3530 = vadd.xlane.f32.xlu1 %v3529_v37 }
 0xa2d   : > { %4737 = vmatprep.subr.mxu0 %v3565_v48  ;;  %v5833_v19 = vpop.eup %4933  ;;  %4745 = vmatpush3.msra.mxu1 %v3652_v63  ;;  %4941 = vpow2.f32 %v3510_v13 }
 0xa2e   : > { %4738 = vmatpush3.msra.mxu0 %v3565_v48  ;;  %v3523_v17 = vsel %vm1008_vm2, %v5833_v19, 0.0 }
 0xa2f   : > { %4739 = vmatprep.subr.mxu0 %v3563_v6  ;;  %v3650_v29 = vpop.permute.xlu1 %3649 }
 0xa30   : > { %4740 = vmatpush3.msra.mxu0 %v3563_v6  ;;  %v3739_v53 = vpop.permute.xlu0 %3738  ;;  %4746 = vmatprep.subr.mxu1 %v3650_v29 }
 0xa31   : > { %4751 = vmatprep.subr.mxu0 %v3739_v53  ;;  %4747 = vmatpush3.msra.mxu1 %v3650_v29 }
 0xa32   : > { %3524 = vadd.xlane.f32.xlu1 %v3523_v17 }
 0xa35   : > { %v5837_v16 = vpop.eup %4935 }
 0xa36   : > { %v4938_v38 = vpop.eup %4937  ;;  %v3535_v25 = vsel %vm1008_vm2, %v5837_v16, 0.0 }
 0xa37   : > { %3536 = vadd.xlane.f32.xlu1 %v3535_v25  ;;  %v3526_v46 = vsel %vm1008_vm2, %v4938_v38, 0.0  ;;  %v4940_v52 = vpop.eup %4939 }
 0xa38   : > { %3527 = vadd.xlane.f32.xlu0 %v3526_v46  ;;  %v3520_v59 = vsel %vm1008_vm2, %v4940_v52, 0.0 }
 0xa3a   : > { %v5843_v50 = vpop.eup %4941 }
 0xa3b   : > { %v3532_v61 = vsel %vm1008_vm2, %v5843_v50, 0.0 }
 0xa3c   : > { %3521 = vadd.xlane.f32.xlu0 %v3520_v59 }
 0xa40   : > { %3533 = vadd.xlane.f32.xlu0 %v3532_v61 }
 0xa48   : > { %3823 = vrot.lane.b32.xlu1 %v5171_v8, %s4985_s15 }
 0xa4c   : > { %3920 = vrot.lane.b32.xlu1 %v5586_v23, %s4986_s16 }
 0xa50   : > { %3952 = vrot.lane.b32.xlu1 %v5755_v30, %s4987_s17 }
 0xa54   : > { %3924 = vrot.lane.b32.xlu1 %v5594_v49, %s4986_s16 }
 0xa56   : > { %3825 = vrot.lane.b32.xlu0 %v5161_v5, %s4985_s15  ;;  %v3737_v5 = vpop.permute.xlu1 %3736 }
 0xa58   : > { %3956 = vrot.lane.b32.xlu1 %v5763_v18, %s4987_s17 }
 0xa5a   : > { %3918 = vrot.lane.b32.xlu0 %v5588_v15, %s4986_s16 }
 0xa5c   : > { %3928 = vrot.lane.b32.xlu1 %v5590_v10, %s4986_s16 }
 0xa5e   : > { %3950 = vrot.lane.b32.xlu0 %v5757_v14, %s4987_s17 }
 0xa60   : > { %3960 = vrot.lane.b32.xlu1 %v5759_v58, %s4987_s17 }
 0xa62   : > { %3922 = vrot.lane.b32.xlu0 %v5602_v35, %s4986_s16 }
 0xa64   : > { %3932 = vrot.lane.b32.xlu1 %v5607_v26, %s4986_s16 }
 0xa66   : > { %3954 = vrot.lane.b32.xlu0 %v5771_v33, %s4987_s17 }
 0xa6a   : > { %3926 = vrot.lane.b32.xlu0 %v5592_v9, %s4986_s16 }
 0xa6e   : > { %3958 = vrot.lane.b32.xlu0 %v5761_v1, %s4987_s17 }
 0xa72   : > { %3930 = vrot.lane.b32.xlu0 %v5610_v39, %s4986_s16 }
 0xaac   : > { %v3519_v8 = vpop.xlane.xlu1 %3518 }
 0xaad   : > { %4943 = vrcp.f32 %v3519_v8 }
 0xaae   : > { %v3516_v23 = vpop.xlane.xlu0 %3515 }
 0xaaf   : > { %4945 = vrcp.f32 %v3516_v23 }
 0xab5   : > { %v3531_v49 = vpop.xlane.xlu1 %3530 }
 0xab6   : > { %4947 = vrcp.f32 %v3531_v49 }
 0xaba   : > { %v4944_v15 = vpop.eup %4943 }
 0xabb   : > { %v3555_v26 = vmul.f32 %v4944_v15, %v5821_v3  ;;  %v3525_v39 = vpop.xlane.xlu1 %3524 }
 0xabc   : > { %v4946_v10 = vpop.eup %4945 }
 0xabd   : > { %v3554_v35 = vmul.f32 %v4946_v10, %v5825_v55 }
 0xabf   : > { %4741 = vmatprep.mubr.msk.f32.mxu0 %vm1008_vm2, %v3554_v35 }
 0xac0   : > { %4742 = vmatmul.mubr.msk.f32.vlgmr.msra.gmra.mxu0 %vm1008_vm2, %v3555_v26  ;;  %v3537_v14 = vpop.xlane.xlu1 %3536 }
 0xac1   : > { %v3528_v9 = vpop.xlane.xlu0 %3527  ;;  %4752 = vmatpush3.msra.mxu0 %v3739_v53 }
 0xac2   : > { %4949 = vrcp.f32 %v3528_v9  ;;  %4753 = vmatprep.subr.mxu0 %v3737_v5 }
 0xac3   : > { %4754 = vmatpush3.msra.mxu0 %v3737_v5  ;;  %4951 = vrcp.f32 %v3525_v39  ;;  %v4948_v18 = vpop.eup %4947 }
 0xac4   : > { %v3559_v2 = vmul.f32 %v4948_v18, %v5829_v22  ;;  %v3824_v55 = vpop.permute.xlu1 %3823  ;;  %4765 = vmatprep.subr.mxu0 %v4034_v36 }
 0xac5   : > { %v3522_v30 = vpop.xlane.xlu0 %3521 }
 0xac6   : > { %4953 = vrcp.f32 %v3522_v30 }
 0xac7   : > { %4955 = vrcp.f32 %v3537_v14 }
 0xac8   : > { %v3921_v63 = vpop.permute.xlu1 %3920 }
 0xac9   : > { %v3534_v58 = vpop.xlane.xlu0 %3533  ;;  %v4007_v61 = vsel %vm641_vm1, %v5421_v27, %v3921_v63 }
 0xaca   : > { %4957 = vrcp.f32 %v3534_v58 }
 0xacc   : > { %v3953_v37 = vpop.permute.xlu1 %3952 }
 0xacd   : > { %v3826_v1 = vpop.permute.xlu0 %3825  ;;  %v4015_v23 = vsel %vm1008_vm2, %v4007_v61, %v3953_v37 }
 0xace   : > { %4758 = vmatprep.subr.mxu1 %v3826_v1 }
 0xacf   : > { %v4950_v33 = vpop.eup %4949 }
 0xad0   : > { %v3558_v4 = vmul.f32 %v4950_v33, %v4938_v38  ;;  %v4952_v47 = vpop.eup %4951  ;;  %v3925_v29 = vpop.permute.xlu1 %3924 }
 0xad1   : > { %v3557_v28 = vmul.f32 %v4952_v47, %v5833_v19  ;;  %v3919_v48 = vpop.permute.xlu0 %3918  ;;  %v4009_v27 = vsel %vm641_vm1, %v5432_v20, %v3925_v29 }
 0xad2   : > { %4755 = vmatprep.mubr.msk.f32.mxu0 %vm1008_vm2, %v3558_v4 }
 0xad3   : > { %v4954_v40 = vpop.eup %4953  ;;  %4756 = vmatmul.mubr.msk.f32.vlgmr.msra.gmra.mxu0 %vm1008_vm2, %v3559_v2 }
 0xad4   : > { %v3556_v57 = vmul.f32 %v4954_v40, %v4940_v52  ;;  %v4956_v3 = vpop.eup %4955  ;;  %4766 = vmatpush3.msra.mxu0 %v4034_v36  ;;  %v3957_v17 = vpop.permute.xlu1 %3956 }
 0xad5   : > { %v3561_v41 = vmul.f32 %v4956_v3, %v5837_v16  ;;  %4767 = vmatprep.subr.mxu0 %v4033_v12  ;;  %v3951_v19 = vpop.permute.xlu0 %3950  ;;  %v4017_v30 = vsel %vm1008_vm2, %v4009_v27, %v3957_v17 }
 0xad6   : > { %4748 = vmatprep.mubr.msk.f32.mxu1 %vm1008_vm2, %v3556_v57  ;;  %4768 = vmatpush3.msra.mxu0 %v4033_v12 }
 0xad7   : > { %v4958_v0 = vpop.eup %4957  ;;  %4749 = vmatmul.mubr.msk.f32.vlgmr.msra.gmra.mxu1 %vm1008_vm2, %v3557_v28  ;;  %4769 = vmatprep.subr.mxu0 %v4032_v21 }
 0xad8   : > { %4759 = vmatpush3.msra.mxu1 %v3826_v1  ;;  %v3560_v42 = vmul.f32 %v4958_v0, %v5843_v50  ;;  %4770 = vmatpush3.msra.mxu0 %v4032_v21  ;;  %v3929_v38 = vpop.permute.xlu1 %3928 }
 0xad9   : > { %4760 = vmatprep.subr.mxu1 %v3824_v55  ;;  %4771 = vmatprep.subr.mxu0 %v4031_v62  ;;  %v3923_v53 = vpop.permute.xlu0 %3922  ;;  %v4011_v20 = vsel %vm641_vm1, %v5425_v32, %v3929_v38 }
 0xada   : > { %4761 = vmatpush3.msra.mxu1 %v3824_v55  ;;  %4762 = vmatprep.mubr.msk.f32.mxu1 %vm1008_vm2, %v3560_v42  ;;  %v4008_v26 = vsel %vm641_vm1, %v5437_v44, %v3923_v53 }
 0xadb   : > { %4763 = vmatmul.mubr.msk.f32.vlgmr.msra.gmra.mxu1 %vm1008_vm2, %v3561_v41  ;;  %4772 = vmatpush3.msra.mxu0 %v4031_v62 }
 0xadc   : > { %v3961_v46 = vpop.permute.xlu1 %3960 }
 0xadd   : > { %v3955_v16 = vpop.permute.xlu0 %3954  ;;  %v4019_v4 = vsel %vm1008_vm2, %v4011_v20, %v3961_v46 }
 0xade   : > { %v4016_v9 = vsel %vm1008_vm2, %v4008_v26, %v3955_v16 }
 0xae1   : > { %v3927_v25 = vpop.permute.xlu0 %3926 }
 0xae2   : > { %v4010_v14 = vsel %vm641_vm1, %v5427_v34, %v3927_v25 }
 0xae5   : > { %v3959_v52 = vpop.permute.xlu0 %3958 }
 0xae6   : > { %v4018_v1 = vsel %vm1008_vm2, %v4010_v14, %v3959_v52 }
 0xae9   : > { %v3931_v59 = vpop.permute.xlu0 %3930 }
 0xaea   : > { %v4012_v47 = vsel %vm641_vm1, %v5445_v54, %v3931_v59  ;;  %v4356_v54 = vld [vmem:[%s5966_s6] ss:$0 sm:$0xff] }
 0xb80   : > { %v4743_v11 = vpop.f32.mrf.mxu0 }
 0xb81   : > { %3984 = vrot.lane.b32.xlu1 %v4743_v11, %s4988_s26 }
 0xb82   : > { %v3640_v60 = vpop.f32.mrf.mxu0 }
 0xb83   : > { %3982 = vrot.lane.b32.xlu0 %v3640_v60, %s4988_s26 }
 0xb93   : > { %v4757_v43 = vpop.f32.mrf.mxu0 }
 0xb94   : > { %3992 = vrot.lane.b32.xlu1 %v4757_v43, %s4988_s26 }
 0xb95   : > { %v3814_v6 = vpop.f32.mrf.mxu0 }
 0xb96   : > { %3990 = vrot.lane.b32.xlu0 %v3814_v6, %s4988_s26 }
 0xb97   : > { %v4750_v24 = vpop.f32.mrf.mxu1 }
 0xb98   : > { %3988 = vrot.lane.b32.xlu1 %v4750_v24, %s4988_s26 }
 0xb99   : > { %v3727_v7 = vpop.f32.mrf.mxu1 }
 0xb9a   : > { %3986 = vrot.lane.b32.xlu0 %v3727_v7, %s4988_s26 }
 0xb9b   : > { %v4764_v22 = vpop.f32.mrf.mxu1 }
 0xb9c   : > { %3964 = vrot.lane.b32.xlu1 %v5780_v45, %s4987_s17  ;;  %v3933_v45 = vpop.permute.xlu1 %3932 }
 0xb9d   : > { %v3901_v13 = vpop.f32.mrf.mxu1  ;;  %v4013_v57 = vsel %vm641_vm1, %v5442_v51, %v3933_v45 }
 0xb9e   : > { %3962 = vrot.lane.b32.xlu0 %v5783_v56, %s4987_s17  ;;  %v4006_v56 = vsel %vm641_vm1, %v5423_v31, %v3919_v48 }
 0xb9f   : > { %v4014_v5 = vsel %vm1008_vm2, %v4006_v56, %v3951_v19 }
 0xba0   : > { %3996 = vrot.lane.b32.xlu1 %v4764_v22, %s4988_s26 }
 0xba2   : > { %3994 = vrot.lane.b32.xlu0 %v3901_v13, %s4988_s26 }
 0xbf3   : > { %v3985_v50 = vpop.permute.xlu1 %3984 }
 0xbf4   : > { %v4024_v10 = vsel %vm4022_vm3, %v4015_v23, %v3985_v50 }
 0xbf5   : > { %v3983_v8 = vpop.permute.xlu0 %3982 }
 0xbf6   : > { %v4023_v15 = vsel %vm4022_vm3, %v4014_v5, %v3983_v8 }
 0xbf7   : > { %4773 = vmatprep.mubr.msk.f32.mxu0 %vm341_vm0, %v4023_v15 }
 0xbf8   : > { %4774 = vmatmul.mubr.msk.f32.vlgmr.msra.gmra.mxu0 %vm341_vm0, %v4024_v10 }
 0xc06   : > { %v3993_v49 = vpop.permute.xlu1 %3992 }
 0xc07   : > { %v4028_v2 = vsel %vm4022_vm3, %v4019_v4, %v3993_v49 }
 0xc08   : > { %v3991_v31 = vpop.permute.xlu0 %3990 }
 0xc09   : > { %v4027_v44 = vsel %vm4022_vm3, %v4018_v1, %v3991_v31 }
 0xc0a   : > { %v3989_v35 = vpop.permute.xlu1 %3988 }
 0xc0b   : > { %v4026_v18 = vsel %vm4022_vm3, %v4017_v30, %v3989_v35 }
 0xc0c   : > { %v3987_v39 = vpop.permute.xlu0 %3986 }
 0xc0d   : > { %v4025_v58 = vsel %vm4022_vm3, %v4016_v9, %v3987_v39 }
 0xc0e   : > { %v3965_v33 = vpop.permute.xlu1 %3964  ;;  %4776 = vmatprep.mubr.msk.f32.mxu0 %vm341_vm0, %v4025_v58 }
 0xc0f   : > { %4777 = vmatmul.mubr.msk.f32.gmra.mxu0 %vm341_vm0, %v4026_v18  ;;  %v4021_v3 = vsel %vm1008_vm2, %v4013_v57, %v3965_v33 }
 0xc10   : > { %4779 = vmatprep.mubr.msk.f32.mxu0 %vm341_vm0, %v4027_v44  ;;  %v3963_v34 = vpop.permute.xlu0 %3962 }
 0xc11   : > { %v4020_v28 = vsel %vm1008_vm2, %v4012_v47, %v3963_v34 }
 0xc12   : > { %v3997_v40 = vpop.permute.xlu1 %3996 }
 0xc13   : > { %4780 = vmatmul.mubr.msk.f32.gmra.mxu0 %vm341_vm0, %v4028_v2  ;;  %v4030_v55 = vsel %vm4022_vm3, %v4021_v3, %v3997_v40 }
 0xc14   : > { %v3995_v32 = vpop.permute.xlu0 %3994 }
 0xc15   : > { %v4029_v0 = vsel %vm4022_vm3, %v4020_v28, %v3995_v32 }
 0xc16   : > { %4782 = vmatprep.mubr.msk.f32.mxu0 %vm341_vm0, %v4029_v0 }
 0xc17   : > { %4783 = vmatmul.mubr.msk.f32.gmra.mxu0 %vm341_vm0, %v4030_v55 }
 0xcb8   : > { %v4775_v51 = vpop.f32.mrf.mxu0 }
 0xcb9   : > { %v4138_v42 = vadd.f32 %v4775_v51, %v4356_v54 }
 0xcba   : > { %v4132_v41 = vpop.f32.mrf.mxu0 }
 0xcbb   : > { %4172 = vst.msk [vmem:[%s332_s13 + $0x8] sm:$0xff] %vm341_vm0, %v4138_v42  ;;  %v4133_v36 = vadd.f32 %v4356_v54, %v4132_v41 }
 0xcbd   : > { %4171 = vst.msk [vmem:[%s332_s13] sm:$0xff] %vm341_vm0, %v4133_v36 }
 0xccf   : > { %v4778_v12 = vpop.f32.mrf.mxu0 }
 0xcd0   : > { %v4148_v21 = vadd.f32 %v4778_v12, %v4356_v54 }
 0xcd1   : > { %v4142_v62 = vpop.f32.mrf.mxu0 }
 0xcd2   : > { %4174 = vst.msk [vmem:[%s332_s13 + $0x18] sm:$0xff] %vm341_vm0, %v4148_v21  ;;  %v4143_v11 = vadd.f32 %v4356_v54, %v4142_v62 }
 0xcd3   : > { %v4781_v60 = vpop.f32.mrf.mxu0 }
 0xcd4   : > { %4173 = vst.msk [vmem:[%s332_s13 + $0x10] sm:$0xff] %vm341_vm0, %v4143_v11  ;;  %v4158_v43 = vadd.f32 %v4781_v60, %v4356_v54 }
 0xcd5   : > { %v4152_v6 = vpop.f32.mrf.mxu0 }
 0xcd6   : > { %4176 = vst.msk [vmem:[%s332_s13 + $0x28] sm:$0xff] %vm341_vm0, %v4158_v43  ;;  %v4153_v24 = vadd.f32 %v4356_v54, %v4152_v6 }
 0xcd7   : > { %v4784_v7 = vpop.f32.mrf.mxu0 }
 0xcd8   : > { %4175 = vst.msk [vmem:[%s332_s13 + $0x20] sm:$0xff] %vm341_vm0, %v4153_v24  ;;  %v4168_v22 = vadd.f32 %v4784_v7, %v4356_v54 }
 0xcd9   : > { %v4162_v13 = vpop.f32.mrf.mxu0 }
 0xcda   : > { %4178 = vst.msk [vmem:[%s332_s13 + $0x38] sm:$0xff] %vm341_vm0, %v4168_v22  ;;  %v4163_v63 = vadd.f32 %v4356_v54, %v4162_v13 }
 0xcdc   : > { %4177 = vst.msk [vmem:[%s332_s13 + $0x30] sm:$0xff] %vm341_vm0, %v4163_v63 }
 0xcdd PF: > { %s19_s30 = sadd.s32 1, %s4973_s30  }
 0xcde   : > { %p16_p4 = scmp.ge.s32.totalorder %s19_s30, 4  }
 0xce0   :  { %18 = sbr.rel (!%p16_p4) target bundleno = 1 (0x1), region = 89 }

</bundles_post_ra>
